<compile_context>
chip_gen: v7x
topology: tpu7x:2x2x1
jax: 0.10.0
libtpu: 0.0.40
codegen_flags: <defaults>
</compile_context>

<pallas_src>
import functools

import jax
import jax.numpy as jnp
from jax.experimental import pallas as pl
from jax.experimental.pallas import tpu as pltpu


def _round_up(x, m):
    return (x + m - 1) // m * m


def _vmem_limit_bytes():
    """~3/4 of per-core physical VMEM (48 MiB v7x, 96 MiB v5e/v6e)."""
    phys = None
    try:
        info = pltpu.get_tpu_info()
        phys = getattr(info, "vmem_capacity_bytes", None)
    except Exception:
        phys = None
    if not phys:
        phys = 64 * 1024 * 1024          # conservative fallback (v7x per-core)
    return int(phys) * 3 // 4


def _choose_strip_h(H, W, N, Cp, Pp):
    """Largest divisor of H that fits a VMEM row budget and keeps >=2 grid steps."""
    # Rough live bytes per output row: input slab + residual/out (f32, Cp) and
    # conv1/conv2 f32 activations + bf16 scratch/patch (Pp).
    bytes_per_row = 8 * Cp + 12 * Pp
    max_rows = max(W, (8 << 20) // max(bytes_per_row, 1))
    best = 1
    for d in range(1, H + 1):
        if H % d:
            continue
        if d * W > max_rows and d > 1:
            continue
        if N * (H // d) < 2 and (N * H) >= 2:
            continue                      # keep both v7x TensorCores busy
        best = d
    return best


def _bottleneck_kernel(x_ref, w1_ref, s1_ref, b1_ref,
                       w2_ref, s2_ref, b2_ref,
                       w3_ref, s3_ref, b3_ref,
                       o_ref, ypad_ref, *, strip_h, W, num_strips):
    """One grid step == one (image, H-strip).  x_ref holds the H-padded image."""
    s = pl.program_id(1)
    row0 = s * strip_h
    if strip_h % 8 == 0:
        row0 = pl.multiple_of(row0, strip_h)   # aligned-load hint

    Cp = x_ref.shape[-1]          # padded channels (multiple of 128)
    Pp = w1_ref.shape[-1]         # padded bottleneck planes (multiple of 128)
    hh = strip_h + 2              # strip rows + 1-row halo top/bottom
    bf16 = jnp.bfloat16

    # ---- conv1 (1x1) + bn1 + relu over the strip + its halo rows ------------
    xh = x_ref[0, pl.ds(row0, hh)]                       # (hh, W, Cp) f32
    y1 = jnp.dot(xh.reshape(hh * W, Cp).astype(bf16), w1_ref[...],
                 preferred_element_type=jnp.float32)     # (hh*W, Pp) f32
    y1 = jnp.maximum(y1 * s1_ref[...] + b1_ref[...], 0.0)

    # ---- conv2's zero-padded input, written ONCE into bf16 VMEM scratch ------
    # Column layout: [0,1] left pad (col 1 is the conv pad), [2, W+2) interior
    # (pack-aligned start for the big bf16 store), [W+2, W+4) right pad.
    ypad_ref[:, pl.ds(2, W), :] = y1.reshape(hh, W, Pp).astype(bf16)
    zcols = jnp.zeros((hh, 2, Pp), bf16)
    ypad_ref[:, pl.ds(0, 2), :] = zcols                  # left pad columns
    ypad_ref[:, pl.ds(W + 2, 2), :] = zcols              # right pad columns

    zrow = jnp.zeros((1, W + 4, Pp), bf16)

    @pl.when(s == 0)
    def _():                                             # top image border
        ypad_ref[pl.ds(0, 1)] = zrow

    @pl.when(s == num_strips - 1)
    def _():                                             # bottom image border
        ypad_ref[pl.ds(hh - 1, 1)] = zrow

    # ---- conv2 (3x3, stride 1, pad 1): dw-grouped im2col, 3 MXU matmuls ------
    acc2 = jnp.zeros((strip_h * W, Pp), jnp.float32)
    for dw in range(3):
        col = ypad_ref[:, pl.ds(dw + 1, W), :]           # (hh, W, Pp) bf16
        # dh windows are free major-axis slices of the loaded column view.
        patch = jnp.concatenate([col[dh:dh + strip_h] for dh in range(3)],
                                axis=-1)                 # (strip_h, W, 3*Pp)
        acc2 = acc2 + jnp.dot(patch.reshape(strip_h * W, 3 * Pp), w2_ref[dw],
                              preferred_element_type=jnp.float32)
    y2 = jnp.maximum(acc2 * s2_ref[...] + b2_ref[...], 0.0)   # (strip_h*W, Pp)

    # ---- conv3 (1x1) + bn3 + residual add + relu -----------------------------
    y3 = jnp.dot(y2.astype(bf16), w3_ref[...],
                 preferred_element_type=jnp.float32)     # (strip_h*W, Cp)
    y3 = y3 * s3_ref[...] + b3_ref[...]
    xres = xh[1:1 + strip_h].reshape(strip_h * W, Cp)    # reuse loaded slab
    out = jnp.maximum(y3 + xres, 0.0)
    o_ref[0] = out.reshape(strip_h, W, Cp).astype(o_ref.dtype)


def bottleneck_pallas(x_nhwc, params, *, strip_h=None):
    """x_nhwc: (N, H, W, Cin) float32.  Returns (N, H, W, 4*planes) float32."""
    N, H, W, Cin = x_nhwc.shape
    w1, s1, b1, w2, s2, b2, w3, s3, b3 = params
    P = w1.shape[-1]
    Cout = w3.shape[-1]
    assert Cin == Cout, "downsample=None requires inplanes == planes * 4"

    Cp = _round_up(Cin, 128)      # lane-align channels
    Pp = _round_up(P, 128)        # lane-align bottleneck planes

    if strip_h is None:
        strip_h = _choose_strip_h(H, W, N, Cp, Pp)
    assert H % strip_h == 0
    num_strips = H // strip_h

    bf16 = jnp.bfloat16

    # Pad H by 1 top/bottom (3x3 halo) and channels to Cp, in one XLA pad.
    x_ext = jnp.pad(x_nhwc, ((0, 0), (1, 1), (0, 0), (0, Cp - Cin)))

    # Weights: zero-pad channels, cast to bf16 (halves HBM/VMEM bytes, MXU peak).
    w1p = jnp.pad(w1, ((0, Cp - Cin), (0, Pp - P))).astype(bf16)         # (Cp, Pp)
    w2p = jnp.pad(w2, ((0, 0), (0, 0), (0, Pp - P), (0, Pp - P)))        # (3,3,Pp,Pp)
    # Group by kw: (kw, kh*cin, cout) so the kernel runs 3 matmuls with K=3*Pp.
    w2g = jnp.transpose(w2p, (1, 0, 2, 3)).reshape(3, 3 * Pp, Pp).astype(bf16)
    w3p = jnp.pad(w3, ((0, Pp - P), (0, Cp - Cout))).astype(bf16)        # (Pp, Cp)
    # BN affines stay f32 (elementwise path).
    s1p = jnp.pad(s1, ((0, 0), (0, Pp - P)))
    b1p = jnp.pad(b1, ((0, 0), (0, Pp - P)))
    s2p = jnp.pad(s2, ((0, 0), (0, Pp - P)))
    b2p = jnp.pad(b2, ((0, 0), (0, Pp - P)))
    s3p = jnp.pad(s3, ((0, 0), (0, Cp - Cout)))
    b3p = jnp.pad(b3, ((0, 0), (0, Cp - Cout)))

    kernel = functools.partial(_bottleneck_kernel, strip_h=strip_h, W=W,
                               num_strips=num_strips)

    def const_spec(shape):
        # Constant block index: single-buffer (double buffering buys nothing).
        nd = len(shape)
        return pl.BlockSpec(shape, lambda n, s, nd=nd: (0,) * nd,
                            pipeline_mode=pl.Buffered(1))

    # Advisory cost estimate for XLA scheduling around the custom call.
    flops = 2 * N * H * W * (Cp * Pp + 9 * Pp * Pp + Pp * Cp)
    bytes_accessed = (x_ext.size + N * H * W * Cp) * 4 \
        + 2 * (w1p.size + w2g.size + w3p.size) \
        + 4 * (s1p.size + b1p.size + s2p.size + b2p.size + s3p.size + b3p.size)

    out_padded = pl.pallas_call(
        kernel,
        out_shape=jax.ShapeDtypeStruct((N, H, W, Cp), x_nhwc.dtype),
        grid_spec=pltpu.PrefetchScalarGridSpec(
            num_scalar_prefetch=0,
            grid=(N, num_strips),
            in_specs=[
                # Full padded image resident across the strip axis; constant in
                # the strip axis -> single-buffered to halve its VMEM footprint.
                pl.BlockSpec((1, H + 2, W, Cp), lambda n, s: (n, 0, 0, 0),
                             pipeline_mode=pl.Buffered(1)),
                const_spec((Cp, Pp)),         # w1 (bf16)
                const_spec((1, Pp)),          # bn1 scale
                const_spec((1, Pp)),          # bn1 bias
                const_spec((3, 3 * Pp, Pp)),  # w2, kw-grouped (bf16)
                const_spec((1, Pp)),          # bn2 scale
                const_spec((1, Pp)),          # bn2 bias
                const_spec((Pp, Cp)),         # w3 (bf16)
                const_spec((1, Cp)),          # bn3 scale
                const_spec((1, Cp)),          # bn3 bias
            ],
            out_specs=pl.BlockSpec((1, strip_h, W, Cp),
                                   lambda n, s: (n, s, 0, 0)),
            scratch_shapes=[
                # bf16 zero-padded conv2 input for one strip (written once/step)
                pltpu.VMEM((strip_h + 2, W + 4, Pp), jnp.bfloat16),
            ],
        ),
        compiler_params=pltpu.CompilerParams(
            dimension_semantics=("parallel", "parallel"),
            vmem_limit_bytes=_vmem_limit_bytes(),
        ),
        cost_estimate=pl.CostEstimate(flops=flops, transcendentals=0,
                                      bytes_accessed=bytes_accessed),
    )(x_ext, w1p, s1p, b1p, w2g, s2p, b2p, w3p, s3p, b3p)

    return out_padded[..., :Cout]


def _fold_bn(gamma, beta, mean, var, eps=1e-5):
    scale = gamma / jnp.sqrt(var + eps)
    bias = beta - mean * scale
    return scale[None, :], bias[None, :]          # (1, C) for lane broadcast


def make_params(key, inplanes, planes):
    """Deterministic synthetic parameters matching the PyTorch module shapes."""
    exp = 4
    ks = jax.random.split(key, 6)
    w1 = jax.random.normal(ks[0], (inplanes, planes), jnp.float32) * 0.1
    w2 = jax.random.normal(ks[1], (3, 3, planes, planes), jnp.float32) * 0.1
    w3 = jax.random.normal(ks[2], (planes, planes * exp), jnp.float32) * 0.1

    def bn(k, c):
        kg, kb, km, kv = jax.random.split(k, 4)
        gamma = 1.0 + 0.1 * jax.random.normal(kg, (c,), jnp.float32)
        beta = 0.1 * jax.random.normal(kb, (c,), jnp.float32)
        mean = 0.1 * jax.random.normal(km, (c,), jnp.float32)
        var = jnp.abs(jax.random.normal(kv, (c,), jnp.float32)) + 0.5
        return _fold_bn(gamma, beta, mean, var)

    s1, b1 = bn(ks[3], planes)
    s2, b2 = bn(ks[4], planes)
    s3, b3 = bn(ks[5], planes * exp)
    return (w1, s1, b1, w2, s2, b2, w3, s3, b3)


def bottleneck_reference(x_nhwc, params):
    """Pure-JAX reference with the same bf16-matmul / f32-elementwise math."""
    w1, s1, b1, w2, s2, b2, w3, s3, b3 = params
    N, H, W, Cin = x_nhwc.shape
    bf = jnp.bfloat16
    f32 = jnp.float32
    y = jnp.einsum('nhwc,cp->nhwp', x_nhwc.astype(bf), w1.astype(bf),
                   preferred_element_type=f32)
    y = jax.nn.relu(y * s1[0] + b1[0])
    yp = jnp.pad(y.astype(bf), ((0, 0), (1, 1), (1, 1), (0, 0)))
    acc = jnp.zeros(y.shape, f32)
    for kh in range(3):
        for kw in range(3):
            acc = acc + jnp.einsum('nhwc,cp->nhwp',
                                   yp[:, kh:kh + H, kw:kw + W, :],
                                   w2[kh, kw].astype(bf),
                                   preferred_element_type=f32)
    y = jax.nn.relu(acc * s2[0] + b2[0])
    y = jnp.einsum('nhwc,cp->nhwp', y.astype(bf), w3.astype(bf),
                   preferred_element_type=f32)
    y = y * s3[0] + b3[0]
    return jax.nn.relu(y + x_nhwc)


if __name__ == "__main__":
    # Module config: downsample=None, stride=1  =>  inplanes == planes * 4.
    planes = 4
    inplanes = planes * 4          # 16
    N, H, W = 2, 16, 16

    key = jax.random.PRNGKey(0)
    kx, kp = jax.random.split(key)
    x_nchw = jax.random.normal(kx, (N, inplanes, H, W), jnp.float32)  # PyTorch layout
    params = make_params(kp, inplanes, planes)

    x_nhwc = jnp.transpose(x_nchw, (0, 2, 3, 1))          # NCHW -> NHWC
    out_nhwc = bottleneck_pallas(x_nhwc, params)
    out_nchw = jnp.transpose(out_nhwc, (0, 3, 1, 2))      # back to NCHW
    jax.block_until_ready(out_nchw)

    ref = jnp.transpose(bottleneck_reference(x_nhwc, params), (0, 3, 1, 2))
    assert out_nchw.shape == (N, inplanes, H, W)
    max_err = float(jnp.max(jnp.abs(out_nchw - ref)))
    assert jnp.allclose(out_nchw, ref, atol=5e-3, rtol=5e-3), \
        f"mismatch vs reference (max abs err {max_err})"
    print("KERNEL_OK")
</pallas_src>

<mosaic_0001>
module attributes {stable_mosaic.version = 11 : i64} {
  func.func @_bottleneck_kernel(%arg0: i32, %arg1: i32, %arg2: memref<1x18x16x128xf32, #tpu.memory_space<vmem>>, %arg3: memref<128x128xbf16, #tpu.memory_space<vmem>>, %arg4: memref<1x128xf32, #tpu.memory_space<vmem>>, %arg5: memref<1x128xf32, #tpu.memory_space<vmem>>, %arg6: memref<3x384x128xbf16, #tpu.memory_space<vmem>>, %arg7: memref<1x128xf32, #tpu.memory_space<vmem>>, %arg8: memref<1x128xf32, #tpu.memory_space<vmem>>, %arg9: memref<128x128xbf16, #tpu.memory_space<vmem>>, %arg10: memref<1x128xf32, #tpu.memory_space<vmem>>, %arg11: memref<1x128xf32, #tpu.memory_space<vmem>>, %arg12: memref<1x16x16x128xf32, #tpu.memory_space<vmem>>, %arg13: memref<18x20x128xbf16, #tpu.memory_space<vmem>>) attributes {dimension_semantics = [#tpu.dimension_semantics<parallel>, #tpu.dimension_semantics<parallel>], iteration_bounds = array<i64: 2, 1>, scalar_prefetch = 0 : i64, scratch_operands = 1 : i64, tpu.core_type = #tpu.core_type<tc>, window_params = [{pipeline_mode = #tpu.pipeline_mode<synchronous>, transform_indices = @transform_0, window_bounds = array<i64: 1, 18, 16, 128>}, {pipeline_mode = #tpu.pipeline_mode<synchronous>, transform_indices = @transform_1, window_bounds = array<i64: 128, 128>}, {pipeline_mode = #tpu.pipeline_mode<synchronous>, transform_indices = @transform_2, window_bounds = array<i64: 1, 128>}, {pipeline_mode = #tpu.pipeline_mode<synchronous>, transform_indices = @transform_3, window_bounds = array<i64: 1, 128>}, {pipeline_mode = #tpu.pipeline_mode<synchronous>, transform_indices = @transform_4, window_bounds = array<i64: 3, 384, 128>}, {pipeline_mode = #tpu.pipeline_mode<synchronous>, transform_indices = @transform_5, window_bounds = array<i64: 1, 128>}, {pipeline_mode = #tpu.pipeline_mode<synchronous>, transform_indices = @transform_6, window_bounds = array<i64: 1, 128>}, {pipeline_mode = #tpu.pipeline_mode<synchronous>, transform_indices = @transform_7, window_bounds = array<i64: 128, 128>}, {pipeline_mode = #tpu.pipeline_mode<synchronous>, transform_indices = @transform_8, window_bounds = array<i64: 1, 128>}, {pipeline_mode = #tpu.pipeline_mode<synchronous>, transform_indices = @transform_9, window_bounds = array<i64: 1, 128>}, {transform_indices = @transform_10, window_bounds = array<i64: 1, 16, 16, 128>}]} {
    %c16_i32 = arith.constant 16 : i32
    %0 = arith.muli %arg1, %c16_i32 : i32
    %1 = tpu.assume_multiple %0, 16 : i32
    %c0 = arith.constant 0 : index
    %2 = arith.index_cast %1 : i32 to index
    %c0_0 = arith.constant 0 : index
    %c0_1 = arith.constant 0 : index
    %3 = vector.load %arg2[%c0, %2, %c0_0, %c0_1] : memref<1x18x16x128xf32, #tpu.memory_space<vmem>>, vector<1x18x16x128xf32>
    %4 = vector.shape_cast %3 : vector<1x18x16x128xf32> to vector<18x16x128xf32>
    %5 = vector.shape_cast %4 : vector<18x16x128xf32> to vector<288x128xf32>
    %6 = arith.truncf %5 : vector<288x128xf32> to vector<288x128xbf16>
    %c0_2 = arith.constant 0 : index
    %c0_3 = arith.constant 0 : index
    %7 = vector.load %arg3[%c0_2, %c0_3] : memref<128x128xbf16, #tpu.memory_space<vmem>>, vector<128x128xbf16>
    %cst = arith.constant dense<0.000000e+00> : vector<288x128xf32>
    %8 = tpu.matmul %6, %7, %cst {dimension_numbers = #tpu.dot_dimension_numbers<[1], [0], [0], [1], [0, 0, 1, 1], [], []>} : vector<288x128xbf16>, vector<128x128xbf16>, vector<288x128xf32> -> vector<288x128xf32>
    %c0_4 = arith.constant 0 : index
    %c0_5 = arith.constant 0 : index
    %9 = vector.load %arg4[%c0_4, %c0_5] : memref<1x128xf32, #tpu.memory_space<vmem>>, vector<1x128xf32>
    %10 = vector.broadcast %9 : vector<1x128xf32> to vector<288x128xf32>
    %11 = arith.mulf %8, %10 : vector<288x128xf32>
    %c0_6 = arith.constant 0 : index
    %c0_7 = arith.constant 0 : index
    %12 = vector.load %arg5[%c0_6, %c0_7] : memref<1x128xf32, #tpu.memory_space<vmem>>, vector<1x128xf32>
    %13 = vector.broadcast %12 : vector<1x128xf32> to vector<288x128xf32>
    %14 = arith.addf %11, %13 : vector<288x128xf32>
    %cst_8 = arith.constant 0.000000e+00 : f32
    %15 = vector.broadcast %cst_8 : f32 to vector<288x128xf32>
    %16 = arith.maximumf %14, %15 : vector<288x128xf32>
    %17 = vector.shape_cast %16 : vector<288x128xf32> to vector<18x16x128xf32>
    %18 = arith.truncf %17 : vector<18x16x128xf32> to vector<18x16x128xbf16>
    %c0_9 = arith.constant 0 : index
    %c2 = arith.constant 2 : index
    %c0_10 = arith.constant 0 : index
    %19 = vector.load %arg13[%c0_9, %c2, %c0_10] : memref<18x20x128xbf16, #tpu.memory_space<vmem>>, vector<18x16x128xbf16>
    tpu.vector_store %arg13[%c0_9, %c2, %c0_10], %18 {strides = array<i32>} : memref<18x20x128xbf16, #tpu.memory_space<vmem>>, vector<18x16x128xbf16>,
    %cst_11 = arith.constant 0.000000e+00 : bf16
    %20 = vector.broadcast %cst_11 : bf16 to vector<18x2x128xbf16>
    %c0_12 = arith.constant 0 : index
    %c0_13 = arith.constant 0 : index
    %c0_14 = arith.constant 0 : index
    %21 = vector.load %arg13[%c0_12, %c0_13, %c0_14] : memref<18x20x128xbf16, #tpu.memory_space<vmem>>, vector<18x2x128xbf16>
    tpu.vector_store %arg13[%c0_12, %c0_13, %c0_14], %20 {strides = array<i32>} : memref<18x20x128xbf16, #tpu.memory_space<vmem>>, vector<18x2x128xbf16>,
    %c0_15 = arith.constant 0 : index
    %c18 = arith.constant 18 : index
    %c0_16 = arith.constant 0 : index
    %22 = vector.load %arg13[%c0_15, %c18, %c0_16] : memref<18x20x128xbf16, #tpu.memory_space<vmem>>, vector<18x2x128xbf16>
    tpu.vector_store %arg13[%c0_15, %c18, %c0_16], %20 {strides = array<i32>} : memref<18x20x128xbf16, #tpu.memory_space<vmem>>, vector<18x2x128xbf16>,
    %cst_17 = arith.constant 0.000000e+00 : bf16
    %23 = vector.broadcast %cst_17 : bf16 to vector<1x20x128xbf16>
    %c0_i32 = arith.constant 0 : i32
    %24 = arith.cmpi eq, %arg1, %c0_i32 : i32
    %25 = arith.extui %24 : i1 to i32
    %c0_i32_18 = arith.constant 0 : i32
    %26 = arith.cmpi ne, %25, %c0_i32_18 : i32
    scf.if %26 {
      %c0_58 = arith.constant 0 : index
      %c0_59 = arith.constant 0 : index
      %c0_60 = arith.constant 0 : index
      %87 = vector.load %arg13[%c0_58, %c0_59, %c0_60] : memref<18x20x128xbf16, #tpu.memory_space<vmem>>, vector<1x20x128xbf16>
      tpu.vector_store %arg13[%c0_58, %c0_59, %c0_60], %23 {strides = array<i32>} : memref<18x20x128xbf16, #tpu.memory_space<vmem>>, vector<1x20x128xbf16>,
    } else {
    }
    %c0_i32_19 = arith.constant 0 : i32
    %27 = arith.cmpi eq, %arg1, %c0_i32_19 : i32
    %28 = arith.extui %27 : i1 to i32
    %c0_i32_20 = arith.constant 0 : i32
    %29 = arith.cmpi ne, %28, %c0_i32_20 : i32
    scf.if %29 {
      %c17 = arith.constant 17 : index
      %c0_58 = arith.constant 0 : index
      %c0_59 = arith.constant 0 : index
      %87 = vector.load %arg13[%c17, %c0_58, %c0_59] : memref<18x20x128xbf16, #tpu.memory_space<vmem>>, vector<1x20x128xbf16>
      tpu.vector_store %arg13[%c17, %c0_58, %c0_59], %23 {strides = array<i32>} : memref<18x20x128xbf16, #tpu.memory_space<vmem>>, vector<1x20x128xbf16>,
    } else {
    }
    %cst_21 = arith.constant 0.000000e+00 : f32
    %30 = vector.broadcast %cst_21 : f32 to vector<256x128xf32>
    %c0_22 = arith.constant 0 : index
    %c1 = arith.constant 1 : index
    %c0_23 = arith.constant 0 : index
    %31 = vector.load %arg13[%c0_22, %c1, %c0_23] : memref<18x20x128xbf16, #tpu.memory_space<vmem>>, vector<18x16x128xbf16>
    %32 = vector.extract_strided_slice %31 {offsets = [0, 0, 0], sizes = [16, 16, 128], strides = [1, 1, 1]} : vector<18x16x128xbf16> to vector<16x16x128xbf16>
    %33 = vector.extract_strided_slice %31 {offsets = [1, 0, 0], sizes = [16, 16, 128], strides = [1, 1, 1]} : vector<18x16x128xbf16> to vector<16x16x128xbf16>
    %34 = vector.extract_strided_slice %31 {offsets = [2, 0, 0], sizes = [16, 16, 128], strides = [1, 1, 1]} : vector<18x16x128xbf16> to vector<16x16x128xbf16>
    %35 = tpu.concatenate %32, %33, %34 in 2 : vector<16x16x128xbf16>, vector<16x16x128xbf16>, vector<16x16x128xbf16> -> vector<16x16x384xbf16>
    %36 = vector.shape_cast %35 : vector<16x16x384xbf16> to vector<256x384xbf16>
    %c0_24 = arith.constant 0 : index
    %c0_25 = arith.constant 0 : index
    %c0_26 = arith.constant 0 : index
    %37 = vector.load %arg6[%c0_24, %c0_25, %c0_26] : memref<3x384x128xbf16, #tpu.memory_space<vmem>>, vector<1x384x128xbf16>
    %38 = vector.shape_cast %37 : vector<1x384x128xbf16> to vector<384x128xbf16>
    %cst_27 = arith.constant dense<0.000000e+00> : vector<256x128xf32>
    %39 = tpu.matmul %36, %38, %cst_27 {dimension_numbers = #tpu.dot_dimension_numbers<[1], [0], [0], [1], [0, 0, 1, 1], [], []>} : vector<256x384xbf16>, vector<384x128xbf16>, vector<256x128xf32> -> vector<256x128xf32>
    %40 = arith.addf %30, %39 : vector<256x128xf32>
    %c0_28 = arith.constant 0 : index
    %c2_29 = arith.constant 2 : index
    %c0_30 = arith.constant 0 : index
    %41 = vector.load %arg13[%c0_28, %c2_29, %c0_30] : memref<18x20x128xbf16, #tpu.memory_space<vmem>>, vector<18x16x128xbf16>
    %42 = vector.extract_strided_slice %41 {offsets = [0, 0, 0], sizes = [16, 16, 128], strides = [1, 1, 1]} : vector<18x16x128xbf16> to vector<16x16x128xbf16>
    %43 = vector.extract_strided_slice %41 {offsets = [1, 0, 0], sizes = [16, 16, 128], strides = [1, 1, 1]} : vector<18x16x128xbf16> to vector<16x16x128xbf16>
    %44 = vector.extract_strided_slice %41 {offsets = [2, 0, 0], sizes = [16, 16, 128], strides = [1, 1, 1]} : vector<18x16x128xbf16> to vector<16x16x128xbf16>
    %45 = tpu.concatenate %42, %43, %44 in 2 : vector<16x16x128xbf16>, vector<16x16x128xbf16>, vector<16x16x128xbf16> -> vector<16x16x384xbf16>
    %46 = vector.shape_cast %45 : vector<16x16x384xbf16> to vector<256x384xbf16>
    %c1_31 = arith.constant 1 : index
    %c0_32 = arith.constant 0 : index
    %c0_33 = arith.constant 0 : index
    %47 = vector.load %arg6[%c1_31, %c0_32, %c0_33] : memref<3x384x128xbf16, #tpu.memory_space<vmem>>, vector<1x384x128xbf16>
    %48 = vector.shape_cast %47 : vector<1x384x128xbf16> to vector<384x128xbf16>
    %cst_34 = arith.constant dense<0.000000e+00> : vector<256x128xf32>
    %49 = tpu.matmul %46, %48, %cst_34 {dimension_numbers = #tpu.dot_dimension_numbers<[1], [0], [0], [1], [0, 0, 1, 1], [], []>} : vector<256x384xbf16>, vector<384x128xbf16>, vector<256x128xf32> -> vector<256x128xf32>
    %50 = arith.addf %40, %49 : vector<256x128xf32>
    %c0_35 = arith.constant 0 : index
    %c3 = arith.constant 3 : index
    %c0_36 = arith.constant 0 : index
    %51 = vector.load %arg13[%c0_35, %c3, %c0_36] : memref<18x20x128xbf16, #tpu.memory_space<vmem>>, vector<18x16x128xbf16>
    %52 = vector.extract_strided_slice %51 {offsets = [0, 0, 0], sizes = [16, 16, 128], strides = [1, 1, 1]} : vector<18x16x128xbf16> to vector<16x16x128xbf16>
    %53 = vector.extract_strided_slice %51 {offsets = [1, 0, 0], sizes = [16, 16, 128], strides = [1, 1, 1]} : vector<18x16x128xbf16> to vector<16x16x128xbf16>
    %54 = vector.extract_strided_slice %51 {offsets = [2, 0, 0], sizes = [16, 16, 128], strides = [1, 1, 1]} : vector<18x16x128xbf16> to vector<16x16x128xbf16>
    %55 = tpu.concatenate %52, %53, %54 in 2 : vector<16x16x128xbf16>, vector<16x16x128xbf16>, vector<16x16x128xbf16> -> vector<16x16x384xbf16>
    %56 = vector.shape_cast %55 : vector<16x16x384xbf16> to vector<256x384xbf16>
    %c2_37 = arith.constant 2 : index
    %c0_38 = arith.constant 0 : index
    %c0_39 = arith.constant 0 : index
    %57 = vector.load %arg6[%c2_37, %c0_38, %c0_39] : memref<3x384x128xbf16, #tpu.memory_space<vmem>>, vector<1x384x128xbf16>
    %58 = vector.shape_cast %57 : vector<1x384x128xbf16> to vector<384x128xbf16>
    %cst_40 = arith.constant dense<0.000000e+00> : vector<256x128xf32>
    %59 = tpu.matmul %56, %58, %cst_40 {dimension_numbers = #tpu.dot_dimension_numbers<[1], [0], [0], [1], [0, 0, 1, 1], [], []>} : vector<256x384xbf16>, vector<384x128xbf16>, vector<256x128xf32> -> vector<256x128xf32>
    %60 = arith.addf %50, %59 : vector<256x128xf32>
    %c0_41 = arith.constant 0 : index
    %c0_42 = arith.constant 0 : index
    %61 = vector.load %arg7[%c0_41, %c0_42] : memref<1x128xf32, #tpu.memory_space<vmem>>, vector<1x128xf32>
    %62 = vector.broadcast %61 : vector<1x128xf32> to vector<256x128xf32>
    %63 = arith.mulf %60, %62 : vector<256x128xf32>
    %c0_43 = arith.constant 0 : index
    %c0_44 = arith.constant 0 : index
    %64 = vector.load %arg8[%c0_43, %c0_44] : memref<1x128xf32, #tpu.memory_space<vmem>>, vector<1x128xf32>
    %65 = vector.broadcast %64 : vector<1x128xf32> to vector<256x128xf32>
    %66 = arith.addf %63, %65 : vector<256x128xf32>
    %cst_45 = arith.constant 0.000000e+00 : f32
    %67 = vector.broadcast %cst_45 : f32 to vector<256x128xf32>
    %68 = arith.maximumf %66, %67 : vector<256x128xf32>
    %69 = arith.truncf %68 : vector<256x128xf32> to vector<256x128xbf16>
    %c0_46 = arith.constant 0 : index
    %c0_47 = arith.constant 0 : index
    %70 = vector.load %arg9[%c0_46, %c0_47] : memref<128x128xbf16, #tpu.memory_space<vmem>>, vector<128x128xbf16>
    %cst_48 = arith.constant dense<0.000000e+00> : vector<256x128xf32>
    %71 = tpu.matmul %69, %70, %cst_48 {dimension_numbers = #tpu.dot_dimension_numbers<[1], [0], [0], [1], [0, 0, 1, 1], [], []>} : vector<256x128xbf16>, vector<128x128xbf16>, vector<256x128xf32> -> vector<256x128xf32>
    %c0_49 = arith.constant 0 : index
    %c0_50 = arith.constant 0 : index
    %72 = vector.load %arg10[%c0_49, %c0_50] : memref<1x128xf32, #tpu.memory_space<vmem>>, vector<1x128xf32>
    %73 = vector.broadcast %72 : vector<1x128xf32> to vector<256x128xf32>
    %74 = arith.mulf %71, %73 : vector<256x128xf32>
    %c0_51 = arith.constant 0 : index
    %c0_52 = arith.constant 0 : index
    %75 = vector.load %arg11[%c0_51, %c0_52] : memref<1x128xf32, #tpu.memory_space<vmem>>, vector<1x128xf32>
    %76 = vector.broadcast %75 : vector<1x128xf32> to vector<256x128xf32>
    %77 = arith.addf %74, %76 : vector<256x128xf32>
    %78 = vector.extract_strided_slice %4 {offsets = [1, 0, 0], sizes = [16, 16, 128], strides = [1, 1, 1]} : vector<18x16x128xf32> to vector<16x16x128xf32>
    %79 = vector.shape_cast %78 : vector<16x16x128xf32> to vector<256x128xf32>
    %80 = arith.addf %77, %79 : vector<256x128xf32>
    %cst_53 = arith.constant 0.000000e+00 : f32
    %81 = vector.broadcast %cst_53 : f32 to vector<256x128xf32>
    %82 = arith.maximumf %80, %81 : vector<256x128xf32>
    %83 = vector.shape_cast %82 : vector<256x128xf32> to vector<16x16x128xf32>
    %c0_54 = arith.constant 0 : index
    %c0_55 = arith.constant 0 : index
    %c0_56 = arith.constant 0 : index
    %c0_57 = arith.constant 0 : index
    %84 = vector.load %arg12[%c0_54, %c0_55, %c0_56, %c0_57] : memref<1x16x16x128xf32, #tpu.memory_space<vmem>>, vector<1x16x16x128xf32>
    %85 = vector.shape_cast %84 : vector<1x16x16x128xf32> to vector<16x16x128xf32>
    %86 = vector.shape_cast %83 : vector<16x16x128xf32> to vector<1x16x16x128xf32>
    tpu.vector_store %arg12[%c0_54, %c0_55, %c0_56, %c0_57], %86 {strides = array<i32>} : memref<1x16x16x128xf32, #tpu.memory_space<vmem>>, vector<1x16x16x128xf32>,
    return
  }
  func.func @transform_0(%arg0: i32, %arg1: i32) -> (i32, i32, i32, i32) {
    %c0_i32 = arith.constant 0 : i32
    %c0_i32_0 = arith.constant 0 : i32
    %c0_i32_1 = arith.constant 0 : i32
    %c0_i32_2 = arith.constant 0 : i32
    return %arg0, %c0_i32, %c0_i32_0, %c0_i32_1 : i32, i32, i32, i32
  }
  func.func @transform_1(%arg0: i32, %arg1: i32) -> (i32, i32) {
    %c0_i32 = arith.constant 0 : i32
    %c0_i32_0 = arith.constant 0 : i32
    %c0_i32_1 = arith.constant 0 : i32
    return %c0_i32, %c0_i32_0 : i32, i32
  }
  func.func @transform_2(%arg0: i32, %arg1: i32) -> (i32, i32) {
    %c0_i32 = arith.constant 0 : i32
    %c0_i32_0 = arith.constant 0 : i32
    %c0_i32_1 = arith.constant 0 : i32
    return %c0_i32, %c0_i32_0 : i32, i32
  }
  func.func @transform_3(%arg0: i32, %arg1: i32) -> (i32, i32) {
    %c0_i32 = arith.constant 0 : i32
    %c0_i32_0 = arith.constant 0 : i32
    %c0_i32_1 = arith.constant 0 : i32
    return %c0_i32, %c0_i32_0 : i32, i32
  }
  func.func @transform_4(%arg0: i32, %arg1: i32) -> (i32, i32, i32) {
    %c0_i32 = arith.constant 0 : i32
    %c0_i32_0 = arith.constant 0 : i32
    %c0_i32_1 = arith.constant 0 : i32
    %c0_i32_2 = arith.constant 0 : i32
    return %c0_i32, %c0_i32_0, %c0_i32_1 : i32, i32, i32
  }
  func.func @transform_5(%arg0: i32, %arg1: i32) -> (i32, i32) {
    %c0_i32 = arith.constant 0 : i32
    %c0_i32_0 = arith.constant 0 : i32
    %c0_i32_1 = arith.constant 0 : i32
    return %c0_i32, %c0_i32_0 : i32, i32
  }
  func.func @transform_6(%arg0: i32, %arg1: i32) -> (i32, i32) {
    %c0_i32 = arith.constant 0 : i32
    %c0_i32_0 = arith.constant 0 : i32
    %c0_i32_1 = arith.constant 0 : i32
    return %c0_i32, %c0_i32_0 : i32, i32
  }
  func.func @transform_7(%arg0: i32, %arg1: i32) -> (i32, i32) {
    %c0_i32 = arith.constant 0 : i32
    %c0_i32_0 = arith.constant 0 : i32
    %c0_i32_1 = arith.constant 0 : i32
    return %c0_i32, %c0_i32_0 : i32, i32
  }
  func.func @transform_8(%arg0: i32, %arg1: i32) -> (i32, i32) {
    %c0_i32 = arith.constant 0 : i32
    %c0_i32_0 = arith.constant 0 : i32
    %c0_i32_1 = arith.constant 0 : i32
    return %c0_i32, %c0_i32_0 : i32, i32
  }
  func.func @transform_9(%arg0: i32, %arg1: i32) -> (i32, i32) {
    %c0_i32 = arith.constant 0 : i32
    %c0_i32_0 = arith.constant 0 : i32
    %c0_i32_1 = arith.constant 0 : i32
    return %c0_i32, %c0_i32_0 : i32, i32
  }
  func.func @transform_10(%arg0: i32, %arg1: i32) -> (i32, i32, i32, i32) {
    %c0_i32 = arith.constant 0 : i32
    %c0_i32_0 = arith.constant 0 : i32
    %c0_i32_1 = arith.constant 0 : i32
    return %arg0, %arg1, %c0_i32, %c0_i32_0 : i32, i32, i32, i32
  }
}

</mosaic_0001>

<bundles_post_ra>
// kernel: tpu_custom_call.1
= control target key start
LH: loop header
LB: loop body
LE: loop exit
PB: predicated region body
PF: predicated region fallthrough
CT: control target
= control target key end

     0   :  { %s7456_s0 = inlined_call_operand.hbm [shape: f32[2,18,16,128], index: 0, kind: input, shape index: {}]   ;;  %s7457_s1 = inlined_call_operand.hbm [shape: bf16[128,128], index: 1, kind: input, shape index: {}]   ;;  %s7458_s2 = inlined_call_operand.vmem [shape: f32[1,128], index: 2, kind: input, shape index: {}]   ;;  %s7459_s3 = inlined_call_operand.vmem [shape: f32[1,128], index: 3, kind: input, shape index: {}]   ;;  %s7460_s4 = inlined_call_operand.hbm [shape: bf16[3,384,128], index: 4, kind: input, shape index: {}]   ;;  %s7461_s5 = inlined_call_operand.vmem [shape: f32[1,128], index: 5, kind: input, shape index: {}]   ;;  %s7462_s6 = inlined_call_operand.vmem [shape: f32[1,128], index: 6, kind: input, shape index: {}]   ;;  %s7463_s7 = inlined_call_operand.hbm [shape: bf16[128,128], index: 7, kind: input, shape index: {}]   ;;  %s7464_s8 = inlined_call_operand.vmem [shape: f32[1,128], index: 8, kind: input, shape index: {}]   ;;  %s7465_s9 = inlined_call_operand.vmem [shape: f32[1,128], index: 9, kind: input, shape index: {}]   ;;  %s7466_s10 = inlined_call_operand.hbm [shape: f32[2,16,16,128], index: 10, kind: output, shape index: {}]  }
   0x1   :  { %7510 = sst [smem:[#allocation34_spill]] %s7456_s0 }
   0x2   :  { %7511 = sst [smem:[#allocation35_spill]] %s7457_s1 }
   0x3   :  { %15 = vsyncpa [#allocation4], 0 }
   0x4   :  { %16 = vsyncpa [#allocation7], 0 }
   0x5   :  { %17 = vsyncpa [#allocation10], 0 }
   0x6   :  { %18 = vsyncpa [#allocation5], 0 }
   0x7   :  { %20 = vsyncpa [#allocation5 + $0x1], 0  ;;  %s6099_s13 = smov 0   ;;  %s6101_s14 = smov 0  }
   0x8   :  { %s6103_s15 = smov 0   ;;  %s6105_s16 = smov 0  }
   0x9   :  { %s6107_s17 = smov 0   ;;  %s6109_s18 = smov 0  }
   0xa LB: > { %7512 = sst [smem:[#allocation16_spill]] %s6010_s13  ;;  %s4396_s19 = sadd.s32 4294967295, %s6030_s18   ;;  %s6030_s18 = sphi %s6109_s18, %s26_s18   ;;  %s6026_s17 = sphi %s6107_s17, %s7568_s17   ;;  %s6022_s16 = sphi %s6105_s16, %s7567_s16   ;;  %s6018_s15 = sphi %s6103_s15, %s7566_s15   ;;  %s6014_s14 = sphi %s6101_s14, %s7570_s14   ;;  %s6010_s13 = sphi %s6099_s13, %s7569_s13  }
   0xb   : > { %7513 = sst [smem:[#allocation17_spill]] %s6018_s15  ;;  %s4397_s20 = sadd.s32 4294967294, %s6030_s18  }
   0xc   : > { %7514 = sst [smem:[#allocation18_spill]] %s6026_s17  ;;  %s38_s21 = sadd.s32 1, %s6026_s17 }
   0xd   : > { %7515 = sst [smem:[#allocation19_spill]] %s6030_s18  ;;  %s45_s22 = sadd.s32 1, %s6018_s15 }
   0xe   : > { %p40_p0 = scmp.ge.s32.totalorder %s38_s21, 2  ;;  %p58_p1 = scmp.ne.s32.totalorder %s6014_s14, %s6010_s13 }
   0xf   : > { %p6135_p2 = scmp.eq.s32.totalorder %s4396_s19, 0  ;;  %p272_p3 = scmp.ne.s32.totalorder %s6018_s15, %s6014_s14 }
  0x10   : > { %s7572_s21 = smov (%p40_p0, %s38_s21), 0  ;;  %p273_p5 = scmp.eq.s32.totalorder %s4396_s19, 1 }
  0x11   : > { %s7516_s23 = scalar_select %p6135_p2, 1, 0 }
  0x12   : > { %7517 = sst [smem:[#allocation20_spill]] %s7572_s21  ;;  %p6145_p4 = por %p6135_p2, %p58_p1 }
  0x13   : > { %s42_s25 = ssub.s32 %s6026_s17, %s7572_s21  ;;  %p279_p6 = scmp.eq.s32.totalorder %s4397_s20, 1 }
  0x14   : > { %s7518_s24 = scalar_select %p6145_p4, 1, 0 }
  0x15   : > { %p43_p7 = scmp.eq.s32.totalorder %s42_s25, 0  ;;  %p6151_p8 = por %p273_p5, %p272_p3 }
  0x16   : > { %p6155_p9 = por %p279_p6, %p58_p1  ;;  %p4398_p10 = scmp.ge.s32.totalorder %s6030_s18, 1 }
  0x17   : > { %s7519_s26 = scalar_select %p6151_p8, 1, 0 }
  0x18   : > { %s7520_s27 = scalar_select %p6155_p9, 1, 0 }
  0x19   : > { %s6161_s28 = scalar_select %p43_p7, %s6018_s15, %s45_s22  }
  0x1a   : > { %7521 = sst [smem:[#allocation21_spill]] %s7520_s27  ;;  %p286_p11 = scmp.lt.s32.totalorder %s6030_s18, 3 }
  0x1b   : > { %7522 = sst [smem:[#allocation22_spill]] %s6161_s28  ;;  %s6032_s30 = smov [#allocation6]  }
  0x1c   : > { %p6164_p12 = pnand %p4398_p10, %p286_p11  ;;  %s314_s11 = sshll.u32 %s6032_s30, 4  ;;  %s6168_s11 = int_to_ptr.vmem [resolvable:$true] %s314_s11 }
  0x1d   : > { %s5530_s20 = smul.u32 4608, %s6022_s16  ;;  %s6033_s22 = smov [#allocation3]  }
  0x1e   : > { %s7523_s29 = scalar_select %p6164_p12, 1, 0 }
  0x1f   : > { %p5547_p13 = pneg %p6164_p12  ;;  %s301_s25 = sshll.u32 %s6033_s22, 4  ;;  %s302_s25 = int_to_ptr.vmem [resolvable:$true] %s301_s25 }
  0x20   : > { %s7526_s1 = sld [smem:[#allocation35_spill]] }
  0x21   : > { %p6174_p0 = pnand %p5547_p13, %p6145_p4  ;;  %p6180_p1 = pnand %p5547_p13, %p6135_p2 }
  0x23   : > { %s7525_s19 = scalar_select %p6180_p1, 1, 0 }
  0x24   : > { %p6193_p5 = pneg %p6180_p1 }
  0x26   : > { %s5826_s17 = scalar_lea.hbm %s7526_s1, 1024 }
  0x27   : > { %p5827_p3 = scmp.ne.s32.totalorder %s7526_s1, %s5826_s17  ;;  %p5833_p10 = scmp.lt.u32.totalorder %s5826_s17, %s7526_s1 }
  0x28   : > { %s7527_s27 = scalar_select %p6193_p5, 1, 0 }
  0x29   : > { %p5829_p6 = pnand %p6193_p5, %p5827_p3 }
  0x2b   : > { %p5830_p7 = pneg %p5829_p6 }
  0x2d   : > { %p5835_p11 = pnand %p5833_p10, %p5830_p7 }
  0x2f   : > { %5838 = shalt.err (!%p5835_p11)
}
  0x30   : > { %s5839_s15 = scalar_lea.vmem %s6168_s11, 1024  ;;  %p5847_p2 = scmp.lt.s32.totalorder %s6168_s11, %s6168_s11 }
  0x31   : > { %p5840_p13 = scmp.ne.s32.totalorder %s6168_s11, %s5839_s15  ;;  %p5848_p4 = scmp.lt.s32.totalorder %s5839_s15, %s5839_s15 }
  0x33   : > { %p5842_p9 = pnand %p5840_p13, %p6193_p5  ;;  %p5849_p3 = por %p5848_p4, %p5847_p2 }
  0x35   : > { %p5843_p8 = pneg %p5842_p9 }
  0x37   : > { %p5850_p6 = pnand %p5849_p3, %p5843_p8 }
  0x39   : > { %5853 = shalt.err (!%p5850_p6)
}
  0x3a   : > { %s7484_s21 = smov 64   ;;  %s7486_s13 = smov 4  }
  0x3b   : > { %5553 = dma.hbm_to_vmem [thread:$0]  (!%p6180_p1), %s7526_s1, 1024, %s6168_s11, [#allocation7], %s7484_s21, %s7484_s21, %s7486_s13  }
  0x3c   : > { %s7528_s0 = sld [smem:[#allocation34_spill]]  ;;  %p5856_p4 = pneg %p6174_p0 }
  0x42   : > { %s6220_s30 = scalar_lea.hbm %s7528_s0, %s5530_s20  ;;  %s5859_s18 = scalar_lea.hbm %s7528_s0, 9216 }
  0x43   : > { %s5854_s15 = scalar_lea.hbm %s6220_s30, 4608  ;;  %p5860_p7 = scmp.lt.u32.totalorder %s6220_s30, %s7528_s0 }
  0x44   : > { %p5855_p2 = scmp.ne.s32.totalorder %s6220_s30, %s5854_s15  ;;  %p5861_p10 = scmp.lt.u32.totalorder %s5859_s18, %s5854_s15 }
  0x45   : > { %p5863_p13 = scmp.lt.u32.totalorder %s5854_s15, %s6220_s30 }
  0x46   : > { %p5857_p8 = pnand %p5856_p4, %p5855_p2  ;;  %p5862_p11 = por %p5861_p10, %p5860_p7 }
  0x48   : > { %p5858_p9 = pneg %p5857_p8  ;;  %p5864_p3 = por %p5863_p13, %p5862_p11 }
  0x4a   : > { %p5865_p6 = pnand %p5864_p3, %p5858_p9 }
  0x4c   : > { %5868 = shalt.err (!%p5865_p6)
}
  0x4d   : > { %s5869_s22 = scalar_lea.vmem %s302_s25, 4608  ;;  %p5877_p1 = scmp.lt.s32.totalorder %s302_s25, %s302_s25 }
  0x4e   : > { %p5870_p12 = scmp.ne.s32.totalorder %s302_s25, %s5869_s22  ;;  %p5878_p5 = scmp.lt.s32.totalorder %s5869_s22, %s5869_s22 }
  0x50   : > { %p5872_p2 = pnand %p5870_p12, %p5856_p4  ;;  %p5879_p7 = por %p5878_p5, %p5877_p1 }
  0x52   : > { %p5873_p8 = pneg %p5872_p2 }
  0x54   : > { %p5880_p10 = pnand %p5879_p7, %p5873_p8 }
  0x56   : > { %5883 = shalt.err (!%p5880_p10)
}
  0x57   : > { %s6036_s17 = smov 128   ;;  %s6037_s15 = smov 8  }
  0x58   : > { %5550 = dma.hbm_to_vmem [thread:$0]  (!%p6174_p0), %s6220_s30, 4608, %s302_s25, [#allocation4], %s6036_s17, %s6036_s17, %s6037_s15  }
  0x59   : > { %s6038_s11 = smov [#allocation8]   ;;  %s6039_s28 = smov [#allocation9]  }
  0x5a   : > { %s333_s18 = sshll.u32 %s6038_s11, 4  ;;  %s352_s20 = sshll.u32 %s6039_s28, 4  ;;  %s334_s18 = int_to_ptr.vmem [resolvable:$true] %s333_s18  ;;  %s6243_s20 = int_to_ptr.vmem [resolvable:$true] %s352_s20 }
  0x5b   : > { %s5884_s22 = scalar_lea.hbm %s7460_s4, 9216  ;;  %p7529_p1 = scmp.ne.s32.totalorder %s7527_s27, 0 }
  0x5c   : > { %p5885_p12 = scmp.ne.s32.totalorder %s7460_s4, %s5884_s22  ;;  %p5891_p0 = scmp.lt.u32.totalorder %s5884_s22, %s7460_s4 }
  0x5e   : > { %p5887_p5 = pnand %p5885_p12, %p7529_p1 }
  0x60   : > { %p5888_p4 = pneg %p5887_p5 }
  0x62   : > { %p5893_p9 = pnand %p5891_p0, %p5888_p4 }
  0x64   : > { %5896 = shalt.err (!%p5893_p9)
}
  0x65   : > { %s5897_s30 = scalar_lea.vmem %s334_s18, 9216  ;;  %p5905_p6 = scmp.lt.s32.totalorder %s334_s18, %s334_s18 }
  0x66   : > { %p5898_p11 = scmp.ne.s32.totalorder %s334_s18, %s5897_s30  ;;  %p5906_p2 = scmp.lt.s32.totalorder %s5897_s30, %s5897_s30 }
  0x68   : > { %p5900_p13 = pnand %p5898_p11, %p7529_p1  ;;  %p5907_p8 = por %p5906_p2, %p5905_p6 }
  0x6a   : > { %p5901_p3 = pneg %p5900_p13 }
  0x6c   : > { %p5908_p7 = pnand %p5907_p8, %p5901_p3 }
  0x6e   : > { %5911 = shalt.err (!%p5908_p7)
}
  0x6f   : > { %p7530_p10 = scmp.ne.s32.totalorder %s7525_s19, 0  ;;  %s7531_s0 = smov 4  }
  0x70   : > { %s7532_s1 = smov 64   ;;  %s5912_s11 = scalar_lea.hbm %s7463_s7, 1024 }
  0x71   : > { %5556 = dma.hbm_to_vmem [thread:$0]  (!%p7530_p10), %s7460_s4, 9216, %s334_s18, [#allocation7], %s7532_s1, %s7532_s1, %s7531_s0  }
  0x72   : > { %p5913_p12 = scmp.ne.s32.totalorder %s7463_s7, %s5912_s11  ;;  %p5919_p0 = scmp.lt.u32.totalorder %s5912_s11, %s7463_s7 }
  0x74   : > { %p5915_p5 = pnand %p5913_p12, %p7529_p1 }
  0x76   : > { %p5916_p4 = pneg %p5915_p5 }
  0x78   : > { %p5921_p9 = pnand %p5919_p0, %p5916_p4 }
  0x7a   : > { %5924 = shalt.err (!%p5921_p9)
}
  0x7b   : > { %s5925_s18 = scalar_lea.vmem %s6243_s20, 1024  ;;  %p5933_p6 = scmp.lt.s32.totalorder %s6243_s20, %s6243_s20 }
  0x7c   : > { %p5926_p11 = scmp.ne.s32.totalorder %s6243_s20, %s5925_s18  ;;  %p5934_p2 = scmp.lt.s32.totalorder %s5925_s18, %s5925_s18 }
  0x7e   : > { %p5928_p13 = pnand %p5926_p11, %p7529_p1  ;;  %p5935_p8 = por %p5934_p2, %p5933_p6 }
  0x80   : > { %p5929_p3 = pneg %p5928_p13 }
  0x82   : > { %p5936_p7 = pnand %p5935_p8, %p5929_p3 }
  0x84   : > { %5939 = shalt.err (!%p5936_p7)
}
  0x85   : > { %5559 = dma.hbm_to_vmem [thread:$0]  (!%p7530_p10), %s7463_s7, 1024, %s6243_s20, [#allocation10], %s7532_s1, %s7532_s1, %s7531_s0  }
  0x86   : > { %p7533_p12 = scmp.ne.s32.totalorder %s7523_s29, 0 }
  0x88   : > { %374 = sbr.rel (%p7533_p12) target bundleno = 1219 (0x4c3), region = 60 }
  0x8f   : > { %p7534_p1 = scmp.ne.s32.totalorder %s7518_s24, 0 }
  0x91   : > { %5993 = dma.done.wait (%p7534_p1), [#allocation4], 4608  }
  0x92   : > { %5995 = vsyncadd (%p7534_p1), [#allocation4], 4294962688  ;;  %p7535_p5 = scmp.ne.s32.totalorder %s7516_s23, 0 }
  0x94   : > { %5997 = dma.done.wait (%p7535_p5), [#allocation7], 10240  }
  0x95   : > { %5999 = vsyncadd (%p7535_p5), [#allocation7], 4294957056 }
  0x96   : > { %6001 = dma.done.wait (%p7535_p5), [#allocation10], 1024  }
  0x97   : > { %6003 = vsyncadd (%p7535_p5), [#allocation10], 4294966272  ;;  %v5630_v0 = vld [vmem:[#allocation6] sm:$0xff]   ;;  %v5631_v1 = vld [vmem:[#allocation6 + $0x8] sm:$0xff]   ;;  %vm949_vm0 = vcmask 1040384   ;;  %vm950_vm1 = vcmask 1044484  }
  0x98   : > { %5110 = vmatprep.subr.bf16.mxu0 %v5630_v0  ;;  %5354 = vmatprep.subr.bf16.mxu1 %v5630_v0  ;;  %v5632_v2 = vld [vmem:[#allocation6 + $0x10] sm:$0xff]   ;;  %v5633_v3 = vld [vmem:[#allocation6 + $0x18] sm:$0xff]   ;;  %v424_v4 = vld [vmem:[#allocation3] sm:$0xff]  ;;  %vm1750_vm3 = vcmask 1046528   ;;  %vm1395_vm4 = vsmask.f32 7424 }
  0x99   : > { %5111 = vmatpush3.bf16.msra.mxu0 %v5630_v0  ;;  %5362 = vmatpush3.bf16.msra.mxu1 %v5630_v0  ;;  %v425_v5 = vld [vmem:[#allocation3 + $0x8] sm:$0xff]  ;;  %v5634_v7 = vld [vmem:[#allocation6 + $0x20] sm:$0xff]   ;;  %v5636_v12 = vld [vmem:[#allocation6 + $0x30] sm:$0xff]   ;;  %vm2876_vm5 = vsmask.f32 6400  ;;  %s416_s15 = sand.u32 1, %s6014_s14  }
  0x9a   : > { %5112 = vmatprep.subr.bf16.mxu0 %v5631_v1  ;;  %5355 = vmatprep.subr.bf16.mxu1 %v5631_v1  ;;  %v460_v6 = vpack.c.bf16 %v425_v5, %v424_v4  ;;  %v440_v8 = vld [vmem:[#allocation3 + $0x80] sm:$0xff]  ;;  %v441_v9 = vld [vmem:[#allocation3 + $0x88] sm:$0xff]  ;;  %v5637_v13 = vld [vmem:[#allocation6 + $0x38] sm:$0xff]   ;;  %s4407_s22 = sshll.u32 %s416_s15, 8  ;;  %s4651_s25 = sshll.u32 %s6022_s16, 12 }
  0x9b   : > { %v468_v10 = vpack.c.bf16 %v441_v9, %v440_v8  ;;  %v5635_v11 = vld [vmem:[#allocation6 + $0x28] sm:$0xff]   ;;  %v426_v14 = vld [vmem:[#allocation3 + $0x10] sm:$0xff]  ;;  %v427_v15 = vld [vmem:[#allocation3 + $0x18] sm:$0xff]  ;;  %v6040_v8 = vmov 0   ;;  %s7309_s12 = scalar_lea.vmem [#allocation11], %s4407_s22  ;;  %s7401_s23 = scalar_lea.hbm %s7466_s10, %s4651_s25 }
  0x9c   : > { %5126 = vmatprep.mubr.bf16.mxu0 %v460_v6  ;;  %v428_v16 = vld [vmem:[#allocation3 + $0x20] sm:$0xff]  ;;  %v429_v17 = vld [vmem:[#allocation3 + $0x28] sm:$0xff]  ;;  %v442_v18 = vld [vmem:[#allocation3 + $0x90] sm:$0xff]  ;;  %v461_v23 = vpack.c.bf16 %v427_v15, %v426_v14  ;;  %1150 = vst [vmem:[#allocation2] sm:$0x1] %v6040_v8  ;;  %s4290_s18 = sshll.u32 %s7309_s12, 4  ;;  %s7403_s18 = int_to_ptr.vmem [resolvable:$true] %s4290_s18 }
  0x9d   : > { %5113 = vmatpush3.bf16.msra.mxu0 %v5631_v1  ;;  %5363 = vmatpush3.bf16.msra.mxu1 %v5631_v1  ;;  %v443_v19 = vld [vmem:[#allocation3 + $0x98] sm:$0xff]  ;;  %v444_v20 = vld [vmem:[#allocation3 + $0xa0] sm:$0xff]  ;;  %v445_v21 = vld [vmem:[#allocation3 + $0xa8] sm:$0xff]  ;;  %v462_v25 = vpack.c.bf16 %v429_v17, %v428_v16  ;;  %1151 = vst [vmem:[#allocation2 + $0xc] sm:$0x1] %v6040_v8  ;;  %s7410_s16 = scalar_lea.sflag [#allocation5], %s416_s15 }
  0x9e   : > { %5114 = vmatprep.subr.bf16.mxu0 %v5632_v2  ;;  %5356 = vmatprep.subr.bf16.mxu1 %v5632_v2  ;;  %v5638_v22 = vld [vmem:[#allocation8 + $0x100] sm:$0xff]   ;;  %v469_v26 = vpack.c.bf16 %v443_v19, %v442_v18  ;;  %v470_v27 = vpack.c.bf16 %v445_v21, %v444_v20  ;;  %v430_v28 = vld [vmem:[#allocation3 + $0x30] sm:$0xff]  ;;  %v431_v29 = vld [vmem:[#allocation3 + $0x38] sm:$0xff]  ;;  %1152 = vst [vmem:[#allocation2 + $0x18] sm:$0x1] %v6040_v8  ;;  %s5940_s24 = scalar_lea.vmem %s7403_s18, 4096 }
  0x9f   : > { %5142 = vmatprep.mubr.bf16.mxu1 %v468_v10  ;;  %v5639_v24 = vld [vmem:[#allocation8 + $0xc0] sm:$0xff]   ;;  %v433_v31 = vld [vmem:[#allocation3 + $0x48] sm:$0xff]  ;;  %v446_v32 = vld [vmem:[#allocation3 + $0xb0] sm:$0xff]  ;;  %v463_v36 = vpack.c.bf16 %v431_v29, %v430_v28  ;;  %1153 = vst [vmem:[#allocation2 + $0x24] sm:$0x1] %v6040_v8  ;;  %p5941_p10 = scmp.ne.s32.totalorder %s7403_s18, %s5940_s24  ;;  %p7560_p4 = scmp.ne.s32.totalorder %s7519_s26, 0 }
  0xa0   : > { %v432_v30 = vld [vmem:[#allocation3 + $0x40] sm:$0xff]  ;;  %v447_v33 = vld [vmem:[#allocation3 + $0xb8] sm:$0xff]  ;;  %v449_v35 = vld [vmem:[#allocation3 + $0xc8] sm:$0xff]  ;;  %1154 = vst [vmem:[#allocation2 + $0x30] sm:$0x1] %v6040_v8  ;;  %s6041_s27 = smov [#allocation11]  }
  0xa1   : > { %5115 = vmatpush3.bf16.msra.mxu0 %v5632_v2  ;;  %5364 = vmatpush3.bf16.msra.mxu1 %v5632_v2  ;;  %v448_v34 = vld [vmem:[#allocation3 + $0xc0] sm:$0xff]  ;;  %v464_v37 = vpack.c.bf16 %v433_v31, %v432_v30  ;;  %v471_v38 = vpack.c.bf16 %v447_v33, %v446_v32  ;;  %v434_v40 = vld [vmem:[#allocation3 + $0x50] sm:$0xff]  ;;  %v435_v41 = vld [vmem:[#allocation3 + $0x58] sm:$0xff]  ;;  %1155 = vst [vmem:[#allocation2 + $0x3c] sm:$0x1] %v6040_v8  ;;  %p5942_p0 = pnand %p5941_p10, %p7560_p4  ;;  %s5944_s29 = sshll.u32 %s6041_s27, 4  ;;  %s5945_s29 = int_to_ptr.vmem [resolvable:$false] %s5944_s29 }
  0xa2   : > { %5116 = vmatprep.subr.bf16.mxu0 %v5633_v3  ;;  %5357 = vmatprep.subr.bf16.mxu1 %v5633_v3  ;;  %v472_v39 = vpack.c.bf16 %v449_v35, %v448_v34  ;;  %v436_v42 = vld [vmem:[#allocation3 + $0x60] sm:$0xff]  ;;  %v437_v43 = vld [vmem:[#allocation3 + $0x68] sm:$0xff]  ;;  %v450_v44 = vld [vmem:[#allocation3 + $0xd0] sm:$0xff]  ;;  %v465_v48 = vpack.c.bf16 %v435_v41, %v434_v40  ;;  %1156 = vst [vmem:[#allocation2 + $0x48] sm:$0x1] %v6040_v8  ;;  %s5946_s19 = scalar_lea.vmem %s5945_s29, 8192  ;;  %p5947_p11 = scmp.lt.s32.totalorder %s7403_s18, %s5945_s29 }
  0xa3   : > { %v451_v45 = vld [vmem:[#allocation3 + $0xd8] sm:$0xff]  ;;  %v452_v46 = vld [vmem:[#allocation3 + $0xe0] sm:$0xff]  ;;  %v453_v47 = vld [vmem:[#allocation3 + $0xe8] sm:$0xff]  ;;  %v466_v49 = vpack.c.bf16 %v437_v43, %v436_v42  ;;  %1157 = vst [vmem:[#allocation2 + $0x54] sm:$0x1] %v6040_v8  ;;  %p5943_p9 = pneg %p5942_p0  ;;  %p5948_p13 = scmp.lt.s32.totalorder %s5946_s19, %s5940_s24 }
  0xa4   : > { %v473_v50 = vpack.c.bf16 %v451_v45, %v450_v44  ;;  %v474_v51 = vpack.c.bf16 %v453_v47, %v452_v46  ;;  %v438_v52 = vld [vmem:[#allocation3 + $0x70] sm:$0xff]  ;;  %v439_v53 = vld [vmem:[#allocation3 + $0x78] sm:$0xff]  ;;  %v456_v56 = vld [vmem:[#allocation3 + $0x100] sm:$0xff]  ;;  %1158 = vst [vmem:[#allocation2 + $0x60] sm:$0x1] %v6040_v8 }
  0xa5   : > { %5117 = vmatpush3.bf16.msra.mxu0 %v5633_v3  ;;  %5365 = vmatpush3.bf16.msra.mxu1 %v5633_v3  ;;  %v454_v54 = vld [vmem:[#allocation3 + $0xf0] sm:$0xff]  ;;  %v455_v55 = vld [vmem:[#allocation3 + $0xf8] sm:$0xff]  ;;  %v457_v57 = vld [vmem:[#allocation3 + $0x108] sm:$0xff]  ;;  %v467_v58 = vpack.c.bf16 %v439_v53, %v438_v52  ;;  %1159 = vst [vmem:[#allocation2 + $0x6c] sm:$0x1] %v6040_v8  ;;  %p5949_p3 = por %p5948_p13, %p5947_p11 }
  0xa6   : > { %5118 = vmatprep.subr.bf16.mxu0 %v5634_v7  ;;  %5358 = vmatprep.subr.bf16.mxu1 %v5634_v7  ;;  %v475_v59 = vpack.c.bf16 %v455_v55, %v454_v54  ;;  %v476_v60 = vpack.c.bf16 %v457_v57, %v456_v56  ;;  %v458_v61 = vld [vmem:[#allocation3 + $0x110] sm:$0xff]  ;;  %v459_v62 = vld [vmem:[#allocation3 + $0x118] sm:$0xff]  ;;  %v5640_v0 = vld [vmem:[#allocation8 + $0x108] sm:$0xff]   ;;  %1160 = vst [vmem:[#allocation2 + $0x78] sm:$0x1] %v6040_v8 }
  0xa7   : > { %v477_v63 = vpack.c.bf16 %v459_v62, %v458_v61  ;;  %v5641_v1 = vld [vmem:[#allocation8 + $0xc8] sm:$0xff]   ;;  %v5642_v2 = vld [vmem:[#allocation8 + $0x140] sm:$0xff]   ;;  %v5643_v3 = vld [vmem:[#allocation8 + $0x110] sm:$0xff]   ;;  %1161 = vst [vmem:[#allocation2 + $0x84] sm:$0x1] %v6040_v8  ;;  %p5950_p6 = pnand %p5949_p3, %p5943_p9 }
  0xa8   : > { %v5644_v4 = vld [vmem:[#allocation8 + $0xd0] sm:$0xff]   ;;  %v5645_v5 = vld [vmem:[#allocation8 + $0x148] sm:$0xff]   ;;  %v5646_v6 = vld [vmem:[#allocation8 + $0x118] sm:$0xff]   ;;  %1162 = vst [vmem:[#allocation2 + $0x90] sm:$0x1] %v6040_v8 }
  0xa9   : > { %5119 = vmatpush3.bf16.msra.mxu0 %v5634_v7  ;;  %5366 = vmatpush3.bf16.msra.mxu1 %v5634_v7  ;;  %v5647_v7 = vld [vmem:[#allocation8 + $0xd8] sm:$0xff]   ;;  %1163 = vst [vmem:[#allocation2 + $0x9c] sm:$0x1] %v6040_v8  ;;  %1164 = vst [vmem:[#allocation2 + $0xa8] sm:$0x1] %v6040_v8  ;;  %v5648_v9 = vld [vmem:[#allocation8 + $0x150] sm:$0xff]  }
  0xaa   : > { %5120 = vmatprep.subr.bf16.mxu0 %v5635_v11  ;;  %5359 = vmatprep.subr.bf16.mxu1 %v5635_v11  ;;  %1165 = vst [vmem:[#allocation2 + $0xb4] sm:$0x1] %v6040_v8  ;;  %1166 = vst [vmem:[#allocation2 + $0xc0] sm:$0x1] %v6040_v8  ;;  %v5649_v10 = vld [vmem:[#allocation8 + $0x120] sm:$0xff]   ;;  %v5653_v14 = vld [vmem:[#allocation8 + $0xe8] sm:$0xff]  }
  0xab   : > { %1167 = vst [vmem:[#allocation2 + $0xcc] sm:$0x1] %v6040_v8  ;;  %v5654_v15 = vld [vmem:[#allocation8 + $0x160] sm:$0xff]   ;;  %v5655_v16 = vld [vmem:[#allocation8 + $0x130] sm:$0xff]   ;;  %v5657_v18 = vld [vmem:[#allocation8 + $0x168] sm:$0xff]  }
  0xac   : > { %v5656_v17 = vld [vmem:[#allocation8 + $0xf0] sm:$0xff]   ;;  %v5658_v19 = vld [vmem:[#allocation8 + $0x138] sm:$0xff]   ;;  %vm6360_vm2 = vmor %vm949_vm0, %vm950_vm1 }
  0xad   : > { %5121 = vmatpush3.bf16.msra.mxu0 %v5635_v11  ;;  %5367 = vmatpush3.bf16.msra.mxu1 %v5635_v11  ;;  %v5650_v11 = vld [vmem:[#allocation8 + $0xe0] sm:$0xff]   ;;  %v5659_v20 = vld [vmem:[#allocation8 + $0xf8] sm:$0xff]   ;;  %v5662_v21 = vld [vmem:[#allocation8 + $0x170] sm:$0xff]  }
  0xae   : > { %5122 = vmatprep.subr.bf16.mxu0 %v5636_v12  ;;  %5360 = vmatprep.subr.bf16.mxu1 %v5636_v12 }
  0xb1   : > { %5123 = vmatpush3.bf16.msra.mxu0 %v5636_v12  ;;  %5368 = vmatpush3.bf16.msra.mxu1 %v5636_v12  ;;  %v5651_v12 = vld [vmem:[#allocation8 + $0x158] sm:$0xff]  }
  0xb2   : > { %5124 = vmatprep.subr.bf16.mxu0 %v5637_v13  ;;  %5361 = vmatprep.subr.bf16.mxu1 %v5637_v13 }
  0xb5   : > { %5125 = vmatpush3.bf16.msra.mxu0 %v5637_v13  ;;  %5369 = vmatpush3.bf16.msra.mxu1 %v5637_v13  ;;  %v5652_v13 = vld [vmem:[#allocation8 + $0x128] sm:$0xff]  }
  0xb6   : > { %4678 = vmatprep.subr.bf16.mxu1 %v5638_v22  ;;  %5162 = vmatprep.subr.bf16.mxu0 %v5642_v2  ;;  %v5665_v22 = vld [vmem:[#allocation8 + $0x178] sm:$0xff]  }
  0xb8   : > { %5127 = vmatmul.mubr.bf16.vlgmr.msra.gmra.mrb[0].mxu0 %v461_v23  ;;  %5143 = vmatmul.mubr.bf16.vlgmr.msra.gmra.mrb[0].mxu1 %v469_v26  ;;  %v6324_v23 = vld [vmem:[#allocation8 + $0x80] sm:$0xff]  }
  0xb9   : > { %5130 = vmatprep.mubr.bf16.mxu0 %v462_v25  ;;  %5146 = vmatprep.mubr.bf16.mxu1 %v470_v27  ;;  %v6330_v25 = vld [vmem:[%s7458_s2] ss:$0 sm:$0xff] }
  0xba   : > { %4679 = vmatpush3.bf16.msra.mxu1 %v5639_v24  ;;  %5163 = vmatpush3.bf16.msra.mxu0 %v5642_v2  ;;  %v5707_v24 = vld [vmem:[#allocation8 + $0x40] sm:$0xff]   ;;  %v6335_v27 = vld [vmem:[%s7459_s3] ss:$0 sm:$0xff] }
  0xbb   : > { %4680 = vmatprep.subr.bf16.mxu1 %v5640_v0  ;;  %5164 = vmatprep.subr.bf16.mxu0 %v5645_v5 }
  0xbe   : > { %4681 = vmatpush3.bf16.msra.mxu1 %v5641_v1  ;;  %5165 = vmatpush3.bf16.msra.mxu0 %v5645_v5 }
  0xbf   : > { %4682 = vmatprep.subr.bf16.mxu1 %v5643_v3  ;;  %5166 = vmatprep.subr.bf16.mxu0 %v5648_v9 }
  0xc0   : > { %5131 = vmatmul.mubr.bf16.gmra.mrb[4].mxu0 %v463_v36  ;;  %5147 = vmatmul.mubr.bf16.gmra.mrb[4].mxu1 %v471_v38 }
  0xc1   : > { %5134 = vmatprep.mubr.bf16.mxu0 %v464_v37  ;;  %5150 = vmatprep.mubr.bf16.mxu1 %v472_v39 }
  0xc2   : > { %4683 = vmatpush3.bf16.msra.mxu1 %v5644_v4  ;;  %5167 = vmatpush3.bf16.msra.mxu0 %v5648_v9 }
  0xc3   : > { %4684 = vmatprep.subr.bf16.mxu1 %v5646_v6  ;;  %5168 = vmatprep.subr.bf16.mxu0 %v5651_v12 }
  0xc6   : > { %4685 = vmatpush3.bf16.msra.mxu1 %v5647_v7  ;;  %5169 = vmatpush3.bf16.msra.mxu0 %v5651_v12 }
  0xc7   : > { %4686 = vmatprep.subr.bf16.mxu1 %v5649_v10  ;;  %5170 = vmatprep.subr.bf16.mxu0 %v5654_v15 }
  0xc8   : > { %5135 = vmatmul.mubr.bf16.gmra.mrb[8].mxu0 %v465_v48  ;;  %5151 = vmatmul.mubr.bf16.gmra.mrb[8].mxu1 %v473_v50 }
  0xc9   : > { %5138 = vmatprep.mubr.bf16.mxu0 %v466_v49  ;;  %5154 = vmatprep.mubr.bf16.mxu1 %v474_v51 }
  0xca   : > { %4687 = vmatpush3.bf16.msra.mxu1 %v5650_v11  ;;  %5171 = vmatpush3.bf16.msra.mxu0 %v5654_v15 }
  0xcb   : > { %4688 = vmatprep.subr.bf16.mxu1 %v5652_v13  ;;  %5172 = vmatprep.subr.bf16.mxu0 %v5657_v18 }
  0xce   : > { %4689 = vmatpush3.bf16.msra.mxu1 %v5653_v14  ;;  %5173 = vmatpush3.bf16.msra.mxu0 %v5657_v18 }
  0xcf   : > { %4690 = vmatprep.subr.bf16.mxu1 %v5655_v16  ;;  %5174 = vmatprep.subr.bf16.mxu0 %v5662_v21 }
  0xd0   : > { %5139 = vmatmul.mubr.bf16.gmra.mrb[12].mxu0 %v467_v58  ;;  %5155 = vmatmul.mubr.bf16.gmra.mrb[12].mxu1 %v475_v59 }
  0xd1   : > { %5158 = vmatprep.mubr.bf16.mxu1 %v476_v60 }
  0xd2   : > { %4691 = vmatpush3.bf16.msra.mxu1 %v5656_v17  ;;  %5175 = vmatpush3.bf16.msra.mxu0 %v5662_v21 }
  0xd3   : > { %4692 = vmatprep.subr.bf16.mxu1 %v5658_v19  ;;  %5176 = vmatprep.subr.bf16.mxu0 %v5665_v22 }
  0xd6   : > { %4693 = vmatpush3.bf16.msra.mxu1 %v5659_v20  ;;  %5177 = vmatpush3.bf16.msra.mxu0 %v5665_v22 }
  0xd7   : > { %5210 = vmatprep.subr.bf16.mxu0 %v6324_v23  ;;  %4814 = vmatprep.subr.bf16.mxu1 %v5707_v24 }
  0xd8   : > { %5159 = vmatmul.mubr.bf16.gmra.mrb[16].mxu1 %v477_v63 }
 0x18b   : > { %v5128_v26 = vpop.f32.mrb[0].mxu0  ;;  %v5144_v30 = vpop.f32.mrb[0].mxu1 }
 0x18c   : > { %v728_v28 = vmul.f32 %v5128_v26, %v6330_v25  ;;  %v576_v29 = vpop.f32.mrb[1].mxu0  ;;  %v744_v33 = vmul.f32 %v5144_v30, %v6330_v25  ;;  %v640_v34 = vpop.f32.mrb[1].mxu1 }
 0x18d   : > { %v726_v31 = vmul.f32 %v6330_v25, %v576_v29  ;;  %v5129_v32 = vpop.f32.mrb[2].mxu0  ;;  %v742_v38 = vmul.f32 %v6330_v25, %v640_v34  ;;  %v5145_v39 = vpop.f32.mrb[2].mxu1 }
 0x18e   : > { %v771_v35 = vadd.f32 %v6335_v27, %v728_v28  ;;  %v729_v36 = vmul.f32 %v5129_v32, %v6330_v25  ;;  %v579_v37 = vpop.f32.mrb[3].mxu0  ;;  %v787_v42 = vadd.f32 %v6335_v27, %v744_v33  ;;  %v745_v43 = vmul.f32 %v5145_v39, %v6330_v25  ;;  %v643_v44 = vpop.f32.mrb[3].mxu1 }
 0x18f   : > { %v769_v40 = vadd.f32 %v6335_v27, %v726_v31  ;;  %v727_v41 = vmul.f32 %v6330_v25, %v579_v37  ;;  %v785_v47 = vadd.f32 %v6335_v27, %v742_v38  ;;  %v743_v48 = vmul.f32 %v6330_v25, %v643_v44 }
 0x190   : > { %v807_v45 = vmax.f32 %v771_v35, 0.0  ;;  %v772_v46 = vadd.f32 %v6335_v27, %v729_v36  ;;  %v823_v51 = vmax.f32 %v787_v42, 0.0  ;;  %v788_v52 = vadd.f32 %v6335_v27, %v745_v43 }
 0x191   : > { %v805_v49 = vmax.f32 %v769_v40, 0.0  ;;  %v770_v50 = vadd.f32 %v6335_v27, %v727_v41  ;;  %v821_v55 = vmax.f32 %v785_v47, 0.0  ;;  %v6353_v56 = vadd.f32 %v6335_v27, %v743_v48 }
 0x192   : > { %v4617_v53 = vpack.c.bf16 %v807_v45, %v807_v45  ;;  %v808_v54 = vmax.f32 %v772_v46, 0.0  ;;  %v4633_v60 = vpack.c.bf16 %v823_v51, %v823_v51  ;;  %v824_v61 = vmax.f32 %v788_v52, 0.0 }
 0x193   : > { %v4615_v57 = vpack.c.bf16 %v805_v49, %v805_v49  ;;  %v806_v58 = vmax.f32 %v770_v50, 0.0  ;;  %v5132_v59 = vpop.f32.mrb[4].mxu0  ;;  %v4631_v2 = vpack.c.bf16 %v821_v55, %v821_v55  ;;  %v6356_v3 = vpop.f32.mrb[4].mxu1  ;;  %v822_v42 = vmax.f32 %v6353_v56, 0.0 }
 0x194   : > { %v957_v62 = vrot.slane %v4617_v53, 7  ;;  %v4618_v63 = vpack.c.bf16 %v808_v54, %v808_v54  ;;  %v732_v0 = vmul.f32 %v5132_v59, %v6330_v25  ;;  %v592_v1 = vpop.f32.mrb[5].mxu0  ;;  %v997_v10 = vrot.slane %v4633_v60, 7  ;;  %v6365_v11 = vpop.f32.mrb[5].mxu1 }
 0x195   : > { %v952_v4 = vrot.slane %v4615_v57, 7  ;;  %v4616_v6 = vpack.c.bf16 %v806_v58, %v806_v58  ;;  %v730_v7 = vmul.f32 %v6330_v25, %v592_v1  ;;  %v5133_v9 = vpop.f32.mrb[6].mxu0  ;;  %v6369_v17 = vpop.f32.mrb[6].mxu1  ;;  %v992_v37 = vrot.slane %v4631_v2, 7 }
 0x196   : > { %v958_v12 = vrot.slane %v957_v62, 4  ;;  %1099 = vst [vmem:[#allocation2 + $0xc] sm:$0xe] %v957_v62  ;;  %v959_v13 = vrot.slane %v4618_v63, 7  ;;  %v775_v14 = vadd.f32 %v6335_v27, %v732_v0  ;;  %v733_v15 = vmul.f32 %v5133_v9, %v6330_v25  ;;  %v595_v16 = vpop.f32.mrb[7].mxu0  ;;  %v6373_v22 = vpop.f32.mrb[7].mxu1 }
 0x197   : > { %v953_v18 = vrot.slane %v952_v4, 4  ;;  %1096 = vst [vmem:[#allocation2] sm:$0xe] %v952_v4  ;;  %v954_v19 = vrot.slane %v4616_v6, 7  ;;  %v773_v20 = vadd.f32 %v6335_v27, %v730_v7  ;;  %v731_v21 = vmul.f32 %v6330_v25, %v595_v16  ;;  %1123 = vst [vmem:[#allocation2 + $0x6c] sm:$0xe] %v997_v10 }
 0x198   : > { %1190 = vst [vmem:[#allocation2] sm:$0xf] %v6040_v8  ;;  %v960_v24 = vsel %vm6360_vm2, %v958_v12, %v959_v13  ;;  %v961_v26 = vrot.slane %v959_v13, 4  ;;  %v811_v28 = vmax.f32 %v775_v14, 0.0  ;;  %v776_v29 = vadd.f32 %v6335_v27, %v733_v15  ;;  %1120 = vst [vmem:[#allocation2 + $0x60] sm:$0xe] %v992_v37 }
 0x199   : > { %1100 = vst [vmem:[#allocation2 + $0x10] sm:$0xf] %v960_v24  ;;  %v955_v30 = vsel %vm6360_vm2, %v953_v18, %v954_v19  ;;  %v956_v31 = vrot.slane %v954_v19, 4  ;;  %v809_v32 = vmax.f32 %v773_v20, 0.0  ;;  %v774_v33 = vadd.f32 %v6335_v27, %v731_v21 }
 0x19a   : > { %1101 = vst [vmem:[#allocation2 + $0x14] sm:$0x1] %v961_v26  ;;  %1097 = vst [vmem:[#allocation2 + $0x4] sm:$0xf] %v955_v30  ;;  %v4621_v34 = vpack.c.bf16 %v811_v28, %v811_v28  ;;  %v812_v35 = vmax.f32 %v776_v29, 0.0  ;;  %v998_v36 = vrot.slane %v997_v10, 4  ;;  %v4634_v41 = vpack.c.bf16 %v824_v61, %v824_v61 }
 0x19b   : > { %1098 = vst [vmem:[#allocation2 + $0x8] sm:$0x1] %v956_v31  ;;  %1191 = vst [vmem:[#allocation2 + $0x4] sm:$0xf] %v6040_v8  ;;  %v4619_v38 = vpack.c.bf16 %v809_v32, %v809_v32  ;;  %v810_v39 = vmax.f32 %v774_v33, 0.0  ;;  %v5136_v40 = vpop.f32.mrb[8].mxu0  ;;  %v4632_v30 = vpack.c.bf16 %v822_v42, %v822_v42 }
 0x19c   : > { %1192 = vst [vmem:[#allocation2 + $0x8] sm:$0x3] %v6040_v8  ;;  %v967_v43 = vrot.slane %v4621_v34, 7  ;;  %v4622_v44 = vpack.c.bf16 %v812_v35, %v812_v35  ;;  %v736_v45 = vmul.f32 %v5136_v40, %v6330_v25  ;;  %v608_v46 = vpop.f32.mrb[9].mxu0  ;;  %v6386_v47 = vrot.slane %v992_v37, 4  ;;  %v6388_v48 = vpop.f32.mrb[8].mxu1 }
 0x19d   : > { %v962_v49 = vrot.slane %v4619_v38, 7  ;;  %v4620_v50 = vpack.c.bf16 %v810_v39, %v810_v39  ;;  %v734_v51 = vmul.f32 %v6330_v25, %v608_v46  ;;  %v5137_v52 = vpop.f32.mrb[10].mxu0  ;;  %v999_v53 = vrot.slane %v4634_v41, 7  ;;  %v6391_v54 = vpop.f32.mrb[9].mxu1  ;;  %v1679_v15 = vld [vmem:[#allocation2 + $0xc] sm:$0xe] }
 0x19e   : > { %v968_v55 = vrot.slane %v967_v43, 4  ;;  %1105 = vst [vmem:[#allocation2 + $0x24] sm:$0xe] %v967_v43  ;;  %v969_v56 = vrot.slane %v4622_v44, 7  ;;  %v779_v57 = vadd.f32 %v6335_v27, %v736_v45  ;;  %v737_v58 = vmul.f32 %v5137_v52, %v6330_v25  ;;  %v611_v59 = vpop.f32.mrb[11].mxu0  ;;  %v6395_v60 = vpop.f32.mrb[10].mxu1 }
 0x19f   : > { %v963_v61 = vrot.slane %v962_v49, 4  ;;  %1102 = vst [vmem:[#allocation2 + $0x18] sm:$0xe] %v962_v49  ;;  %v964_v62 = vrot.slane %v4620_v50, 7  ;;  %v777_v63 = vadd.f32 %v6335_v27, %v734_v51  ;;  %v735_v0 = vmul.f32 %v6330_v25, %v611_v59  ;;  %v6399_v1 = vpop.f32.mrb[11].mxu1 }
 0x1a0   : > { %v970_v2 = vsel %vm6360_vm2, %v968_v55, %v969_v56  ;;  %v971_v4 = vrot.slane %v969_v56, 4  ;;  %v815_v6 = vmax.f32 %v779_v57, 0.0  ;;  %v780_v7 = vadd.f32 %v6335_v27, %v737_v58  ;;  %v1201_v9 = vld [vmem:[#allocation2 + $0x10] sm:$0xf]  ;;  %v1678_v49 = vld [vmem:[#allocation2] sm:$0xe] }
 0x1a1   : > { %1106 = vst [vmem:[#allocation2 + $0x28] sm:$0xf] %v970_v2  ;;  %v965_v10 = vsel %vm6360_vm2, %v963_v61, %v964_v62  ;;  %v966_v12 = vrot.slane %v964_v62, 4  ;;  %v813_v13 = vmax.f32 %v777_v63, 0.0  ;;  %v778_v14 = vadd.f32 %v6335_v27, %v735_v0 }
 0x1a2   : > { %1107 = vst [vmem:[#allocation2 + $0x2c] sm:$0x1] %v971_v4  ;;  %1103 = vst [vmem:[#allocation2 + $0x1c] sm:$0xf] %v965_v10  ;;  %v4625_v16 = vpack.c.bf16 %v815_v6, %v815_v6  ;;  %v816_v18 = vmax.f32 %v780_v7, 0.0  ;;  %v1000_v19 = vsel %vm6360_vm2, %v998_v36, %v999_v53  ;;  %v1001_v20 = vrot.slane %v999_v53, 4 }
 0x1a3   : > { %v5660_v21 = vld [vmem:[#allocation2 + $0x14] ss:$0 sps:$4 sm:$0x11]   ;;  %1104 = vst [vmem:[#allocation2 + $0x20] sm:$0x1] %v966_v12  ;;  %v4623_v24 = vpack.c.bf16 %v813_v13, %v813_v13  ;;  %v814_v26 = vmax.f32 %v778_v14, 0.0  ;;  %v6409_v29 = vcombine.low %v1679_v15, %v1201_v9 }
 0x1a4   : > { %v5140_v28 = vpop.f32.mrb[12].mxu0  ;;  %1124 = vst [vmem:[#allocation2 + $0x70] sm:$0xf] %v1000_v19  ;;  %v977_v31 = vrot.slane %v4625_v16, 7  ;;  %v4626_v32 = vpack.c.bf16 %v816_v18, %v816_v18  ;;  %1125 = vst [vmem:[#allocation2 + $0x74] sm:$0x1] %v1001_v20 }
 0x1a5   : > { %v740_v33 = vmul.f32 %v5140_v28, %v6330_v25  ;;  %v624_v34 = vpop.f32.mrb[13].mxu0  ;;  %v1755_v35 = vrot.slane %v5660_v21, 1  ;;  %v972_v37 = vrot.slane %v4623_v24, 7  ;;  %v4624_v38 = vpack.c.bf16 %v814_v26, %v814_v26  ;;  %v6414_v41 = vpop.f32.mrb[12].mxu1  ;;  %v1198_v63 = vld [vmem:[#allocation2 + $0x4] sm:$0xf] }
 0x1a6   : > { %v738_v36 = vmul.f32 %v6330_v25, %v624_v34  ;;  %v5141_v39 = vpop.f32.mrb[14].mxu0  ;;  %v1754_v40 = vrot.slane %v6409_v29, 1  ;;  %v978_v43 = vrot.slane %v977_v31, 4  ;;  %1111 = vst [vmem:[#allocation2 + $0x3c] sm:$0xe] %v977_v31  ;;  %v979_v44 = vrot.slane %v4626_v32, 7 }
 0x1a7   : > { %v783_v42 = vadd.f32 %v6335_v27, %v740_v33  ;;  %v741_v45 = vmul.f32 %v5141_v39, %v6330_v25  ;;  %v627_v46 = vpop.f32.mrb[15].mxu0  ;;  %v6418_v50 = vpop.f32.mrb[13].mxu1  ;;  %v973_v51 = vrot.slane %v972_v37, 4  ;;  %1108 = vst [vmem:[#allocation2 + $0x30] sm:$0xe] %v972_v37  ;;  %v974_v52 = vrot.slane %v4624_v38, 7 }
 0x1a8   : > { %v781_v53 = vadd.f32 %v6335_v27, %v738_v36  ;;  %v739_v55 = vmul.f32 %v6330_v25, %v627_v46  ;;  %v5663_v56 = vld [vmem:[#allocation2 + $0x8] ss:$0 sps:$4 sm:$0x11]   ;;  %v6422_v57 = vpop.f32.mrb[14].mxu1  ;;  %v980_v58 = vsel %vm6360_vm2, %v978_v43, %v979_v44  ;;  %v981_v59 = vrot.slane %v979_v44, 4  ;;  %v5708_v28 = vld [vmem:[#allocation8] sm:$0xff]  }
 0x1a9   : > { %v819_v61 = vmax.f32 %v783_v42, 0.0  ;;  %v784_v62 = vadd.f32 %v6335_v27, %v741_v45  ;;  %v6427_v0 = vpop.f32.mrb[15].mxu1  ;;  %1112 = vst [vmem:[#allocation2 + $0x40] sm:$0xf] %v980_v58  ;;  %v975_v2 = vsel %vm6360_vm2, %v973_v51, %v974_v52  ;;  %v976_v4 = vrot.slane %v974_v52, 4  ;;  %v5717_v31 = vld [vmem:[#allocation8 + $0x48] sm:$0xff]  }
 0x1aa   : > { %v817_v6 = vmax.f32 %v781_v53, 0.0  ;;  %v782_v7 = vadd.f32 %v6335_v27, %v739_v55  ;;  %1113 = vst [vmem:[#allocation2 + $0x44] sm:$0x1] %v981_v59  ;;  %1109 = vst [vmem:[#allocation2 + $0x34] sm:$0xf] %v975_v2  ;;  %v6433_v12 = vsel %vm1750_vm3, %v1754_v40, %v1755_v35  ;;  %v994_v13 = vrot.slane %v4632_v30, 7 }
 0x1ab   : > { %v4629_v9 = vpack.c.bf16 %v819_v61, %v819_v61  ;;  %v820_v10 = vmax.f32 %v784_v62, 0.0  ;;  %1110 = vst [vmem:[#allocation2 + $0x38] sm:$0x1] %v976_v4  ;;  %2048 = vmatprep.mubr.bf16.mxu1 %v6433_v12  ;;  %v6436_v16 = vcombine.low %v1678_v49, %v1198_v63  ;;  %v1752_v18 = vrot.slane %v5663_v56, 1  ;;  %v6441_v26 = vpop.f32.mrb[16].mxu1  ;;  %v5718_v56 = vld [vmem:[#allocation8 + $0x8] sm:$0xff]  }
 0x1ac   : > { %v4627_v14 = vpack.c.bf16 %v817_v6, %v817_v6  ;;  %v818_v15 = vmax.f32 %v782_v7, 0.0  ;;  %v995_v21 = vsel %vm6360_vm2, %v6386_v47, %v994_v13  ;;  %v996_v24 = vrot.slane %v994_v13, 4  ;;  %v6446_v35 = vld [vmem:[#allocation2 + $0x1c] sm:$0xf]  ;;  %v6450_v38 = vpop.f32.mrb[17].mxu1 }
 0x1ad   : > { %v987_v19 = vrot.slane %v4629_v9, 7  ;;  %v4630_v20 = vpack.c.bf16 %v820_v10, %v820_v10  ;;  %1121 = vst [vmem:[#allocation2 + $0x64] sm:$0xf] %v995_v21  ;;  %v1751_v33 = vrot.slane %v6436_v16, 1  ;;  %v748_v34 = vmul.f32 %v6356_v3, %v6330_v25  ;;  %v6458_v44 = vpop.f32.mrb[18].mxu1  ;;  %v5727_v9 = vld [vmem:[#allocation8 + $0x50] sm:$0xff]  }
 0x1ae   : > { %v982_v30 = vrot.slane %v4627_v14, 7  ;;  %v4628_v32 = vpack.c.bf16 %v818_v15, %v818_v15  ;;  %v6448_v37 = vld [vmem:[#allocation2 + $0x20] ss:$0 sps:$4 sm:$0x11]   ;;  %1122 = vst [vmem:[#allocation2 + $0x68] sm:$0x1] %v996_v24  ;;  %v746_v39 = vmul.f32 %v6330_v25, %v6365_v11  ;;  %v749_v40 = vmul.f32 %v6369_v17, %v6330_v25 }
 0x1af   : > { %v988_v47 = vrot.slane %v987_v19, 4  ;;  %1117 = vst [vmem:[#allocation2 + $0x54] sm:$0xe] %v987_v19  ;;  %v989_v36 = vrot.slane %v4630_v20, 7  ;;  %v1753_v45 = vsel %vm1750_vm3, %v1751_v33, %v1752_v18  ;;  %v791_v46 = vadd.f32 %v6335_v27, %v748_v34  ;;  %v6462_v49 = vpop.f32.mrb[19].mxu1 }
 0x1b0   : > { %v6456_v43 = vld [vmem:[#allocation2 + $0x2c] ss:$0 sps:$4 sm:$0x11]   ;;  %v983_v3 = vrot.slane %v982_v30, 4  ;;  %1114 = vst [vmem:[#allocation2 + $0x48] sm:$0xe] %v982_v30  ;;  %2049 = vmatmul.mubr.bf16.vlgmr.msra.gmra.mrb[20].mxu1 %v1753_v45  ;;  %v789_v17 = vadd.f32 %v6335_v27, %v746_v39  ;;  %v792_v52 = vadd.f32 %v6335_v27, %v749_v40  ;;  %v747_v62 = vmul.f32 %v6330_v25, %v6373_v22 }
 0x1b1   : > { %v984_v42 = vrot.slane %v4628_v32, 7  ;;  %v990_v51 = vsel %vm6360_vm2, %v988_v47, %v989_v36  ;;  %v991_v11 = vrot.slane %v989_v36, 4  ;;  %v6468_v53 = vld [vmem:[#allocation2 + $0x28] sm:$0xf]  ;;  %v1681_v55 = vld [vmem:[#allocation2 + $0x24] sm:$0xe]  ;;  %4815 = vmatpush3.bf16.msra.mxu1 %v5708_v28  ;;  %v752_v20 = vmul.f32 %v6388_v48, %v6330_v25 }
 0x1b2   : > { %1118 = vst [vmem:[#allocation2 + $0x58] sm:$0xf] %v990_v51  ;;  %v827_v61 = vmax.f32 %v791_v46, 0.0  ;;  %v1680_v63 = vld [vmem:[#allocation2 + $0x18] sm:$0xe]  ;;  %v825_v2 = vmax.f32 %v789_v17, 0.0  ;;  %4816 = vmatprep.subr.bf16.mxu1 %v5717_v31  ;;  %v790_v13 = vadd.f32 %v6335_v27, %v747_v62  ;;  %v6480_v14 = vcombine.low %v1681_v55, %v6468_v53 }
 0x1b3   : > { %v985_v58 = vsel %vm6360_vm2, %v983_v3, %v984_v42  ;;  %v986_v59 = vrot.slane %v984_v42, 4  ;;  %1119 = vst [vmem:[#allocation2 + $0x5c] sm:$0x1] %v991_v11  ;;  %v828_v4 = vmax.f32 %v792_v52, 0.0  ;;  %v6475_v6 = vcombine.low %v1680_v63, %v6446_v35  ;;  %v5673_v36 = vld [vmem:[#allocation8 + $0x88] sm:$0xff]   ;;  %v5728_v48 = vld [vmem:[#allocation8 + $0x10] sm:$0xff]  }
 0x1b4   : > { %1115 = vst [vmem:[#allocation2 + $0x4c] sm:$0xf] %v985_v58  ;;  %v1758_v7 = vrot.slane %v6448_v37, 1  ;;  %v4637_v10 = vpack.c.bf16 %v827_v61, %v827_v61  ;;  %v1761_v22 = vrot.slane %v6456_v43, 1  ;;  %v4635_v15 = vpack.c.bf16 %v825_v2, %v825_v2  ;;  %v6501_v42 = vld [vmem:[#allocation2 + $0x34] sm:$0xf] }
 0x1b5   : > { %1116 = vst [vmem:[#allocation2 + $0x50] sm:$0x1] %v986_v59  ;;  %v4638_v18 = vpack.c.bf16 %v828_v4, %v828_v4  ;;  %v1757_v19 = vrot.slane %v6475_v6, 1  ;;  %v826_v24 = vmax.f32 %v790_v13, 0.0  ;;  %v1760_v28 = vrot.slane %v6480_v14, 1  ;;  %4817 = vmatpush3.bf16.msra.mxu1 %v5718_v56  ;;  %v5733_v46 = vld [vmem:[#allocation8 + $0x58] sm:$0xff]  }
 0x1b6   : > { %v1007_v21 = vrot.slane %v4637_v10, 7  ;;  %v750_v31 = vmul.f32 %v6330_v25, %v6391_v54  ;;  %v6489_v30 = vld [vmem:[#allocation2 + $0x38] ss:$0 sps:$4 sm:$0x11]   ;;  %v1002_v32 = vrot.slane %v4635_v15, 7  ;;  %v795_v47 = vadd.f32 %v6335_v27, %v752_v20  ;;  %4818 = vmatprep.subr.bf16.mxu1 %v5727_v9  ;;  %v5734_v4 = vld [vmem:[#allocation8 + $0x18] sm:$0xff]  }
 0x1b7   : > { %v1009_v33 = vrot.slane %v4638_v18, 7  ;;  %v6492_v34 = vsel %vm1750_vm3, %v1757_v19, %v1758_v7  ;;  %v4636_v40 = vpack.c.bf16 %v826_v24, %v826_v24  ;;  %v6498_v54 = vsel %vm1750_vm3, %v1760_v28, %v1761_v22  ;;  %v1682_v45 = vld [vmem:[#allocation2 + $0x30] sm:$0xe]  ;;  %v6507_v55 = vld [vmem:[#allocation2 + $0x44] ss:$0 sps:$4 sm:$0x11]  }
 0x1b8   : > { %v1008_v39 = vrot.slane %v1007_v21, 4  ;;  %1129 = vst [vmem:[#allocation2 + $0x84] sm:$0xe] %v1007_v21  ;;  %2056 = vmatprep.mubr.bf16.mxu1 %v6492_v34  ;;  %5178 = vmatprep.mubr.bf16.mxu0 %v6492_v34  ;;  %v793_v3 = vadd.f32 %v6335_v27, %v750_v31  ;;  %v1003_v51 = vrot.slane %v1002_v32, 4  ;;  %1126 = vst [vmem:[#allocation2 + $0x78] sm:$0xe] %v1002_v32 }
 0x1b9   : > { %v1011_v11 = vrot.slane %v1009_v33, 4  ;;  %2057 = vmatmul.mubr.bf16.gmra.mrb[24].mxu1 %v6433_v12  ;;  %5179 = vmatmul.mubr.bf16.vlgmr.msra.gmra.mrb[16].mxu0 %v6498_v54  ;;  %v831_v17 = vmax.f32 %v795_v47, 0.0  ;;  %v753_v52 = vmul.f32 %v6395_v60, %v6330_v25  ;;  %v1004_v58 = vrot.slane %v4636_v40, 7  ;;  %v6515_v61 = vld [vmem:[#allocation2 + $0x40] sm:$0xf]  ;;  %v5736_v22 = vld [vmem:[#allocation8 + $0x60] sm:$0xff]  }
 0x1ba   : > { %v1010_v56 = vsel %vm6360_vm2, %v1008_v39, %v1009_v33  ;;  %5211 = vmatpush3.bf16.msra.mxu0 %v6324_v23  ;;  %2064 = vmatprep.mubr.bf16.mxu1 %v6498_v54  ;;  %v829_v59 = vmax.f32 %v793_v3, 0.0  ;;  %v751_v12 = vmul.f32 %v6330_v25, %v6399_v1  ;;  %v6519_v63 = vcombine.low %v1682_v45, %v6501_v42  ;;  %v5678_v23 = vld [vmem:[#allocation8 + $0x90] sm:$0xff]   ;;  %v1683_v13 = vld [vmem:[#allocation2 + $0x3c] sm:$0xe] }
 0x1bb   : > { %1130 = vst [vmem:[#allocation2 + $0x88] sm:$0xf] %v1010_v56  ;;  %1131 = vst [vmem:[#allocation2 + $0x8c] sm:$0x1] %v1011_v11  ;;  %v4641_v62 = vpack.c.bf16 %v831_v17, %v831_v17  ;;  %v796_v60 = vadd.f32 %v6335_v27, %v753_v52  ;;  %v1764_v2 = vrot.slane %v6489_v30, 1  ;;  %5212 = vmatprep.subr.bf16.mxu0 %v5673_v36  ;;  %4819 = vmatpush3.bf16.msra.mxu1 %v5728_v48  ;;  %v5739_v40 = vld [vmem:[#allocation8 + $0x20] sm:$0xff]  }
 0x1bc   : > { %v1005_v7 = vsel %vm6360_vm2, %v1003_v51, %v1004_v58  ;;  %v1006_v1 = vrot.slane %v1004_v58, 4  ;;  %v4639_v9 = vpack.c.bf16 %v829_v59, %v829_v59  ;;  %v794_v10 = vadd.f32 %v6335_v27, %v751_v12  ;;  %4820 = vmatprep.subr.bf16.mxu1 %v5733_v46  ;;  %v6536_v39 = vld [vmem:[#allocation2 + $0x4c] sm:$0xf]  ;;  %v6542_v46 = vld [vmem:[#allocation2 + $0x50] ss:$0 sps:$4 sm:$0x11]  }
 0x1bd   : > { %1127 = vst [vmem:[#allocation2 + $0x7c] sm:$0xf] %v1005_v7  ;;  %v1017_v15 = vrot.slane %v4641_v62, 7  ;;  %v832_v18 = vmax.f32 %v796_v60, 0.0  ;;  %v1763_v19 = vrot.slane %v6519_v63, 1  ;;  %v6527_v20 = vcombine.low %v1683_v13, %v6515_v61  ;;  %v5683_v51 = vld [vmem:[#allocation8 + $0x98] sm:$0xff]  }
 0x1be   : > { %1128 = vst [vmem:[#allocation2 + $0x80] sm:$0x1] %v1006_v1  ;;  %v1012_v21 = vrot.slane %v4639_v9, 7  ;;  %v830_v24 = vmax.f32 %v794_v10, 0.0  ;;  %v1767_v28 = vrot.slane %v6507_v55, 1  ;;  %5213 = vmatpush3.bf16.msra.mxu0 %v5673_v36  ;;  %v756_v31 = vmul.f32 %v6414_v41, %v6330_v25  ;;  %v5741_v11 = vld [vmem:[#allocation8 + $0x68] sm:$0xff]  }
 0x1bf   : > { %v1018_v32 = vrot.slane %v1017_v15, 4  ;;  %1135 = vst [vmem:[#allocation2 + $0x9c] sm:$0xe] %v1017_v15  ;;  %v4642_v33 = vpack.c.bf16 %v832_v18, %v832_v18  ;;  %v6533_v47 = vsel %vm1750_vm3, %v1763_v19, %v1764_v2  ;;  %v1766_v48 = vrot.slane %v6527_v20, 1  ;;  %5214 = vmatprep.subr.bf16.mxu0 %v5678_v23  ;;  %4821 = vmatpush3.bf16.msra.mxu1 %v5734_v4  ;;  %v1684_v59 = vld [vmem:[#allocation2 + $0x48] sm:$0xe] }
 0x1c0   : > { %v1013_v3 = vrot.slane %v1012_v21, 4  ;;  %1132 = vst [vmem:[#allocation2 + $0x90] sm:$0xe] %v1012_v21  ;;  %v4640_v45 = vpack.c.bf16 %v830_v24, %v830_v24  ;;  %5182 = vmatprep.mubr.bf16.mxu0 %v6533_v47  ;;  %v799_v41 = vadd.f32 %v6335_v27, %v756_v31  ;;  %v754_v36 = vmul.f32 %v6330_v25, %v6418_v50  ;;  %v6552_v12 = vld [vmem:[#allocation2 + $0x5c] ss:$0 sps:$4 sm:$0x11]  }
 0x1c1   : > { %4822 = vmatprep.subr.bf16.mxu1 %v5736_v22  ;;  %v1019_v17 = vrot.slane %v4642_v33, 7  ;;  %2065 = vmatmul.mubr.bf16.gmra.mrb[28].mxu1 %v6492_v34  ;;  %v6546_v52 = vsel %vm1750_vm3, %v1766_v48, %v1767_v28  ;;  %v757_v56 = vmul.f32 %v6422_v57, %v6330_v25  ;;  %v755_v58 = vmul.f32 %v6330_v25, %v6427_v0  ;;  %v1686_v2 = vld [vmem:[#allocation2 + $0x60] sm:$0xe]  ;;  %v6564_v1 = vld [vmem:[#allocation2 + $0x58] sm:$0xf] }
 0x1c2   : > { %v1014_v50 = vrot.slane %v4640_v45, 7  ;;  %5183 = vmatmul.mubr.bf16.gmra.mrb[20].mxu0 %v6546_v52  ;;  %2072 = vmatprep.mubr.bf16.mxu1 %v6533_v47  ;;  %v835_v62 = vmax.f32 %v799_v41, 0.0  ;;  %v797_v34 = vadd.f32 %v6335_v27, %v754_v36  ;;  %v6558_v60 = vcombine.low %v1684_v59, %v6536_v39  ;;  %v1685_v9 = vld [vmem:[#allocation2 + $0x54] sm:$0xe]  ;;  %v6570_v19 = vld [vmem:[#allocation8 + $0xa0] sm:$0xff]  }
 0x1c3   : > { %v1020_v57 = vsel %vm6360_vm2, %v1018_v32, %v1019_v17  ;;  %v1021_v4 = vrot.slane %v1019_v17, 4  ;;  %v800_v0 = vadd.f32 %v6335_v27, %v757_v56  ;;  %v798_v7 = vadd.f32 %v6335_v27, %v755_v58  ;;  %5215 = vmatpush3.bf16.msra.mxu0 %v5678_v23  ;;  %4823 = vmatpush3.bf16.msra.mxu1 %v5739_v40  ;;  %v6568_v18 = vld [vmem:[#allocation2 + $0x68] ss:$0 sps:$4 sm:$0x11]   ;;  %v6578_v40 = vld [vmem:[#allocation2 + $0x64] sm:$0xf] }
 0x1c4   : > { %1136 = vst [vmem:[#allocation2 + $0xa0] sm:$0xf] %v1020_v57  ;;  %v1015_v10 = vsel %vm6360_vm2, %v1013_v3, %v1014_v50  ;;  %v1016_v13 = vrot.slane %v1014_v50, 4  ;;  %v4645_v22 = vpack.c.bf16 %v835_v62, %v835_v62  ;;  %v833_v15 = vmax.f32 %v797_v34, 0.0  ;;  %5216 = vmatprep.subr.bf16.mxu0 %v5683_v51  ;;  %4824 = vmatprep.subr.bf16.mxu1 %v5741_v11  ;;  %v5742_v3 = vld [vmem:[#allocation8 + $0x28] sm:$0xff]   ;;  %v5744_v56 = vld [vmem:[#allocation8 + $0x70] sm:$0xff]  }
 0x1c5   : > { %1137 = vst [vmem:[#allocation2 + $0xa4] sm:$0x1] %v1021_v4  ;;  %1133 = vst [vmem:[#allocation2 + $0x94] sm:$0xf] %v1015_v10  ;;  %v836_v21 = vmax.f32 %v800_v0, 0.0  ;;  %v834_v24 = vmax.f32 %v798_v7, 0.0  ;;  %v6575_v33 = vcombine.low %v1685_v9, %v6564_v1  ;;  %v6584_v11 = vcombine.low %v1686_v2, %v6578_v40 }
 0x1c6   : > { %v1769_v23 = vrot.slane %v6558_v60, 1  ;;  %v1770_v28 = vrot.slane %v6542_v46, 1  ;;  %1134 = vst [vmem:[#allocation2 + $0x98] sm:$0x1] %v1016_v13  ;;  %v1027_v31 = vrot.slane %v4645_v22, 7  ;;  %v4643_v32 = vpack.c.bf16 %v833_v15, %v833_v15  ;;  %v6592_v4 = vld [vmem:[#allocation8 + $0xa8] sm:$0xff]  }
 0x1c7   : > { %7538 = vst [vmem:[#allocation23_spill] sm:$0xff] %v6575_v33  ;;  %v1773_v48 = vrot.slane %v6552_v12, 1  ;;  %v4646_v45 = vpack.c.bf16 %v836_v21, %v836_v21  ;;  %v4644_v41 = vpack.c.bf16 %v834_v24, %v834_v24  ;;  %7539 = vst [vmem:[#allocation24_spill] sm:$0xff] %v6584_v11  ;;  %v6586_v17 = vld [vmem:[#allocation2 + $0x74] ss:$0 sps:$4 sm:$0x11]   ;;  %5217 = vmatpush3.bf16.msra.mxu0 %v5683_v51  ;;  %4825 = vmatpush3.bf16.msra.mxu1 %v5742_v3 }
 0x1c8   : > { %v6581_v36 = vsel %vm1750_vm3, %v1769_v23, %v1770_v28  ;;  %v1028_v58 = vrot.slane %v1027_v31, 4  ;;  %1141 = vst [vmem:[#allocation2 + $0xb4] sm:$0xe] %v1027_v31  ;;  %v1022_v59 = vrot.slane %v4643_v32, 7  ;;  %v1772_v50 = vrot.slane %v6575_v33, 1  ;;  %5218 = vmatprep.subr.bf16.mxu0 %v6570_v19  ;;  %v5747_v9 = vld [vmem:[#allocation8 + $0x30] sm:$0xff]   ;;  %4826 = vmatprep.subr.bf16.mxu1 %v5744_v56 }
 0x1c9   : > { %5186 = vmatprep.mubr.bf16.mxu0 %v6581_v36  ;;  %v1776_v62 = vrot.slane %v6568_v18, 1  ;;  %v1687_v34 = vld [vmem:[#allocation2 + $0x6c] sm:$0xe]  ;;  %v1688_v57 = vld [vmem:[#allocation2 + $0x78] sm:$0xe]  ;;  %v1029_v2 = vrot.slane %v4646_v45, 7  ;;  %2073 = vmatmul.mubr.bf16.gmra.mrb[32].mxu1 %v6498_v54  ;;  %v760_v7 = vmul.f32 %v6441_v26, %v6330_v25  ;;  %v758_v22 = vmul.f32 %v6330_v25, %v6450_v38 }
 0x1ca   : > { %v1024_v0 = vrot.slane %v4644_v41, 7  ;;  %v1775_v51 = vrot.slane %v6584_v11, 1  ;;  %v1023_v10 = vrot.slane %v1022_v59, 4  ;;  %1138 = vst [vmem:[#allocation2 + $0xa8] sm:$0xe] %v1022_v59  ;;  %v6599_v13 = vsel %vm1750_vm3, %v1772_v50, %v1773_v48  ;;  %2080 = vmatprep.mubr.bf16.mxu1 %v6546_v52  ;;  %v5750_v38 = vld [vmem:[#allocation8 + $0x78] sm:$0xff]  }
 0x1cb   : > { %v761_v15 = vmul.f32 %v6458_v44, %v6330_v25  ;;  %v6606_v54 = vld [vmem:[#allocation2 + $0x70] sm:$0xf]  ;;  %v6608_v21 = vld [vmem:[#allocation2 + $0x80] ss:$0 sps:$4 sm:$0x11]   ;;  %v1030_v26 = vsel %vm6360_vm2, %v1028_v58, %v1029_v2  ;;  %v1031_v24 = vrot.slane %v1029_v2, 4  ;;  %5187 = vmatmul.mubr.bf16.gmra.mrb[24].mxu0 %v6599_v13  ;;  %v803_v31 = vadd.f32 %v6335_v27, %v760_v7  ;;  %4827 = vmatpush3.bf16.msra.mxu1 %v5747_v9 }
 0x1cc   : > { %v1026_v23 = vrot.slane %v1024_v0, 4  ;;  %v6614_v28 = vsel %vm1750_vm3, %v1775_v51, %v1776_v62  ;;  %1142 = vst [vmem:[#allocation2 + $0xb8] sm:$0xf] %v1030_v26  ;;  %v1025_v44 = vsel %vm6360_vm2, %v1023_v10, %v1024_v0  ;;  %v801_v32 = vadd.f32 %v6335_v27, %v758_v22  ;;  %v6622_v3 = vld [vmem:[#allocation2 + $0x7c] sm:$0xf]  ;;  %5219 = vmatpush3.bf16.msra.mxu0 %v6570_v19  ;;  %v5698_v50 = vld [vmem:[#allocation8 + $0xb0] sm:$0xff]  }
 0x1cd   : > { %5190 = vmatprep.mubr.bf16.mxu0 %v6614_v28  ;;  %v804_v48 = vadd.f32 %v6335_v27, %v761_v15  ;;  %1143 = vst [vmem:[#allocation2 + $0xbc] sm:$0x1] %v1031_v24  ;;  %1139 = vst [vmem:[#allocation2 + $0xac] sm:$0xf] %v1025_v44  ;;  %v759_v45 = vmul.f32 %v6330_v25, %v6462_v49  ;;  %v6627_v41 = vcombine.low %v1687_v34, %v6606_v54  ;;  %v1689_v59 = vld [vmem:[#allocation2 + $0x84] sm:$0xe] }
 0x1ce   : > { %1140 = vst [vmem:[#allocation2 + $0xb0] sm:$0x1] %v1026_v23  ;;  %v1779_v56 = vrot.slane %v6586_v17, 1  ;;  %v6631_v58 = vcombine.low %v1688_v57, %v6622_v3  ;;  %v839_v62 = vmax.f32 %v803_v31, 0.0  ;;  %v837_v2 = vmax.f32 %v801_v32, 0.0  ;;  %5220 = vmatprep.subr.bf16.mxu0 %v6592_v4  ;;  %4828 = vmatprep.subr.bf16.mxu1 %v5750_v38  ;;  %v5751_v7 = vld [vmem:[#allocation8 + $0x38] sm:$0xff]  }
 0x1cf   : > { %7540 = vst [vmem:[#allocation25_spill] sm:$0xff] %v6627_v41  ;;  %v840_v0 = vmax.f32 %v804_v48, 0.0  ;;  %v1782_v51 = vrot.slane %v6608_v21, 1  ;;  %v802_v25 = vadd.f32 %v6335_v27, %v759_v45  ;;  %v1778_v49 = vrot.slane %v6627_v41, 1  ;;  %v1690_v57 = vld [vmem:[#allocation2 + $0x90] sm:$0xe]  ;;  %4829 = vmatpush3.bf16.msra.mxu1 %v5751_v7 }
 0x1d0   : > { %7541 = vst [vmem:[#allocation26_spill] sm:$0xff] %v6631_v58  ;;  %v1781_v34 = vrot.slane %v6631_v58, 1  ;;  %v4649_v10 = vpack.c.bf16 %v839_v62, %v839_v62  ;;  %v4647_v19 = vpack.c.bf16 %v837_v2, %v837_v2  ;;  %v6639_v15 = vld [vmem:[#allocation2 + $0x88] sm:$0xf]  ;;  %v5703_v26 = vld [vmem:[#allocation8 + $0xb8] sm:$0xff]   ;;  %5221 = vmatpush3.bf16.msra.mxu0 %v6592_v4 }
 0x1d1   : > { %v4650_v22 = vpack.c.bf16 %v840_v0, %v840_v0  ;;  %v838_v24 = vmax.f32 %v802_v25, 0.0  ;;  %2081 = vmatmul.mubr.bf16.gmra.mrb[36].mxu1 %v6533_v47  ;;  %v6643_v9 = vsel %vm1750_vm3, %v1778_v49, %v1779_v56  ;;  %v6649_v23 = vcombine.low %v1689_v59, %v6639_v15  ;;  %v6651_v38 = vld [vmem:[#allocation2 + $0x94] sm:$0xf]  ;;  %v6653_v44 = vld [vmem:[#allocation2 + $0x98] ss:$0 sps:$4 sm:$0x11]   ;;  %5222 = vmatprep.subr.bf16.mxu0 %v5698_v50 }
 0x1d2   : > { %v6646_v27 = vsel %vm1750_vm3, %v1781_v34, %v1782_v51  ;;  %v1037_v31 = vrot.slane %v4649_v10, 7  ;;  %v1032_v32 = vrot.slane %v4647_v19, 7  ;;  %2088 = vmatprep.mubr.bf16.mxu1 %v6581_v36  ;;  %v6657_v47 = vld [vmem:[#allocation2 + $0x8c] ss:$0 sps:$4 sm:$0x11]   ;;  %v6660_v45 = vcombine.low %v1690_v57, %v6651_v38  ;;  %v5709_v25 = vld [vmem:[#allocation8 + $0x1c0] sm:$0xff]  }
 0x1d3   : > { %7542 = vst [vmem:[#allocation27_spill] sm:$0xff] %v6649_v23  ;;  %v1039_v48 = vrot.slane %v4650_v22, 7  ;;  %v4648_v56 = vpack.c.bf16 %v838_v24, %v838_v24  ;;  %5191 = vmatmul.mubr.bf16.gmra.mrb[28].mxu0 %v6643_v9  ;;  %v1788_v51 = vrot.slane %v6653_v44, 1  ;;  %v1784_v34 = vrot.slane %v6649_v23, 1  ;;  %v1692_v7 = vld [vmem:[#allocation2 + $0xa8] sm:$0xe] }
 0x1d4   : > { %7543 = vst [vmem:[#allocation28_spill] sm:$0xff] %v6660_v45  ;;  %v1038_v59 = vrot.slane %v1037_v31, 4  ;;  %1147 = vst [vmem:[#allocation2 + $0xcc] sm:$0xe] %v1037_v31  ;;  %v1033_v62 = vrot.slane %v1032_v32, 4  ;;  %5194 = vmatprep.mubr.bf16.mxu0 %v6646_v27  ;;  %v1787_v0 = vrot.slane %v6660_v45, 1  ;;  %5223 = vmatpush3.bf16.msra.mxu0 %v5698_v50 }
 0x1d5   : > { %1144 = vst [vmem:[#allocation2 + $0xc0] sm:$0xe] %v1032_v32  ;;  %v1041_v4 = vrot.slane %v1039_v48, 4  ;;  %1194 = vst [vmem:[#allocation2 + $0xcc] sm:$0xf] %v6040_v8  ;;  %v1034_v2 = vrot.slane %v4648_v56, 7  ;;  %5224 = vmatprep.subr.bf16.mxu0 %v5703_v26 }
 0x1d6   : > { %v1040_v49 = vsel %vm6360_vm2, %v1038_v59, %v1039_v48  ;;  %v1785_v57 = vrot.slane %v6657_v47, 1  ;;  %v1691_v22 = vld [vmem:[#allocation2 + $0x9c] sm:$0xe]  ;;  %v6675_v50 = vld [vmem:[#allocation2 + $0xac] sm:$0xf]  ;;  %v6679_v24 = vsel %vm1750_vm3, %v1787_v0, %v1788_v51 }
 0x1d7   : > { %1149 = vst [vmem:[#allocation2 + $0xd4] sm:$0x1] %v1041_v4  ;;  %1148 = vst [vmem:[#allocation2 + $0xd0] sm:$0xf] %v1040_v49  ;;  %v1035_v10 = vsel %vm6360_vm2, %v1033_v62, %v1034_v2  ;;  %v1036_v19 = vrot.slane %v1034_v2, 4  ;;  %v6686_v5 = vcombine.low %v1692_v7, %v6675_v50 }
 0x1d8   : > { %1196 = vst [vmem:[#allocation2 + $0xd4] sm:$0x3] %v6040_v8  ;;  %1195 = vst [vmem:[#allocation2 + $0xd0] sm:$0xf] %v6040_v8  ;;  %v6681_v31 = vld [vmem:[#allocation2 + $0xa0] sm:$0xf]  ;;  %5225 = vmatpush3.bf16.msra.mxu0 %v5703_v26  ;;  %v6689_v48 = vsel %vm1750_vm3, %v1784_v34, %v1785_v57 }
 0x1d9   : > { %1145 = vst [vmem:[#allocation2 + $0xc4] sm:$0xf] %v1035_v10  ;;  %1146 = vst [vmem:[#allocation2 + $0xc8] sm:$0x1] %v1036_v19  ;;  %2089 = vmatmul.mubr.bf16.gmra.mrb[40].mxu1 %v6546_v52  ;;  %v6695_v52 = vcombine.low %v1691_v22, %v6681_v31  ;;  %4950 = vmatprep.subr.bf16.mxu0 %v5709_v25  ;;  %v1793_v56 = vrot.slane %v6686_v5, 1 }
 0x1da   : > { %v6683_v32 = vld [vmem:[#allocation2 + $0xb0] ss:$0 sps:$4 sm:$0x11]   ;;  %7544 = vst [vmem:[#allocation29_spill] sm:$0xff] %v6686_v5  ;;  %2096 = vmatprep.mubr.bf16.mxu1 %v6599_v13  ;;  %v1693_v2 = vld [vmem:[#allocation2 + $0xb4] sm:$0xe] }
 0x1db   : > { %v6692_v8 = vld [vmem:[#allocation2 + $0xa4] ss:$0 sps:$4 sm:$0x11]   ;;  %7545 = vst [vmem:[#allocation30_spill] sm:$0xff] %v6695_v52  ;;  %5195 = vmatmul.mubr.bf16.gmra.mrb[32].mxu0 %v6689_v48  ;;  %v1794_v59 = vrot.slane %v6683_v32, 1  ;;  %v1790_v26 = vrot.slane %v6695_v52, 1 }
 0x1dc   : > { %5198 = vmatprep.mubr.bf16.mxu0 %v6679_v24  ;;  %v1791_v62 = vrot.slane %v6692_v8, 1  ;;  %v1694_v4 = vld [vmem:[#allocation2 + $0xc0] sm:$0xe]  ;;  %v6709_v25 = vld [vmem:[#allocation2 + $0xb8] sm:$0xf] }
 0x1dd   : > { %v6707_v51 = vsel %vm1750_vm3, %v1793_v56, %v1794_v59  ;;  %v6720_v7 = vld [vmem:[#allocation2 + $0xbc] ss:$0 sps:$4 sm:$0x11]   ;;  %v6723_v10 = vcombine.low %v1693_v2, %v6709_v25  ;;  %v1695_v22 = vld [vmem:[#allocation2 + $0xcc] sm:$0xe] }
 0x1de   : > { %v6717_v57 = vsel %vm1750_vm3, %v1790_v26, %v1791_v62  ;;  %v1209_v45 = vld [vmem:[#allocation2 + $0x30] sm:$0xf]  ;;  %v1221_v33 = vld [vmem:[#allocation2 + $0x60] sm:$0xf] }
 0x1df   : > { %7547 = vst [vmem:[#allocation32_spill] sm:$0xff] %v6723_v10  ;;  %v6730_v26 = vld [vmem:[#allocation2 + $0xd0] sm:$0xf]  ;;  %v1796_v62 = vrot.slane %v6723_v10, 1 }
 0x1e0   : > { %v6703_v0 = vld [vmem:[#allocation2 + $0xc4] sm:$0xf]  ;;  %v6711_v49 = vld [vmem:[#allocation2 + $0xc8] ss:$0 sps:$4 sm:$0x11]   ;;  %v6737_v52 = vcombine.low %v1695_v22, %v6730_v26  ;;  %v4462_v22 = vcombine.low %v1209_v45, %v6501_v42 }
 0x1e1   : > { %2097 = vmatmul.mubr.bf16.gmra.mrb[44].mxu1 %v6581_v36  ;;  %v6714_v34 = vcombine.low %v1694_v4, %v6703_v0  ;;  %v1203_v36 = vld [vmem:[#allocation2 + $0x18] sm:$0xf]  ;;  %v1800_v59 = vrot.slane %v6711_v49, 1  ;;  %v1797_v4 = vrot.slane %v6720_v7, 1 }
 0x1e2   : > { %2104 = vmatprep.mubr.bf16.mxu1 %v6614_v28  ;;  %v4458_v19 = vcombine.low %v1203_v36, %v6446_v35  ;;  %v6734_v5 = vld [vmem:[#allocation2 + $0xd4] ss:$0 sps:$4 sm:$0x11]   ;;  %7548 = vst [vmem:[#allocation33_spill] sm:$0xff] %v6737_v52  ;;  %v1206_v36 = vld [vmem:[#allocation2 + $0x24] sm:$0xf] }
 0x1e3   : > { %7546 = vst [vmem:[#allocation31_spill] sm:$0xff] %v6714_v34  ;;  %5199 = vmatmul.mubr.bf16.gmra.mrb[36].mxu0 %v6717_v57  ;;  %v1799_v56 = vrot.slane %v6714_v34, 1  ;;  %v6744_v34 = vsel %vm1750_vm3, %v1796_v62, %v1797_v4  ;;  %v4460_v10 = vcombine.low %v1206_v36, %v6468_v53  ;;  %v1428_v62 = vshll.u32 %v6448_v37, 16  ;;  %v1212_v36 = vld [vmem:[#allocation2 + $0x3c] sm:$0xf] }
 0x1e4   : > { %5202 = vmatprep.mubr.bf16.mxu0 %v6707_v51  ;;  %v1423_v2 = vshll.u32 %v4458_v19, 16  ;;  %v1447_v41 = vshll.u32 %v4462_v22, 16  ;;  %v4464_v45 = vcombine.low %v1212_v36, %v6515_v61 }
 0x1e5   : > { %v6741_v35 = vsel %vm1750_vm3, %v1799_v56, %v1800_v59  ;;  %v1803_v56 = vrot.slane %v6734_v5, 1  ;;  %v1421_v59 = vshrl.u32 %v4458_v19, 16  ;;  %v1435_v4 = vshll.u32 %v4460_v10, 16 }
 0x1e6   : > { %v1425_v23 = vrot.slane %v1423_v2, 1  ;;  %v1430_v2 = vrot.slane %v1428_v62, 1  ;;  %v1449_v37 = vrot.slane %v1447_v41, 1 }
 0x1e7   : > { %v1437_v42 = vrot.slane %v1435_v4, 1  ;;  %v1459_v4 = vshll.u32 %v4464_v45, 16 }
 0x1e8   : > { %v1426_v58 = vor.u32 %v1425_v23, %v1421_v59  ;;  %v1452_v59 = vshll.u32 %v6489_v30, 16 }
 0x1e9   : > { %2105 = vmatmul.mubr.bf16.gmra.mrb[48].mxu1 %v6599_v13  ;;  %v1802_v13 = vrot.slane %v6737_v52, 1  ;;  %v1215_v52 = vld [vmem:[#allocation2 + $0x48] sm:$0xf] }
 0x1ea   : > { %2112 = vmatprep.mubr.bf16.mxu1 %v6643_v9  ;;  %v6759_v19 = vsel %vm1395_vm4, %v1426_v58, %v1430_v2  ;;  %v4466_v23 = vcombine.low %v1215_v52, %v6536_v39  ;;  %v1454_v41 = vrot.slane %v1452_v59, 1  ;;  %v5713_v58 = vld [vmem:[#allocation8 + $0x1c8] sm:$0xff]   ;;  %v1218_v39 = vld [vmem:[#allocation2 + $0x54] sm:$0xf]  ;;  %v4470_v2 = vcombine.low %v1221_v33, %v6578_v40  ;;  %v5721_v33 = vld [vmem:[#allocation8 + $0x190] sm:$0xff]  }
 0x1eb   : > { %5203 = vmatmul.mubr.bf16.gmra.mrb[40].mxu0 %v6744_v34  ;;  %v1804_v53 = vsel %vm1750_vm3, %v1802_v13, %v1803_v56  ;;  %v1433_v13 = vshrl.u32 %v4460_v10, 16  ;;  %v1445_v56 = vshrl.u32 %v4462_v22, 16  ;;  %v4468_v30 = vcombine.low %v1218_v39, %v6564_v1  ;;  %v5719_v1 = vld [vmem:[#allocation8 + $0x1d0] sm:$0xff]   ;;  %v1227_v40 = vld [vmem:[#allocation2 + $0x78] sm:$0xf] }
 0x1ec   : > { %5206 = vmatprep.mubr.bf16.mxu0 %v6741_v35  ;;  %v1471_v61 = vshll.u32 %v4466_v23, 16  ;;  %v4474_v39 = vcombine.low %v1227_v40, %v6622_v3  ;;  %v1512_v3 = vshll.u32 %v6586_v17, 16  ;;  %v5738_v40 = vld [vmem:[#allocation8 + $0x1a8] sm:$0xff]  }
 0x1ed   : > { %v1438_v62 = vor.u32 %v1437_v42, %v1433_v13  ;;  %v1450_v11 = vor.u32 %v1449_v37, %v1445_v56  ;;  %v1464_v42 = vshll.u32 %v6507_v55, 16  ;;  %v5715_v37 = vld [vmem:[#allocation8 + $0x188] sm:$0xff]   ;;  %v1469_v13 = vshrl.u32 %v4466_v23, 16  ;;  %v5723_v55 = vld [vmem:[#allocation8 + $0x1d8] sm:$0xff]  }
 0x1ee   : > { %v1473_v22 = vrot.slane %v1471_v61, 1  ;;  %v1483_v59 = vshll.u32 %v4468_v30, 16  ;;  %v1493_v23 = vshrl.u32 %v4470_v2, 16 }
 0x1ef   : > { %v6773_v10 = vsel %vm1395_vm4, %v1450_v11, %v1454_v41  ;;  %v1495_v11 = vshll.u32 %v4470_v2, 16  ;;  %v1466_v61 = vrot.slane %v1464_v42, 1  ;;  %v5729_v2 = vld [vmem:[#allocation8 + $0x1e0] sm:$0xff]  }
 0x1f1   : > { %2113 = vmatmul.mubr.bf16.gmra.mrb[52].mxu1 %v6614_v28  ;;  %v1440_v28 = vshll.u32 %v6456_v43, 16  ;;  %v1461_v43 = vrot.slane %v1459_v4, 1  ;;  %v1224_v4 = vld [vmem:[#allocation2 + $0x6c] sm:$0xf] }
 0x1f2   : > { %2120 = vmatprep.mubr.bf16.mxu1 %v6646_v27 }
 0x1f3   : > { %5207 = vmatmul.mubr.bf16.gmra.mrb[44].mxu0 %v1804_v53  ;;  %v1442_v36 = vrot.slane %v1440_v28, 1  ;;  %v5711_v53 = vld [vmem:[#allocation8 + $0x180] sm:$0xff]   ;;  %v1476_v28 = vshll.u32 %v6542_v46, 16  ;;  %v1485_v46 = vrot.slane %v1483_v59, 1  ;;  %v1233_v59 = vld [vmem:[#allocation2 + $0x90] sm:$0xf] }
 0x1f4   : > { %5226 = vmatprep.mubr.bf16.mxu0 %v6759_v19 }
 0x1f5   : > { %v6767_v52 = vsel %vm1395_vm4, %v1438_v62, %v1442_v36  ;;  %v1474_v62 = vor.u32 %v1473_v22, %v1469_v13  ;;  %v1488_v22 = vshll.u32 %v6552_v12, 16  ;;  %v1524_v12 = vshll.u32 %v6608_v21, 16 }
 0x1f6   : > { %v4478_v21 = vcombine.low %v1233_v59, %v6651_v38  ;;  %v1536_v38 = vshll.u32 %v6657_v47, 16 }
 0x1f9   : > { %2121 = vmatmul.mubr.bf16.gmra.mrb[56].mxu1 %v6643_v9  ;;  %v1457_v9 = vshrl.u32 %v4464_v45, 16  ;;  %v1478_v45 = vrot.slane %v1476_v28, 1  ;;  %v1519_v28 = vshll.u32 %v4474_v39, 16 }
 0x1fa   : > { %2128 = vmatprep.mubr.bf16.mxu1 %v6689_v48 }
 0x1fb   : > { %5227 = vmatmul.mubr.bf16.vlgmr.msra.gmra.mrb[16].mxu0 %v6767_v52  ;;  %v1462_v56 = vor.u32 %v1461_v43, %v1457_v9  ;;  %v6787_v41 = vsel %vm1395_vm4, %v1474_v62, %v1478_v45  ;;  %v1481_v43 = vshrl.u32 %v4468_v30, 16  ;;  %v5725_v9 = vld [vmem:[#allocation8 + $0x198] sm:$0xff]   ;;  %v5735_v30 = vld [vmem:[#allocation8 + $0x1e8] sm:$0xff]   ;;  %v1521_v17 = vrot.slane %v1519_v28, 1  ;;  %v5743_v45 = vld [vmem:[#allocation8 + $0x1f0] sm:$0xff]  }
 0x1fc   : > { %4951 = vmatpush3.bf16.msra.mxu0 %v5711_v53  ;;  %5230 = vmatprep.mubr.bf16.mxu0 %v6773_v10  ;;  %v4472_v53 = vcombine.low %v1224_v4, %v6606_v54  ;;  %v5755_v28 = vld [vmem:[#allocation8 + $0x1b8] sm:$0xff]  }
 0x1fd   : > { %4952 = vmatprep.subr.bf16.mxu0 %v5713_v58  ;;  %v6781_v36 = vsel %vm1395_vm4, %v1462_v56, %v1466_v61  ;;  %v1497_v58 = vrot.slane %v1495_v11, 1  ;;  %v1486_v54 = vor.u32 %v1485_v46, %v1481_v43  ;;  %v1490_v56 = vrot.slane %v1488_v22, 1  ;;  %v1239_v43 = vld [vmem:[#allocation2 + $0xa8] sm:$0xf] }
 0x1fe   : > { %v1507_v42 = vshll.u32 %v4472_v53, 16  ;;  %v1505_v11 = vshrl.u32 %v4472_v53, 16  ;;  %v1514_v46 = vrot.slane %v1512_v3, 1  ;;  %v5746_v22 = vld [vmem:[#allocation8 + $0x1b0] sm:$0xff]  }
 0x1ff   : > { %v6797_v62 = vsel %vm1395_vm4, %v1486_v54, %v1490_v56 }
 0x200   : > { %4953 = vmatpush3.bf16.msra.mxu0 %v5715_v37  ;;  %v1498_v37 = vor.u32 %v1497_v58, %v1493_v23  ;;  %v1509_v4 = vrot.slane %v1507_v42, 1  ;;  %v1543_v58 = vshll.u32 %v4478_v21, 16 }
 0x201   : > { %2129 = vmatmul.mubr.bf16.gmra.mrb[60].mxu1 %v6646_v27  ;;  %4954 = vmatprep.subr.bf16.mxu0 %v5719_v1  ;;  %v1500_v27 = vshll.u32 %v6568_v18, 16  ;;  %v1230_v1 = vld [vmem:[#allocation2 + $0x84] sm:$0xf]  ;;  %v5731_v18 = vld [vmem:[#allocation8 + $0x1a0] sm:$0xff]  }
 0x202   : > { %2136 = vmatprep.mubr.bf16.mxu1 %v6679_v24  ;;  %v4476_v61 = vcombine.low %v1230_v1, %v6639_v15  ;;  %v1526_v15 = vrot.slane %v1524_v12, 1  ;;  %v1545_v47 = vrot.slane %v1543_v58, 1  ;;  %v6821_v1 = vld [vmem:[#allocation8 + $0x200] sm:$0xff]   ;;  %v1248_v58 = vld [vmem:[#allocation2 + $0xcc] sm:$0xf] }
 0x203   : > { %5231 = vmatmul.mubr.bf16.gmra.mrb[20].mxu0 %v6781_v36  ;;  %v1502_v13 = vrot.slane %v1500_v27, 1  ;;  %v1236_v27 = vld [vmem:[#allocation2 + $0x9c] sm:$0xf] }
 0x204   : > { %5234 = vmatprep.mubr.bf16.mxu0 %v6787_v41  ;;  %4955 = vmatpush3.bf16.msra.mxu0 %v5721_v33  ;;  %v1531_v23 = vshll.u32 %v4476_v61, 16  ;;  %v1529_v54 = vshrl.u32 %v4476_v61, 16 }
 0x205   : > { %4956 = vmatprep.subr.bf16.mxu0 %v5723_v55  ;;  %v6803_v33 = vsel %vm1395_vm4, %v1498_v37, %v1502_v13  ;;  %v1510_v55 = vor.u32 %v1509_v4, %v1505_v11  ;;  %v4480_v37 = vcombine.low %v1236_v27, %v6681_v31  ;;  %v1242_v31 = vld [vmem:[#allocation2 + $0xb4] sm:$0xf]  ;;  %v1200_v11 = vld [vmem:[#allocation2 + $0xc] sm:$0xf]  ;;  %v1245_v4 = vld [vmem:[#allocation2 + $0xc0] sm:$0xf] }
 0x206   : > { %v1533_v42 = vrot.slane %v1531_v23, 1  ;;  %v4484_v61 = vcombine.low %v1242_v31, %v6709_v25  ;;  %v1197_v23 = vld [vmem:[#allocation2] sm:$0xf] }
 0x207   : > { %v1555_v59 = vshll.u32 %v4480_v37, 16 }
 0x208   : > { %4957 = vmatpush3.bf16.msra.mxu0 %v5725_v9  ;;  %v5752_v9 = vld [vmem:[#allocation8 + $0x1f8] sm:$0xff]   ;;  %v1534_v56 = vor.u32 %v1533_v42, %v1529_v54  ;;  %v1584_v54 = vshll.u32 %v6720_v7, 16 }
 0x209   : > { %2137 = vmatmul.mubr.bf16.gmra.mrb[64].mxu1 %v6689_v48  ;;  %4958 = vmatprep.subr.bf16.mxu0 %v5729_v2  ;;  %v1517_v48 = vshrl.u32 %v4474_v39, 16  ;;  %v1548_v39 = vshll.u32 %v6653_v44, 16  ;;  %v6811_v2 = vsel %vm1395_vm4, %v1510_v55, %v1514_v46  ;;  %v4482_v44 = vcombine.low %v1239_v43, %v6675_v50  ;;  %v5792_v42 = vld [vmem:[#allocation2 + $0x14] ss:$0 sps:$4 sm:$0x11]  }
 0x20a   : > { %2144 = vmatprep.mubr.bf16.mxu1 %v6717_v57  ;;  %v1560_v50 = vshll.u32 %v6692_v8, 16  ;;  %v1572_v55 = vshll.u32 %v6683_v32, 16  ;;  %v4486_v46 = vcombine.low %v1245_v4, %v6703_v0  ;;  %v1577_v0 = vshrl.u32 %v4484_v61, 16 }
 0x20b   : > { %5235 = vmatmul.mubr.bf16.gmra.mrb[24].mxu0 %v6797_v62  ;;  %v1522_v53 = vor.u32 %v1521_v17, %v1517_v48  ;;  %v1550_v12 = vrot.slane %v1548_v39, 1  ;;  %v5790_v48 = vld [vmem:[#allocation2 + $0x10] sm:$0xf]  ;;  %v1565_v8 = vshrl.u32 %v4482_v44, 16 }
 0x20c   : > { %5238 = vmatprep.mubr.bf16.mxu0 %v6803_v33  ;;  %4959 = vmatpush3.bf16.msra.mxu0 %v5731_v18  ;;  %v1538_v18 = vrot.slane %v1536_v38, 1  ;;  %v4456_v17 = vcombine.low %v1200_v11, %v5790_v48  ;;  %v1562_v43 = vrot.slane %v1560_v50, 1  ;;  %v1574_v39 = vrot.slane %v1572_v55, 1  ;;  %v5793_v50 = vld [vmem:[#allocation2 + $0x8] ss:$0 sps:$4 sm:$0x11]  }
 0x20d   : > { %4960 = vmatprep.subr.bf16.mxu0 %v5735_v30  ;;  %v6817_v13 = vsel %vm1395_vm4, %v1522_v53, %v1526_v15  ;;  %v1567_v30 = vshll.u32 %v4482_v44, 16  ;;  %v1579_v53 = vshll.u32 %v4484_v61, 16  ;;  %v1404_v61 = vshll.u32 %v5793_v50, 16 }
 0x20e   : > { %v1411_v15 = vshll.u32 %v4456_v17, 16 }
 0x20f   : > { %v1569_v25 = vrot.slane %v1567_v30, 1 }
 0x210   : > { %4961 = vmatpush3.bf16.msra.mxu0 %v5738_v40  ;;  %v1553_v40 = vshrl.u32 %v4480_v37, 16  ;;  %v1416_v37 = vshll.u32 %v5792_v42, 16  ;;  %v1413_v44 = vrot.slane %v1411_v15, 1  ;;  %v2881_v42 = vshll.u32 %v6436_v16, 16 }
 0x211   : > { %2145 = vmatmul.mubr.bf16.gmra.mrb[68].mxu1 %v6679_v24  ;;  %4962 = vmatprep.subr.bf16.mxu0 %v5743_v45  ;;  %v1541_v24 = vshrl.u32 %v4478_v21, 16  ;;  %v6828_v21 = vsel %vm1395_vm4, %v1534_v56, %v1538_v18  ;;  %v1557_v45 = vrot.slane %v1555_v59, 1  ;;  %v1570_v32 = vor.u32 %v1569_v25, %v1565_v8 }
 0x212   : > { %2152 = vmatprep.mubr.bf16.mxu1 %v6707_v51  ;;  %v1409_v56 = vshrl.u32 %v4456_v17, 16  ;;  %v1589_v59 = vshrl.u32 %v4486_v46, 16  ;;  %v1608_v17 = vshll.u32 %v6734_v5, 16 }
 0x213   : > { %5239 = vmatmul.mubr.bf16.gmra.mrb[28].mxu0 %v6811_v2  ;;  %v1546_v3 = vor.u32 %v1545_v47, %v1541_v24  ;;  %v1558_v27 = vor.u32 %v1557_v45, %v1553_v40  ;;  %v4488_v24 = vcombine.low %v1248_v58, %v6730_v26  ;;  %v1581_v47 = vrot.slane %v1579_v53, 1  ;;  %v5758_v53 = vld [vmem:[#allocation2 + $0x8] ss:$0 sps:$4 sm:$0x33]  }
 0x214   : > { %5242 = vmatprep.mubr.bf16.mxu0 %v6817_v13  ;;  %4963 = vmatpush3.bf16.msra.mxu0 %v5746_v22  ;;  %v5791_v22 = vld [vmem:[#allocation2 + $0x4] sm:$0xf]  ;;  %v6847_v7 = vsel %vm1395_vm4, %v1570_v32, %v1574_v39  ;;  %v1596_v26 = vshll.u32 %v6711_v49, 16  ;;  %v1414_v4 = vor.u32 %v1413_v44, %v1409_v56  ;;  %v2895_v40 = vshrl.u32 %v6409_v29, 16 }
 0x215   : > { %4964 = vmatprep.subr.bf16.mxu0 %v5752_v9  ;;  %v4454_v38 = vcombine.low %v1197_v23, %v5791_v22  ;;  %v1591_v9 = vshll.u32 %v4486_v46, 16  ;;  %v1603_v30 = vshll.u32 %v4488_v24, 16  ;;  %v1582_v11 = vor.u32 %v1581_v47, %v1577_v0 }
 0x216   : > { %v2898_v45 = vshll.u32 %v6409_v29, 16  ;;  %v1598_v49 = vrot.slane %v1596_v26, 1  ;;  %v1601_v46 = vshrl.u32 %v4488_v24, 16  ;;  %v2897_v22 = vrot.slane %v2895_v40, 1 }
 0x217   : > { %v1399_v18 = vshll.u32 %v4454_v38, 16  ;;  %v1593_v31 = vrot.slane %v1591_v9, 1  ;;  %v1605_v23 = vrot.slane %v1603_v30, 1  ;;  %v5759_v9 = vld [vmem:[#allocation2 + $0x20] ss:$0 sps:$4 sm:$0x33]  }
 0x218   : > { %4965 = vmatpush3.bf16.msra.mxu0 %v5755_v28  ;;  %v6842_v28 = vsel %vm1395_vm4, %v1558_v27, %v1562_v43  ;;  %v1406_v27 = vrot.slane %v1404_v61, 1  ;;  %v1610_v43 = vrot.slane %v1608_v17, 1  ;;  %v2900_v29 = vrot.slane %v2898_v45, 2 }
 0x219   : > { %2153 = vmatmul.mubr.bf16.gmra.mrb[72].mxu1 %v6717_v57  ;;  %5258 = vmatprep.subr.bf16.mxu0 %v6821_v1  ;;  %v6834_v57 = vsel %vm1395_vm4, %v1546_v3, %v1550_v12  ;;  %v1586_v3 = vrot.slane %v1584_v54, 1  ;;  %v1418_v12 = vrot.slane %v1416_v37, 1  ;;  %v1401_v48 = vrot.slane %v1399_v18, 1 }
 0x21a   : > { %2160 = vmatprep.mubr.bf16.mxu1 %v6744_v34  ;;  %v1594_v55 = vor.u32 %v1593_v31, %v1589_v59  ;;  %v1606_v54 = vor.u32 %v1605_v23, %v1601_v46  ;;  %v2886_v37 = vshrl.u32 %v5758_v53, 16  ;;  %v2889_v24 = vshll.u32 %v5758_v53, 16  ;;  %v5761_v46 = vld [vmem:[#allocation8 + $0x208] sm:$0xff]  }
 0x21b   : > { %5243 = vmatmul.mubr.bf16.gmra.mrb[32].mxu0 %v6828_v21  ;;  %v6856_v15 = vsel %vm1395_vm4, %v1582_v11, %v1586_v3  ;;  %v1419_v58 = vsel %vm1395_vm4, %v1414_v4, %v1418_v12  ;;  %v2901_v47 = vor.u32 %v2900_v29, %v2897_v22  ;;  %v2912_v44 = vshrl.u32 %v6475_v6, 16  ;;  %v5762_v22 = vld [vmem:[#allocation2 + $0x38] ss:$0 sps:$4 sm:$0x33]  }
 0x21c   : > { %5246 = vmatprep.mubr.bf16.mxu0 %v6834_v57  ;;  %v2915_v56 = vshll.u32 %v6475_v6, 16  ;;  %v2920_v31 = vshrl.u32 %v5759_v9, 16  ;;  %v2923_v26 = vshll.u32 %v5759_v9, 16  ;;  %v2883_v3 = vrot.slane %v2881_v42, 2 }
 0x21d   : > { %v2888_v12 = vrot.slane %v2886_v37, 1  ;;  %v2891_v30 = vrot.slane %v2889_v24, 2  ;;  %v5760_v6 = vld [vmem:[#allocation2 + $0x2c] ss:$0 sps:$4 sm:$0x33]   ;;  %v2929_v40 = vshrl.u32 %v6480_v14, 16 }
 0x21e   : > { %v2917_v11 = vrot.slane %v2915_v56, 2  ;;  %v2925_v50 = vrot.slane %v2923_v26, 2  ;;  %v2949_v29 = vshll.u32 %v6519_v63, 16  ;;  %v2957_v9 = vshll.u32 %v5762_v22, 16  ;;  %v5773_v26 = vld [vmem:[#allocation8 + $0x228] sm:$0xff]  }
 0x21f   : > { %v2931_v23 = vrot.slane %v2929_v40, 1 }
 0x220   : > { %v2951_v37 = vrot.slane %v2949_v29, 2 }
 0x221   : > { %2161 = vmatmul.mubr.bf16.gmra.mrb[76].mxu1 %v6707_v51  ;;  %v5756_v51 = vld [vmem:[#allocation2 + $0x14] ss:$0 sps:$4 sm:$0x33]  }
 0x222   : > { %2168 = vmatprep.mubr.bf16.mxu1 %v6741_v35  ;;  %v1397_v35 = vshrl.u32 %v4454_v38, 16  ;;  %v2903_v8 = vshrl.u32 %v5756_v51, 16  ;;  %v2906_v25 = vshll.u32 %v5756_v51, 16  ;;  %v6861_v38 = vsel %vm1395_vm4, %v1594_v55, %v1598_v49 }
 0x223   : > { %5247 = vmatmul.mubr.bf16.gmra.mrb[36].mxu0 %v6842_v28  ;;  %v1611_v51 = vsel %vm1395_vm4, %v1606_v54, %v1610_v43  ;;  %v2932_v55 = vshll.u32 %v6480_v14, 16  ;;  %v2937_v49 = vshrl.u32 %v5760_v6, 16  ;;  %v5764_v14 = vld [vmem:[#allocation8 + $0x210] sm:$0xff]   ;;  %v5767_v54 = vld [vmem:[#allocation8 + $0x218] sm:$0xff]  }
 0x224   : > { %5250 = vmatprep.mubr.bf16.mxu0 %v6847_v7  ;;  %v1402_v5 = vor.u32 %v1401_v48, %v1397_v35  ;;  %v2905_v32 = vrot.slane %v2903_v8, 1  ;;  %v2908_v39 = vrot.slane %v2906_v25, 2  ;;  %v2922_v35 = vrot.slane %v2920_v31, 1 }
 0x225   : > { %v2892_v48 = vor.u32 %v2891_v30, %v2888_v12  ;;  %v2940_v8 = vshll.u32 %v5760_v6, 16 }
 0x226   : > { %v1407_v0 = vsel %vm1395_vm4, %v1402_v5, %v1406_v27  ;;  %v2909_v18 = vor.u32 %v2908_v39, %v2905_v32  ;;  %v2926_v45 = vor.u32 %v2925_v50, %v2922_v35  ;;  %v2934_v27 = vrot.slane %v2932_v55, 2 }
 0x227   : > { %v2939_v5 = vrot.slane %v2937_v49, 1  ;;  %v2942_v43 = vrot.slane %v2940_v8, 2  ;;  %v5766_v49 = vld [vmem:[#allocation2 + $0x5c] ss:$0 sps:$4 sm:$0x33]  }
 0x228   : > { %v2910_v4 = vsel %vm2876_vm5, %v2901_v47, %v2909_v18  ;;  %v2935_v32 = vor.u32 %v2934_v27, %v2931_v23  ;;  %v5770_v47 = vld [vmem:[#allocation8 + $0x220] sm:$0xff]   ;;  %v3005_v27 = vshrl.u32 %v5766_v49, 16 }
 0x229   : > { %2169 = vmatmul.mubr.bf16.gmra.mrb[80].mxu1 %v6744_v34  ;;  %v2878_v34 = vshrl.u32 %v6436_v16, 16  ;;  %v2914_v16 = vrot.slane %v2912_v44, 1  ;;  %v2943_v39 = vor.u32 %v2942_v43, %v2939_v5  ;;  %v2966_v44 = vshll.u32 %v6527_v20, 16  ;;  %v7549_v8 = vld [vmem:[#allocation23_spill] sm:$0xff] }
 0x22a   : > { %2514 = vmatprep.mubr.bf16.mxu1 %v1419_v58  ;;  %v3008_v5 = vshll.u32 %v5766_v49, 16 }
 0x22b   : > { %5251 = vmatmul.mubr.bf16.gmra.mrb[40].mxu0 %v6856_v15  ;;  %v2880_v59 = vrot.slane %v2878_v34, 1  ;;  %v2918_v17 = vor.u32 %v2917_v11, %v2914_v16  ;;  %v2954_v34 = vshrl.u32 %v5762_v22, 16  ;;  %v6886_v42 = vsel %vm2876_vm5, %v2935_v32, %v2943_v39  ;;  %v5765_v16 = vld [vmem:[#allocation2 + $0x50] ss:$0 sps:$4 sm:$0x33]   ;;  %v5776_v11 = vld [vmem:[#allocation8 + $0x230] sm:$0xff]  }
 0x22c   : > { %5254 = vmatprep.mubr.bf16.mxu0 %v6861_v38  ;;  %v2968_v12 = vrot.slane %v2966_v44, 2  ;;  %v2988_v6 = vshrl.u32 %v5765_v16, 16  ;;  %v3010_v29 = vrot.slane %v3008_v5, 2  ;;  %v5768_v32 = vld [vmem:[#allocation2 + $0x68] ss:$0 sps:$4 sm:$0x33]  }
 0x22d   : > { %v2884_v61 = vor.u32 %v2883_v3, %v2880_v59  ;;  %v6877_v53 = vsel %vm2876_vm5, %v2918_v17, %v2926_v45  ;;  %v2956_v24 = vrot.slane %v2954_v34, 1  ;;  %v7550_v39 = vld [vmem:[#allocation24_spill] sm:$0xff]  ;;  %v5769_v44 = vld [vmem:[#allocation2 + $0x74] ss:$0 sps:$4 sm:$0x33]  }
 0x22e   : > { %v2990_v55 = vrot.slane %v2988_v6, 1  ;;  %v3014_v34 = vshrl.u32 %v7550_v39, 16 }
 0x22f   : > { %v2893_v25 = vsel %vm2876_vm5, %v2884_v61, %v2892_v48  ;;  %v2991_v61 = vshll.u32 %v5765_v16, 16  ;;  %v5779_v48 = vld [vmem:[#allocation8 + $0x238] sm:$0xff]  }
 0x231   : > { %2515 = vmatmul.mubr.bf16.vlgmr.msra.gmra.mrb[84].mxu1 %v1407_v0  ;;  %v2959_v0 = vrot.slane %v2957_v9, 2  ;;  %v3017_v9 = vshll.u32 %v7550_v39, 16  ;;  %v5774_v39 = vld [vmem:[#allocation2 + $0x98] ss:$0 sps:$4 sm:$0x33]  }
 0x232   : > { %2522 = vmatprep.mubr.bf16.mxu1 %v6759_v19 }
 0x233   : > { %5255 = vmatmul.mubr.bf16.gmra.mrb[44].mxu0 %v1611_v51  ;;  %v2960_v18 = vor.u32 %v2959_v0, %v2956_v24  ;;  %v3016_v24 = vrot.slane %v3014_v34, 1  ;;  %v7554_v34 = vld [vmem:[#allocation28_spill] sm:$0xff] }
 0x234   : > { %3426 = vmatprep.mubr.bf16.mxu0 %v2910_v4 }
 0x239   : > { %2523 = vmatmul.mubr.bf16.gmra.mrb[88].mxu1 %v1419_v58  ;;  %v2946_v58 = vshrl.u32 %v6519_v63, 16  ;;  %v5763_v63 = vld [vmem:[#allocation2 + $0x44] ss:$0 sps:$4 sm:$0x33]  }
 0x23a   : > { %2530 = vmatprep.mubr.bf16.mxu1 %v6767_v52  ;;  %v2971_v59 = vshrl.u32 %v5763_v63, 16  ;;  %v2974_v31 = vshll.u32 %v5763_v63, 16  ;;  %v3019_v63 = vrot.slane %v3017_v9, 2  ;;  %v3082_v9 = vshrl.u32 %v7554_v34, 16 }
 0x23b   : > { %3427 = vmatmul.mubr.bf16.vlgmr.msra.gmra.mrb[48].mxu0 %v2893_v25  ;;  %v3000_v25 = vshll.u32 %v7549_v8, 16 }
 0x23c   : > { %5259 = vmatpush3.bf16.msra.mxu0 %v6821_v1  ;;  %3434 = vmatprep.mubr.bf16.mxu0 %v6877_v53  ;;  %v2948_v1 = vrot.slane %v2946_v58, 1  ;;  %v2973_v30 = vrot.slane %v2971_v59, 1  ;;  %v3007_v58 = vrot.slane %v3005_v27, 1 }
 0x23d   : > { %5260 = vmatprep.subr.bf16.mxu0 %v5761_v46 }
 0x23e   : > { %v2952_v56 = vor.u32 %v2951_v37, %v2948_v1  ;;  %v3022_v1 = vshrl.u32 %v5768_v32, 16  ;;  %v3025_v37 = vshll.u32 %v5768_v32, 16 }
 0x240   : > { %5261 = vmatpush3.bf16.msra.mxu0 %v5761_v46  ;;  %v6895_v3 = vsel %vm2876_vm5, %v2952_v56, %v2960_v18  ;;  %v7551_v56 = vld [vmem:[#allocation25_spill] sm:$0xff] }
 0x241   : > { %2531 = vmatmul.mubr.bf16.gmra.mrb[92].mxu1 %v6759_v19  ;;  %5262 = vmatprep.subr.bf16.mxu0 %v5764_v14  ;;  %v2963_v19 = vshrl.u32 %v6527_v20, 16  ;;  %v2976_v20 = vrot.slane %v2974_v31, 2  ;;  %v3031_v18 = vshrl.u32 %v7551_v56, 16  ;;  %v3034_v59 = vshll.u32 %v7551_v56, 16 }
 0x242   : > { %2538 = vmatprep.mubr.bf16.mxu1 %v6773_v10  ;;  %v3020_v31 = vor.u32 %v3019_v63, %v3016_v24  ;;  %v3084_v24 = vrot.slane %v3082_v9, 1  ;;  %v5775_v56 = vld [vmem:[#allocation2 + $0xa4] ss:$0 sps:$4 sm:$0x33]  }
 0x243   : > { %3435 = vmatmul.mubr.bf16.gmra.mrb[52].mxu0 %v2910_v4  ;;  %v2965_v51 = vrot.slane %v2963_v19, 1  ;;  %v2983_v4 = vshll.u32 %v6558_v60, 16  ;;  %v2977_v50 = vor.u32 %v2976_v20, %v2973_v30  ;;  %v3027_v19 = vrot.slane %v3025_v37, 2 }
 0x244   : > { %3442 = vmatprep.mubr.bf16.mxu0 %v6886_v42  ;;  %5263 = vmatpush3.bf16.msra.mxu0 %v5764_v14  ;;  %v3002_v14 = vrot.slane %v3000_v25, 2  ;;  %v3036_v20 = vrot.slane %v3034_v59, 2  ;;  %v3093_v37 = vshll.u32 %v5774_v39, 16 }
 0x245   : > { %5264 = vmatprep.subr.bf16.mxu0 %v5767_v54  ;;  %v2969_v35 = vor.u32 %v2968_v12, %v2965_v51  ;;  %v2985_v45 = vrot.slane %v2983_v4, 2  ;;  %v3042_v51 = vshll.u32 %v5769_v44, 16  ;;  %v3033_v12 = vrot.slane %v3031_v18, 1  ;;  %v7552_v4 = vld [vmem:[#allocation26_spill] sm:$0xff] }
 0x247   : > { %v6904_v40 = vsel %vm2876_vm5, %v2969_v35, %v2977_v50  ;;  %v3048_v35 = vshrl.u32 %v7552_v4, 16  ;;  %v3051_v50 = vshll.u32 %v7552_v4, 16  ;;  %v3037_v6 = vor.u32 %v3036_v20, %v3033_v12 }
 0x248   : > { %5265 = vmatpush3.bf16.msra.mxu0 %v5767_v54 }
 0x249   : > { %2539 = vmatmul.mubr.bf16.gmra.mrb[96].mxu1 %v6767_v52  ;;  %5266 = vmatprep.subr.bf16.mxu0 %v5770_v47  ;;  %v2980_v52 = vshrl.u32 %v6558_v60, 16  ;;  %v2993_v60 = vrot.slane %v2991_v61, 2 }
 0x24a   : > { %2546 = vmatprep.mubr.bf16.mxu1 %v6781_v36 }
 0x24b   : > { %3443 = vmatmul.mubr.bf16.gmra.mrb[56].mxu0 %v6877_v53  ;;  %v2982_v17 = vrot.slane %v2980_v52, 1  ;;  %v2994_v23 = vor.u32 %v2993_v60, %v2990_v55  ;;  %v5771_v52 = vld [vmem:[#allocation2 + $0x80] ss:$0 sps:$4 sm:$0x33]   ;;  %v3053_v55 = vrot.slane %v3051_v50, 2 }
 0x24c   : > { %3450 = vmatprep.mubr.bf16.mxu0 %v6895_v3  ;;  %5267 = vmatpush3.bf16.msra.mxu0 %v5770_v47  ;;  %v3024_v47 = vrot.slane %v3022_v1, 1  ;;  %v3056_v61 = vshrl.u32 %v5771_v52, 16  ;;  %v3090_v1 = vshrl.u32 %v5774_v39, 16 }
 0x24d   : > { %5268 = vmatprep.subr.bf16.mxu0 %v5773_v26  ;;  %v2986_v46 = vor.u32 %v2985_v45, %v2982_v17  ;;  %v3050_v17 = vrot.slane %v3048_v35, 1 }
 0x24e   : > { %v3058_v60 = vrot.slane %v3056_v61, 1 }
 0x24f   : > { %v6913_v22 = vsel %vm2876_vm5, %v2986_v46, %v2994_v23  ;;  %v3054_v23 = vor.u32 %v3053_v55, %v3050_v17 }
 0x250   : > { %5269 = vmatpush3.bf16.msra.mxu0 %v5773_v26  ;;  %v3039_v26 = vshrl.u32 %v5769_v44, 16  ;;  %v3095_v44 = vrot.slane %v3093_v37, 2 }
 0x251   : > { %2547 = vmatmul.mubr.bf16.gmra.mrb[100].mxu1 %v6773_v10  ;;  %5270 = vmatprep.subr.bf16.mxu0 %v5776_v11  ;;  %v2997_v10 = vshrl.u32 %v7549_v8, 16  ;;  %v5772_v8 = vld [vmem:[#allocation2 + $0x8c] ss:$0 sps:$4 sm:$0x33]  }
 0x252   : > { %2554 = vmatprep.mubr.bf16.mxu1 %v6787_v41  ;;  %v3041_v16 = vrot.slane %v3039_v26, 1  ;;  %v3073_v27 = vshrl.u32 %v5772_v8, 16  ;;  %v3076_v5 = vshll.u32 %v5772_v8, 16 }
 0x253   : > { %3451 = vmatmul.mubr.bf16.gmra.mrb[60].mxu0 %v6886_v42  ;;  %v2999_v43 = vrot.slane %v2997_v10, 1  ;;  %v7553_v10 = vld [vmem:[#allocation27_spill] sm:$0xff] }
 0x254   : > { %3458 = vmatprep.mubr.bf16.mxu0 %v6904_v40  ;;  %5271 = vmatpush3.bf16.msra.mxu0 %v5776_v11  ;;  %v3044_v11 = vrot.slane %v3042_v51, 2  ;;  %v3065_v25 = vshrl.u32 %v7553_v10, 16  ;;  %v3068_v46 = vshll.u32 %v7553_v10, 16  ;;  %v3078_v32 = vrot.slane %v3076_v5, 2 }
 0x255   : > { %5272 = vmatprep.subr.bf16.mxu0 %v5779_v48  ;;  %v3003_v54 = vor.u32 %v3002_v14, %v2999_v43 }
 0x256   : > { %v3067_v43 = vrot.slane %v3065_v25, 1 }
 0x258   : > { %5273 = vmatpush3.bf16.msra.mxu0 %v5779_v48  ;;  %v3059_v48 = vshll.u32 %v5771_v52, 16  ;;  %v3110_v52 = vshll.u32 %v5775_v56, 16 }
 0x259   : > { %2555 = vmatmul.mubr.bf16.gmra.mrb[104].mxu1 %v6781_v36  ;;  %v3011_v36 = vor.u32 %v3010_v29, %v3007_v58  ;;  %v3070_v58 = vrot.slane %v3068_v46, 2  ;;  %v3075_v29 = vrot.slane %v3073_v27, 1 }
 0x25a   : > { %2562 = vmatprep.mubr.bf16.mxu1 %v6797_v62  ;;  %v3061_v49 = vrot.slane %v3059_v48, 2  ;;  %v3112_v61 = vrot.slane %v3110_v52, 2  ;;  %v5777_v48 = vld [vmem:[#allocation2 + $0xb0] ss:$0 sps:$4 sm:$0x33]  }
 0x25b   : > { %3459 = vmatmul.mubr.bf16.gmra.mrb[64].mxu0 %v6895_v3  ;;  %v6922_v0 = vsel %vm2876_vm5, %v3003_v54, %v3011_v36  ;;  %v3085_v54 = vshll.u32 %v7554_v34, 16  ;;  %v3071_v36 = vor.u32 %v3070_v58, %v3067_v43  ;;  %v3127_v27 = vshll.u32 %v5777_v48, 16  ;;  %v5778_v34 = vld [vmem:[#allocation2 + $0xbc] ss:$0 sps:$4 sm:$0x33]  }
 0x25c   : > { %3466 = vmatprep.mubr.bf16.mxu0 %v6913_v22 }
 0x25d   : > { %v3129_v39 = vrot.slane %v3127_v27, 2 }
 0x261   : > { %2563 = vmatmul.mubr.bf16.gmra.mrb[108].mxu1 %v6787_v41  ;;  %v3028_v41 = vor.u32 %v3027_v19, %v3024_v47  ;;  %v3087_v47 = vrot.slane %v3085_v54, 2  ;;  %v3092_v19 = vrot.slane %v3090_v1, 1 }
 0x262   : > { %2570 = vmatprep.mubr.bf16.mxu1 %v6803_v33 }
 0x263   : > { %3467 = vmatmul.mubr.bf16.gmra.mrb[68].mxu0 %v6904_v40  ;;  %v6931_v30 = vsel %vm2876_vm5, %v3020_v31, %v3028_v41  ;;  %v3088_v12 = vor.u32 %v3087_v47, %v3084_v24  ;;  %v3096_v20 = vor.u32 %v3095_v44, %v3092_v19  ;;  %v3141_v44 = vshrl.u32 %v5778_v34, 16 }
 0x264   : > { %3474 = vmatprep.mubr.bf16.mxu0 %v6922_v0 }
 0x265   : > { %v6971_v50 = vsel %vm2876_vm5, %v3088_v12, %v3096_v20  ;;  %v5780_v20 = vld [vmem:[#allocation2 + $0xc8] ss:$0 sps:$4 sm:$0x33]  }
 0x269   : > { %2571 = vmatmul.mubr.bf16.gmra.mrb[112].mxu1 %v6797_v62  ;;  %v3045_v62 = vor.u32 %v3044_v11, %v3041_v16  ;;  %v3107_v11 = vshrl.u32 %v5775_v56, 16  ;;  %v3144_v56 = vshll.u32 %v5778_v34, 16  ;;  %v5783_v34 = vld [vmem:[#allocation9 + $0x8] sm:$0xff]  }
 0x26a   : > { %2578 = vmatprep.mubr.bf16.mxu1 %v6811_v2 }
 0x26b   : > { %3475 = vmatmul.mubr.bf16.gmra.mrb[72].mxu0 %v6913_v22  ;;  %v6940_v45 = vsel %vm2876_vm5, %v3037_v6, %v3045_v62  ;;  %v3109_v62 = vrot.slane %v3107_v11, 1  ;;  %v3146_v12 = vrot.slane %v3144_v56, 2 }
 0x26c   : > { %3482 = vmatprep.mubr.bf16.mxu0 %v6931_v30 }
 0x271   : > { %2579 = vmatmul.mubr.bf16.gmra.mrb[116].mxu1 %v6803_v33  ;;  %v3062_v33 = vor.u32 %v3061_v49, %v3058_v60 }
 0x272   : > { %2586 = vmatprep.mubr.bf16.mxu1 %v6817_v13 }
 0x273   : > { %3483 = vmatmul.mubr.bf16.gmra.mrb[76].mxu0 %v6922_v0  ;;  %v6949_v14 = vsel %vm2876_vm5, %v3054_v23, %v3062_v33  ;;  %v3113_v23 = vor.u32 %v3112_v61, %v3109_v62  ;;  %v3124_v33 = vshrl.u32 %v5777_v48, 16 }
 0x274   : > { %3490 = vmatprep.mubr.bf16.mxu0 %v6940_v45 }
 0x279   : > { %2587 = vmatmul.mubr.bf16.gmra.mrb[120].mxu1 %v6811_v2  ;;  %v3079_v2 = vor.u32 %v3078_v32, %v3075_v29  ;;  %v3126_v32 = vrot.slane %v3124_v33, 1 }
 0x27a   : > { %2594 = vmatprep.mubr.bf16.mxu1 %v6828_v21 }
 0x27b   : > { %3491 = vmatmul.mubr.bf16.gmra.mrb[80].mxu0 %v6931_v30  ;;  %v6958_v63 = vsel %vm2876_vm5, %v3071_v36, %v3079_v2  ;;  %v3130_v19 = vor.u32 %v3129_v39, %v3126_v32 }
 0x27c   : > { %3498 = vmatprep.mubr.bf16.mxu0 %v6949_v14 }
 0x281   : > { %2595 = vmatmul.mubr.bf16.gmra.mrb[124].mxu1 %v6817_v13  ;;  %v7555_v13 = vld [vmem:[#allocation30_spill] sm:$0xff] }
 0x282   : > { %2602 = vmatprep.mubr.bf16.mxu1 %v6834_v57  ;;  %v3099_v26 = vshrl.u32 %v7555_v13, 16  ;;  %v3102_v51 = vshll.u32 %v7555_v13, 16 }
 0x283   : > { %3499 = vmatmul.mubr.bf16.gmra.mrb[84].mxu0 %v6940_v45  ;;  %v4694_v18 = vpop.f32.mrb[20].mxu1 }
 0x284   : > { %3506 = vmatprep.mubr.bf16.mxu0 %v6958_v63  ;;  %v4695_v59 = vpop.f32.mrb[21].mxu1  ;;  %v3101_v35 = vrot.slane %v3099_v26, 1  ;;  %v3104_v6 = vrot.slane %v3102_v51, 2  ;;  %v3143_v51 = vrot.slane %v3141_v44, 1 }
 0x285   : > { %v6961_v31 = vadd.f32 %v4695_v59, %v4694_v18  ;;  %v4697_v41 = vpop.f32.mrb[22].mxu1 }
 0x286   : > { %v4698_v16 = vpop.f32.mrb[23].mxu1  ;;  %v3105_v46 = vor.u32 %v3104_v6, %v3101_v35  ;;  %v7558_v35 = vld [vmem:[#allocation31_spill] sm:$0xff] }
 0x287   : > { %v6965_v4 = vadd.f32 %v4698_v16, %v4697_v41  ;;  %v5782_v41 = vld [vmem:[#allocation9] sm:$0xff]   ;;  %v3150_v6 = vshrl.u32 %v7558_v35, 16  ;;  %v3153_v62 = vshll.u32 %v7558_v35, 16 }
 0x288   : > { %v6984_v58 = vsel %vm2876_vm5, %v3105_v46, %v3113_v23  ;;  %5306 = vmatprep.subr.bf16.mxu1 %v5782_v41 }
 0x289   : > { %2603 = vmatmul.mubr.bf16.gmra.mrb[128].mxu1 %v6828_v21  ;;  %v7556_v21 = vld [vmem:[#allocation29_spill] sm:$0xff] }
 0x28a   : > { %2610 = vmatprep.mubr.bf16.mxu1 %v6842_v28  ;;  %v3116_v8 = vshrl.u32 %v7556_v21, 16  ;;  %v3119_v10 = vshll.u32 %v7556_v21, 16  ;;  %5307 = vmatpush3.bf16.msra.mxu1 %v5782_v41  ;;  %v5784_v41 = vld [vmem:[#allocation9 + $0x10] sm:$0xff]  }
 0x28b   : > { %3507 = vmatmul.mubr.bf16.gmra.mrb[88].mxu0 %v6949_v14  ;;  %5308 = vmatprep.subr.bf16.mxu1 %v5783_v34 }
 0x28c   : > { %3514 = vmatprep.mubr.bf16.mxu0 %v6971_v50  ;;  %v4700_v17 = vpop.f32.mrb[24].mxu1  ;;  %v3118_v43 = vrot.slane %v3116_v8, 1  ;;  %v3121_v29 = vrot.slane %v3119_v10, 2  ;;  %v3152_v8 = vrot.slane %v3150_v6, 1 }
 0x28d   : > { %v4701_v55 = vpop.f32.mrb[25].mxu1 }
 0x28e   : > { %v6974_v60 = vadd.f32 %v4701_v55, %v4700_v17  ;;  %v4703_v49 = vpop.f32.mrb[26].mxu1  ;;  %v3122_v47 = vor.u32 %v3121_v29, %v3118_v43  ;;  %v3147_v17 = vor.u32 %v3146_v12, %v3143_v51  ;;  %v3158_v55 = vshrl.u32 %v5780_v20, 16  ;;  %5309 = vmatpush3.bf16.msra.mxu1 %v5783_v34 }
 0x28f   : > { %v4704_v25 = vpop.f32.mrb[27].mxu1  ;;  %5310 = vmatprep.subr.bf16.mxu1 %v5784_v41 }
 0x290   : > { %v6978_v5 = vadd.f32 %v4704_v25, %v4703_v49  ;;  %v6997_v13 = vsel %vm2876_vm5, %v3122_v47, %v3130_v19  ;;  %v3161_v49 = vshll.u32 %v5780_v20, 16  ;;  %v3155_v25 = vrot.slane %v3153_v62, 2  ;;  %v5785_v62 = vld [vmem:[#allocation9 + $0x18] sm:$0xff]  }
 0x291   : > { %2611 = vmatmul.mubr.bf16.gmra.mrb[132].mxu1 %v6834_v57  ;;  %v7557_v57 = vld [vmem:[#allocation32_spill] sm:$0xff]  ;;  %v3160_v46 = vrot.slane %v3158_v55, 1 }
 0x292   : > { %2618 = vmatprep.mubr.bf16.mxu1 %v6847_v7  ;;  %v3133_v1 = vshrl.u32 %v7557_v57, 16  ;;  %v3136_v37 = vshll.u32 %v7557_v57, 16  ;;  %v3163_v23 = vrot.slane %v3161_v49, 2  ;;  %5311 = vmatpush3.bf16.msra.mxu1 %v5784_v41 }
 0x293   : > { %3515 = vmatmul.mubr.bf16.gmra.mrb[92].mxu0 %v6958_v63  ;;  %5312 = vmatprep.subr.bf16.mxu1 %v5785_v62 }
 0x294   : > { %3522 = vmatprep.mubr.bf16.mxu0 %v6984_v58  ;;  %v4706_v9 = vpop.f32.mrb[28].mxu1  ;;  %v3135_v59 = vrot.slane %v3133_v1, 1  ;;  %v3138_v26 = vrot.slane %v3136_v37, 2  ;;  %v3164_v39 = vor.u32 %v3163_v23, %v3160_v46  ;;  %v5786_v23 = vld [vmem:[#allocation9 + $0x20] sm:$0xff]  }
 0x295   : > { %v4707_v54 = vpop.f32.mrb[29].mxu1 }
 0x296   : > { %v6987_v36 = vadd.f32 %v4707_v54, %v4706_v9  ;;  %v4709_v2 = vpop.f32.mrb[30].mxu1  ;;  %v3139_v48 = vor.u32 %v3138_v26, %v3135_v59  ;;  %5313 = vmatpush3.bf16.msra.mxu1 %v5785_v62 }
 0x297   : > { %v4710_v24 = vpop.f32.mrb[31].mxu1  ;;  %5314 = vmatprep.subr.bf16.mxu1 %v5786_v23 }
 0x298   : > { %v6991_v18 = vadd.f32 %v4710_v24, %v4709_v2  ;;  %v7010_v10 = vsel %vm2876_vm5, %v3139_v48, %v3147_v17 }
 0x299   : > { %2619 = vmatmul.mubr.bf16.gmra.mrb[136].mxu1 %v6842_v28 }
 0x29a   : > { %2626 = vmatprep.mubr.bf16.mxu1 %v6856_v15  ;;  %5315 = vmatpush3.bf16.msra.mxu1 %v5786_v23 }
 0x29b   : > { %3523 = vmatmul.mubr.bf16.gmra.mrb[96].mxu0 %v6971_v50 }
 0x29c   : > { %3530 = vmatprep.mubr.bf16.mxu0 %v6997_v13  ;;  %v4712_v16 = vpop.f32.mrb[32].mxu1 }
 0x29d   : > { %v4713_v11 = vpop.f32.mrb[33].mxu1 }
 0x29e   : > { %v7000_v28 = vadd.f32 %v4713_v11, %v4712_v16  ;;  %v4715_v52 = vpop.f32.mrb[34].mxu1 }
 0x29f   : > { %v4716_v61 = vpop.f32.mrb[35].mxu1 }
 0x2a0   : > { %v7004_v21 = vadd.f32 %v4716_v61, %v4715_v52 }
 0x2a1   : > { %2627 = vmatmul.mubr.bf16.gmra.mrb[140].mxu1 %v6847_v7  ;;  %v3156_v7 = vor.u32 %v3155_v25, %v3152_v8 }
 0x2a2   : > { %2634 = vmatprep.mubr.bf16.mxu1 %v6861_v38 }
 0x2a3   : > { %3531 = vmatmul.mubr.bf16.gmra.mrb[100].mxu0 %v6984_v58  ;;  %v7020_v9 = vsel %vm2876_vm5, %v3156_v7, %v3164_v39  ;;  %v5781_v7 = vld [vmem:[#allocation2 + $0xd4] ss:$0 sps:$4 sm:$0x33]   ;;  %v7559_v39 = vld [vmem:[#allocation33_spill] sm:$0xff] }
 0x2a4   : > { %3538 = vmatprep.mubr.bf16.mxu0 %v7010_v10  ;;  %v4718_v33 = vpop.f32.mrb[36].mxu1  ;;  %v3167_v34 = vshrl.u32 %v7559_v39, 16 }
 0x2a5   : > { %v4719_v27 = vpop.f32.mrb[37].mxu1 }
 0x2a6   : > { %v7013_v43 = vadd.f32 %v4719_v27, %v4718_v33  ;;  %v4721_v29 = vpop.f32.mrb[38].mxu1 }
 0x2a7   : > { %v4722_v32 = vpop.f32.mrb[39].mxu1 }
 0x2a8   : > { %v7015_v38 = vadd.f32 %v4722_v32, %v4721_v29 }
 0x2a9   : > { %2635 = vmatmul.mubr.bf16.gmra.mrb[144].mxu1 %v6856_v15 }
 0x2ab   : > { %3539 = vmatmul.mubr.bf16.gmra.mrb[104].mxu0 %v6997_v13 }
 0x2ac   : > { %3546 = vmatprep.mubr.bf16.mxu0 %v7020_v9  ;;  %v4724_v54 = vpop.f32.mrb[40].mxu1 }
 0x2ad   : > { %v4725_v2 = vpop.f32.mrb[41].mxu1 }
 0x2ae   : > { %v7023_v57 = vadd.f32 %v4725_v2, %v4724_v54  ;;  %v4727_v1 = vpop.f32.mrb[42].mxu1  ;;  %v3175_v54 = vshrl.u32 %v5781_v7, 16  ;;  %v3178_v2 = vshll.u32 %v5781_v7, 16 }
 0x2af   : > { %v4728_v37 = vpop.f32.mrb[43].mxu1 }
 0x2b0   : > { %v7025_v24 = vadd.f32 %v4728_v37, %v4727_v1 }
 0x2b3   : > { %3547 = vmatmul.mubr.bf16.gmra.mrb[108].mxu0 %v7010_v10 }
 0x2b4   : > { %5274 = vmatprep.mubr.bf16.mxu0 %v6877_v53  ;;  %v4730_v15 = vpop.f32.mrb[44].mxu1 }
 0x2b5   : > { %v4731_v47 = vpop.f32.mrb[45].mxu1 }
 0x2b6   : > { %v7029_v19 = vadd.f32 %v4731_v47, %v4730_v15  ;;  %v4733_v44 = vpop.f32.mrb[46].mxu1 }
 0x2b7   : > { %v4734_v56 = vpop.f32.mrb[47].mxu1 }
 0x2b8   : > { %v7031_v59 = vadd.f32 %v4734_v56, %v4733_v44  ;;  %v3169_v44 = vrot.slane %v3167_v34, 1 }
 0x2bb   : > { %5275 = vmatmul.mubr.bf16.vlgmr.msra.gmra.mrb[16].mxu0 %v6886_v42 }
 0x2bc   : > { %5278 = vmatprep.mubr.bf16.mxu0 %v6895_v3  ;;  %v4736_v26 = vpop.f32.mrb[48].mxu1 }
 0x2bd   : > { %v4737_v51 = vpop.f32.mrb[49].mxu1 }
 0x2be   : > { %v7035_v12 = vadd.f32 %v4737_v51, %v4736_v26  ;;  %v4739_v53 = vpop.f32.mrb[50].mxu1  ;;  %v3177_v26 = vrot.slane %v3175_v54, 1  ;;  %v5787_v51 = vld [vmem:[#allocation9 + $0x28] sm:$0xff]  }
 0x2bf   : > { %v4740_v20 = vpop.f32.mrb[51].mxu1  ;;  %5316 = vmatprep.subr.bf16.mxu1 %v5787_v51 }
 0x2c0   : > { %v7037_v16 = vadd.f32 %v4740_v20, %v4739_v53  ;;  %5317 = vmatpush3.bf16.msra.mxu1 %v5787_v51 }
 0x2c3   : > { %5279 = vmatmul.mubr.bf16.gmra.mrb[20].mxu0 %v6904_v40 }
 0x2c4   : > { %5282 = vmatprep.mubr.bf16.mxu0 %v6913_v22  ;;  %v4742_v11 = vpop.f32.mrb[52].mxu1 }
 0x2c5   : > { %v4743_v52 = vpop.f32.mrb[53].mxu1 }
 0x2c6   : > { %v7041_v35 = vadd.f32 %v4743_v52, %v4742_v11  ;;  %v4745_v42 = vpop.f32.mrb[54].mxu1 }
 0x2c7   : > { %v4746_v3 = vpop.f32.mrb[55].mxu1 }
 0x2c8   : > { %v7043_v6 = vadd.f32 %v4746_v3, %v4745_v42 }
 0x2cb   : > { %5283 = vmatmul.mubr.bf16.gmra.mrb[24].mxu0 %v6922_v0 }
 0x2cc   : > { %5286 = vmatprep.mubr.bf16.mxu0 %v6931_v30  ;;  %v4748_v61 = vpop.f32.mrb[56].mxu1 }
 0x2cd   : > { %v4749_v48 = vpop.f32.mrb[57].mxu1 }
 0x2ce   : > { %v7047_v40 = vadd.f32 %v4749_v48, %v4748_v61  ;;  %v4751_v22 = vpop.f32.mrb[58].mxu1 }
 0x2cf   : > { %v4752_v17 = vpop.f32.mrb[59].mxu1 }
 0x2d0   : > { %v7049_v55 = vadd.f32 %v4752_v17, %v4751_v22 }
 0x2d3   : > { %5287 = vmatmul.mubr.bf16.gmra.mrb[28].mxu0 %v6940_v45 }
 0x2d4   : > { %5290 = vmatprep.mubr.bf16.mxu0 %v6949_v14  ;;  %v4754_v49 = vpop.f32.mrb[60].mxu1 }
 0x2d5   : > { %v4755_v8 = vpop.f32.mrb[61].mxu1 }
 0x2d6   : > { %v7053_v25 = vadd.f32 %v4755_v8, %v4754_v49  ;;  %v4757_v0 = vpop.f32.mrb[62].mxu1  ;;  %v5788_v8 = vld [vmem:[#allocation9 + $0x30] sm:$0xff]  }
 0x2d7   : > { %v4758_v30 = vpop.f32.mrb[63].mxu1  ;;  %5318 = vmatprep.subr.bf16.mxu1 %v5788_v8 }
 0x2d8   : > { %v7055_v46 = vadd.f32 %v4758_v30, %v4757_v0  ;;  %5319 = vmatpush3.bf16.msra.mxu1 %v5788_v8 }
 0x2db   : > { %5291 = vmatmul.mubr.bf16.gmra.mrb[32].mxu0 %v6958_v63 }
 0x2dc   : > { %5294 = vmatprep.mubr.bf16.mxu0 %v6971_v50  ;;  %v4760_v33 = vpop.f32.mrb[64].mxu1  ;;  %v3170_v50 = vshll.u32 %v7559_v39, 16 }
 0x2dd   : > { %v4761_v27 = vpop.f32.mrb[65].mxu1 }
 0x2de   : > { %v7059_v45 = vadd.f32 %v4761_v27, %v4760_v33  ;;  %v4763_v14 = vpop.f32.mrb[66].mxu1  ;;  %v3172_v41 = vrot.slane %v3170_v50, 2 }
 0x2df   : > { %v4764_v29 = vpop.f32.mrb[67].mxu1 }
 0x2e0   : > { %v7061_v32 = vadd.f32 %v4764_v29, %v4763_v14  ;;  %v3173_v53 = vor.u32 %v3172_v41, %v3169_v44 }
 0x2e3   : > { %5295 = vmatmul.mubr.bf16.gmra.mrb[36].mxu0 %v6984_v58  ;;  %v3180_v58 = vrot.slane %v3178_v2, 2 }
 0x2e4   : > { %5298 = vmatprep.mubr.bf16.mxu0 %v6997_v13  ;;  %v4766_v63 = vpop.f32.mrb[68].mxu1 }
 0x2e5   : > { %v4767_v1 = vpop.f32.mrb[69].mxu1  ;;  %v3181_v20 = vor.u32 %v3180_v58, %v3177_v26 }
 0x2e6   : > { %v7067_v37 = vadd.f32 %v4767_v1, %v4766_v63  ;;  %v4769_v15 = vpop.f32.mrb[70].mxu1  ;;  %v5789_v1 = vld [vmem:[#allocation9 + $0x38] sm:$0xff]  }
 0x2e7   : > { %v4770_v47 = vpop.f32.mrb[71].mxu1  ;;  %v3182_v61 = vsel %vm2876_vm5, %v3173_v53, %v3181_v20  ;;  %5320 = vmatprep.subr.bf16.mxu1 %v5789_v1 }
 0x2e8   : > { %v7069_v56 = vadd.f32 %v4770_v47, %v4769_v15  ;;  %5321 = vmatpush3.bf16.msra.mxu1 %v5789_v1 }
 0x2eb   : > { %5299 = vmatmul.mubr.bf16.gmra.mrb[40].mxu0 %v7010_v10 }
 0x2ec   : > { %5302 = vmatprep.mubr.bf16.mxu0 %v7020_v9  ;;  %v4772_v13 = vpop.f32.mrb[72].mxu1 }
 0x2ed   : > { %v4773_v11 = vpop.f32.mrb[73].mxu1 }
 0x2ee   : > { %v7073_v52 = vadd.f32 %v4773_v11, %v4772_v13  ;;  %v4775_v42 = vpop.f32.mrb[74].mxu1 }
 0x2ef   : > { %v4776_v3 = vpop.f32.mrb[75].mxu1 }
 0x2f0   : > { %v7075_v62 = vadd.f32 %v4776_v3, %v4775_v42 }
 0x2f3   : > { %5303 = vmatmul.mubr.bf16.gmra.mrb[44].mxu0 %v3182_v61 }
 0x2f4   : > { %v4778_v48 = vpop.f32.mrb[76].mxu1 }
 0x2f5   : > { %v4779_v22 = vpop.f32.mrb[77].mxu1 }
 0x2f6   : > { %v7078_v10 = vadd.f32 %v4779_v22, %v4778_v48  ;;  %v4781_v9 = vpop.f32.mrb[78].mxu1 }
 0x2f7   : > { %v4782_v17 = vpop.f32.mrb[79].mxu1 }
 0x2f8   : > { %v7080_v49 = vadd.f32 %v4782_v17, %v4781_v9 }
 0x2fc   : > { %v4784_v0 = vpop.f32.mrb[80].mxu1 }
 0x2fd   : > { %v4785_v30 = vpop.f32.mrb[81].mxu1 }
 0x2fe   : > { %v7082_v23 = vadd.f32 %v4785_v30, %v4784_v0  ;;  %v4787_v33 = vpop.f32.mrb[82].mxu1 }
 0x2ff   : > { %v4788_v27 = vpop.f32.mrb[83].mxu1 }
 0x300   : > { %v7084_v14 = vadd.f32 %v4788_v27, %v4787_v33 }
 0x304   : > { %v4830_v29 = vpop.f32.mrb[84].mxu1 }
 0x305   : > { %v4831_v7 = vpop.f32.mrb[85].mxu1 }
 0x306   : > { %v4832_v39 = vadd.f32 %v4831_v7, %v4830_v29  ;;  %v4833_v34 = vpop.f32.mrb[86].mxu1 }
 0x307   : > { %v4834_v63 = vpop.f32.mrb[87].mxu1 }
 0x308   : > { %v5373_v50 = vadd.f32 %v4832_v39, %v6961_v31  ;;  %v4835_v54 = vadd.f32 %v4834_v63, %v4833_v34 }
 0x30a   : > { %v5379_v2 = vadd.f32 %v4835_v54, %v6965_v4 }
 0x30c   : > { %v4836_v15 = vpop.f32.mrb[88].mxu1 }
 0x30d   : > { %v4837_v47 = vpop.f32.mrb[89].mxu1 }
 0x30e   : > { %v4966_v44 = vpop.f32.mrb[48].mxu0  ;;  %v4838_v41 = vadd.f32 %v4837_v47, %v4836_v15  ;;  %v4839_v26 = vpop.f32.mrb[90].mxu1 }
 0x30f   : > { %v4967_v58 = vpop.f32.mrb[49].mxu0  ;;  %v4840_v51 = vpop.f32.mrb[91].mxu1 }
 0x310   : > { %v5370_v13 = vadd.f32 %v4838_v41, %v6974_v60  ;;  %v4968_v53 = vadd.f32 %v4967_v58, %v4966_v44  ;;  %v4969_v20 = vpop.f32.mrb[50].mxu0  ;;  %v4841_v11 = vadd.f32 %v4840_v51, %v4839_v26 }
 0x311   : > { %v4970_v42 = vpop.f32.mrb[51].mxu0 }
 0x312   : > { %v5376_v31 = vadd.f32 %v4841_v11, %v6978_v5  ;;  %v4971_v3 = vadd.f32 %v4970_v42, %v4969_v20  ;;  %v7090_v4 = vadd.f32 %v5373_v50, %v4968_v53 }
 0x314   : > { %v4842_v61 = vpop.f32.mrb[92].mxu1  ;;  %v7092_v48 = vadd.f32 %v5379_v2, %v4971_v3 }
 0x315   : > { %v4843_v22 = vpop.f32.mrb[93].mxu1 }
 0x316   : > { %v4972_v9 = vpop.f32.mrb[52].mxu0  ;;  %v4844_v17 = vadd.f32 %v4843_v22, %v4842_v61  ;;  %v4845_v8 = vpop.f32.mrb[94].mxu1 }
 0x317   : > { %v4973_v0 = vpop.f32.mrb[53].mxu0  ;;  %v4846_v30 = vpop.f32.mrb[95].mxu1 }
 0x318   : > { %v5385_v60 = vadd.f32 %v4844_v17, %v6987_v36  ;;  %v4974_v33 = vadd.f32 %v4973_v0, %v4972_v9  ;;  %v4975_v27 = vpop.f32.mrb[54].mxu0  ;;  %v4847_v29 = vadd.f32 %v4846_v30, %v4845_v8 }
 0x319   : > { %v4976_v7 = vpop.f32.mrb[55].mxu0 }
 0x31a   : > { %v5391_v5 = vadd.f32 %v4847_v29, %v6991_v18  ;;  %v4977_v39 = vadd.f32 %v4976_v7, %v4975_v27  ;;  %v7096_v34 = vadd.f32 %v5370_v13, %v4974_v33 }
 0x31c   : > { %v4848_v63 = vpop.f32.mrb[96].mxu1  ;;  %v7098_v50 = vadd.f32 %v5376_v31, %v4977_v39 }
 0x31d   : > { %v4849_v54 = vpop.f32.mrb[97].mxu1 }
 0x31e   : > { %v4978_v2 = vpop.f32.mrb[56].mxu0  ;;  %v4850_v1 = vadd.f32 %v4849_v54, %v4848_v63  ;;  %v4851_v15 = vpop.f32.mrb[98].mxu1 }
 0x31f   : > { %v4979_v47 = vpop.f32.mrb[57].mxu0  ;;  %v4852_v44 = vpop.f32.mrb[99].mxu1 }
 0x320   : > { %v5382_v36 = vadd.f32 %v4850_v1, %v7000_v28  ;;  %v4980_v41 = vadd.f32 %v4979_v47, %v4978_v2  ;;  %v4981_v26 = vpop.f32.mrb[58].mxu0  ;;  %v4853_v58 = vadd.f32 %v4852_v44, %v4851_v15 }
 0x321   : > { %v4982_v51 = vpop.f32.mrb[59].mxu0 }
 0x322   : > { %v5388_v18 = vadd.f32 %v4853_v58, %v7004_v21  ;;  %v4983_v53 = vadd.f32 %v4982_v51, %v4981_v26  ;;  %v7102_v13 = vadd.f32 %v5385_v60, %v4980_v41 }
 0x324   : > { %v4854_v20 = vpop.f32.mrb[100].mxu1  ;;  %v7104_v11 = vadd.f32 %v5391_v5, %v4983_v53 }
 0x325   : > { %v4855_v42 = vpop.f32.mrb[101].mxu1 }
 0x326   : > { %v4984_v31 = vpop.f32.mrb[60].mxu0  ;;  %v4856_v3 = vadd.f32 %v4855_v42, %v4854_v20  ;;  %v4857_v61 = vpop.f32.mrb[102].mxu1 }
 0x327   : > { %v4985_v22 = vpop.f32.mrb[61].mxu0  ;;  %v4858_v9 = vpop.f32.mrb[103].mxu1 }
 0x328   : > { %v5397_v28 = vadd.f32 %v4856_v3, %v7013_v43  ;;  %v4986_v17 = vadd.f32 %v4985_v22, %v4984_v31  ;;  %v4987_v8 = vpop.f32.mrb[62].mxu0  ;;  %v4859_v0 = vadd.f32 %v4858_v9, %v4857_v61 }
 0x329   : > { %v4988_v30 = vpop.f32.mrb[63].mxu0 }
 0x32a   : > { %v5403_v21 = vadd.f32 %v4859_v0, %v7015_v38  ;;  %v4989_v33 = vadd.f32 %v4988_v30, %v4987_v8  ;;  %v7108_v60 = vadd.f32 %v5382_v36, %v4986_v17 }
 0x32c   : > { %v4860_v27 = vpop.f32.mrb[104].mxu1  ;;  %v7110_v29 = vadd.f32 %v5388_v18, %v4989_v33 }
 0x32d   : > { %v4861_v7 = vpop.f32.mrb[105].mxu1 }
 0x32e   : > { %v4990_v5 = vpop.f32.mrb[64].mxu0  ;;  %v4862_v39 = vadd.f32 %v4861_v7, %v4860_v27  ;;  %v4863_v63 = vpop.f32.mrb[106].mxu1 }
 0x32f   : > { %v4991_v54 = vpop.f32.mrb[65].mxu0  ;;  %v4864_v2 = vpop.f32.mrb[107].mxu1 }
 0x330   : > { %v5394_v43 = vadd.f32 %v4862_v39, %v7023_v57  ;;  %v4992_v1 = vadd.f32 %v4991_v54, %v4990_v5  ;;  %v4993_v15 = vpop.f32.mrb[66].mxu0  ;;  %v4865_v47 = vadd.f32 %v4864_v2, %v4863_v63 }
 0x331   : > { %v4994_v44 = vpop.f32.mrb[67].mxu0 }
 0x332   : > { %v5400_v38 = vadd.f32 %v4865_v47, %v7025_v24  ;;  %v4995_v41 = vadd.f32 %v4994_v44, %v4993_v15  ;;  %v7114_v36 = vadd.f32 %v5397_v28, %v4992_v1 }
 0x334   : > { %v4866_v26 = vpop.f32.mrb[108].mxu1  ;;  %v7116_v58 = vadd.f32 %v5403_v21, %v4995_v41 }
 0x335   : > { %v4867_v51 = vpop.f32.mrb[109].mxu1 }
 0x336   : > { %v4996_v18 = vpop.f32.mrb[68].mxu0  ;;  %v4868_v53 = vadd.f32 %v4867_v51, %v4866_v26  ;;  %v4869_v20 = vpop.f32.mrb[110].mxu1 }
 0x337   : > { %v4997_v42 = vpop.f32.mrb[69].mxu0  ;;  %v4870_v31 = vpop.f32.mrb[111].mxu1 }
 0x338   : > { %v5409_v57 = vadd.f32 %v4868_v53, %v7029_v19  ;;  %v4998_v3 = vadd.f32 %v4997_v42, %v4996_v18  ;;  %v4999_v61 = vpop.f32.mrb[70].mxu0  ;;  %v4871_v22 = vadd.f32 %v4870_v31, %v4869_v20 }
 0x339   : > { %v5000_v9 = vpop.f32.mrb[71].mxu0 }
 0x33a   : > { %v5415_v24 = vadd.f32 %v4871_v22, %v7031_v59  ;;  %v5001_v17 = vadd.f32 %v5000_v9, %v4999_v61  ;;  %v7120_v28 = vadd.f32 %v5394_v43, %v4998_v3 }
 0x33c   : > { %v4872_v8 = vpop.f32.mrb[112].mxu1  ;;  %v7122_v0 = vadd.f32 %v5400_v38, %v5001_v17 }
 0x33d   : > { %v4873_v30 = vpop.f32.mrb[113].mxu1 }
 0x33e   : > { %v5002_v21 = vpop.f32.mrb[72].mxu0  ;;  %v4874_v33 = vadd.f32 %v4873_v30, %v4872_v8  ;;  %v4875_v27 = vpop.f32.mrb[114].mxu1 }
 0x33f   : > { %v5003_v7 = vpop.f32.mrb[73].mxu0  ;;  %v4876_v5 = vpop.f32.mrb[115].mxu1 }
 0x340   : > { %v5406_v19 = vadd.f32 %v4874_v33, %v7035_v12  ;;  %v5004_v39 = vadd.f32 %v5003_v7, %v5002_v21  ;;  %v5005_v63 = vpop.f32.mrb[74].mxu0  ;;  %v4877_v54 = vadd.f32 %v4876_v5, %v4875_v27 }
 0x341   : > { %v5006_v2 = vpop.f32.mrb[75].mxu0 }
 0x342   : > { %v5412_v59 = vadd.f32 %v4877_v54, %v7037_v16  ;;  %v5007_v1 = vadd.f32 %v5006_v2, %v5005_v63  ;;  %v7126_v43 = vadd.f32 %v5409_v57, %v5004_v39 }
 0x344   : > { %v4878_v15 = vpop.f32.mrb[116].mxu1  ;;  %v7128_v47 = vadd.f32 %v5415_v24, %v5007_v1 }
 0x345   : > { %v4879_v44 = vpop.f32.mrb[117].mxu1 }
 0x346   : > { %v5008_v38 = vpop.f32.mrb[76].mxu0  ;;  %v4880_v41 = vadd.f32 %v4879_v44, %v4878_v15  ;;  %v4881_v26 = vpop.f32.mrb[118].mxu1 }
 0x347   : > { %v5009_v51 = vpop.f32.mrb[77].mxu0  ;;  %v4882_v18 = vpop.f32.mrb[119].mxu1 }
 0x348   : > { %v5421_v12 = vadd.f32 %v4880_v41, %v7041_v35  ;;  %v5010_v53 = vadd.f32 %v5009_v51, %v5008_v38  ;;  %v5011_v20 = vpop.f32.mrb[78].mxu0  ;;  %v4883_v42 = vadd.f32 %v4882_v18, %v4881_v26 }
 0x349   : > { %v5012_v31 = vpop.f32.mrb[79].mxu0 }
 0x34a   : > { %v5427_v16 = vadd.f32 %v4883_v42, %v7043_v6  ;;  %v5013_v3 = vadd.f32 %v5012_v31, %v5011_v20  ;;  %v7132_v57 = vadd.f32 %v5406_v19, %v5010_v53 }
 0x34c   : > { %v4884_v61 = vpop.f32.mrb[120].mxu1  ;;  %v7134_v22 = vadd.f32 %v5412_v59, %v5013_v3 }
 0x34d   : > { %v4885_v9 = vpop.f32.mrb[121].mxu1 }
 0x34e   : > { %v5014_v24 = vpop.f32.mrb[80].mxu0  ;;  %v4886_v17 = vadd.f32 %v4885_v9, %v4884_v61  ;;  %v4887_v8 = vpop.f32.mrb[122].mxu1 }
 0x34f   : > { %v5015_v30 = vpop.f32.mrb[81].mxu0  ;;  %v4888_v21 = vpop.f32.mrb[123].mxu1 }
 0x350   : > { %v5418_v35 = vadd.f32 %v4886_v17, %v7047_v40  ;;  %v5016_v33 = vadd.f32 %v5015_v30, %v5014_v24  ;;  %v5017_v27 = vpop.f32.mrb[82].mxu0  ;;  %v4889_v7 = vadd.f32 %v4888_v21, %v4887_v8 }
 0x351   : > { %v5018_v5 = vpop.f32.mrb[83].mxu0 }
 0x352   : > { %v5424_v6 = vadd.f32 %v4889_v7, %v7049_v55  ;;  %v5019_v39 = vadd.f32 %v5018_v5, %v5017_v27  ;;  %v7138_v19 = vadd.f32 %v5421_v12, %v5016_v33 }
 0x354   : > { %v4890_v63 = vpop.f32.mrb[124].mxu1  ;;  %v7140_v54 = vadd.f32 %v5427_v16, %v5019_v39 }
 0x355   : > { %v4891_v2 = vpop.f32.mrb[125].mxu1 }
 0x356   : > { %v5020_v59 = vpop.f32.mrb[84].mxu0  ;;  %v4892_v1 = vadd.f32 %v4891_v2, %v4890_v63  ;;  %v4893_v15 = vpop.f32.mrb[126].mxu1 }
 0x357   : > { %v5021_v44 = vpop.f32.mrb[85].mxu0  ;;  %v4894_v38 = vpop.f32.mrb[127].mxu1 }
 0x358   : > { %v5433_v40 = vadd.f32 %v4892_v1, %v7053_v25  ;;  %v5022_v41 = vadd.f32 %v5021_v44, %v5020_v59  ;;  %v5023_v26 = vpop.f32.mrb[86].mxu0  ;;  %v4895_v51 = vadd.f32 %v4894_v38, %v4893_v15 }
 0x359   : > { %v5024_v18 = vpop.f32.mrb[87].mxu0 }
 0x35a   : > { %v5439_v55 = vadd.f32 %v4895_v51, %v7055_v46  ;;  %v5025_v53 = vadd.f32 %v5024_v18, %v5023_v26  ;;  %v7144_v12 = vadd.f32 %v5418_v35, %v5022_v41 }
 0x35c   : > { %v4896_v20 = vpop.f32.mrb[128].mxu1  ;;  %v7146_v42 = vadd.f32 %v5424_v6, %v5025_v53 }
 0x35d   : > { %v4897_v31 = vpop.f32.mrb[129].mxu1 }
 0x35e   : > { %v5026_v16 = vpop.f32.mrb[88].mxu0  ;;  %v4898_v3 = vadd.f32 %v4897_v31, %v4896_v20  ;;  %v4899_v61 = vpop.f32.mrb[130].mxu1 }
 0x35f   : > { %v5027_v9 = vpop.f32.mrb[89].mxu0  ;;  %v4900_v24 = vpop.f32.mrb[131].mxu1 }
 0x360   : > { %v5430_v25 = vadd.f32 %v4898_v3, %v7059_v45  ;;  %v5028_v17 = vadd.f32 %v5027_v9, %v5026_v16  ;;  %v5029_v8 = vpop.f32.mrb[90].mxu0  ;;  %v4901_v30 = vadd.f32 %v4900_v24, %v4899_v61 }
 0x361   : > { %v5030_v21 = vpop.f32.mrb[91].mxu0 }
 0x362   : > { %v5436_v46 = vadd.f32 %v4901_v30, %v7061_v32  ;;  %v5031_v33 = vadd.f32 %v5030_v21, %v5029_v8  ;;  %v7150_v35 = vadd.f32 %v5433_v40, %v5028_v17 }
 0x364   : > { %v4902_v27 = vpop.f32.mrb[132].mxu1  ;;  %v7152_v7 = vadd.f32 %v5439_v55, %v5031_v33 }
 0x365   : > { %v4903_v5 = vpop.f32.mrb[133].mxu1 }
 0x366   : > { %v5032_v6 = vpop.f32.mrb[92].mxu0  ;;  %v4904_v39 = vadd.f32 %v4903_v5, %v4902_v27  ;;  %v4905_v63 = vpop.f32.mrb[134].mxu1 }
 0x367   : > { %v5033_v2 = vpop.f32.mrb[93].mxu0  ;;  %v4906_v59 = vpop.f32.mrb[135].mxu1 }
 0x368   : > { %v5445_v45 = vadd.f32 %v4904_v39, %v7067_v37  ;;  %v5034_v1 = vadd.f32 %v5033_v2, %v5032_v6  ;;  %v5035_v15 = vpop.f32.mrb[94].mxu0  ;;  %v4907_v44 = vadd.f32 %v4906_v59, %v4905_v63 }
 0x369   : > { %v5036_v38 = vpop.f32.mrb[95].mxu0 }
 0x36a   : > { %v5451_v32 = vadd.f32 %v4907_v44, %v7069_v56  ;;  %v5037_v41 = vadd.f32 %v5036_v38, %v5035_v15  ;;  %v7156_v40 = vadd.f32 %v5430_v25, %v5034_v1 }
 0x36c   : > { %v4908_v26 = vpop.f32.mrb[136].mxu1  ;;  %v7158_v51 = vadd.f32 %v5436_v46, %v5037_v41 }
 0x36d   : > { %v4909_v18 = vpop.f32.mrb[137].mxu1 }
 0x36e   : > { %v5038_v55 = vpop.f32.mrb[96].mxu0  ;;  %v4910_v53 = vadd.f32 %v4909_v18, %v4908_v26  ;;  %v4911_v20 = vpop.f32.mrb[138].mxu1 }
 0x36f   : > { %v5039_v31 = vpop.f32.mrb[97].mxu0  ;;  %v4912_v16 = vpop.f32.mrb[139].mxu1 }
 0x370   : > { %v5442_v37 = vadd.f32 %v4910_v53, %v7073_v52  ;;  %v5040_v3 = vadd.f32 %v5039_v31, %v5038_v55  ;;  %v5041_v61 = vpop.f32.mrb[98].mxu0  ;;  %v4913_v9 = vadd.f32 %v4912_v16, %v4911_v20 }
 0x371   : > { %v5042_v24 = vpop.f32.mrb[99].mxu0 }
 0x372   : > { %v5448_v56 = vadd.f32 %v4913_v9, %v7075_v62  ;;  %v5043_v17 = vadd.f32 %v5042_v24, %v5041_v61  ;;  %v7162_v25 = vadd.f32 %v5445_v45, %v5040_v3 }
 0x374   : > { %v4914_v8 = vpop.f32.mrb[140].mxu1  ;;  %v7164_v30 = vadd.f32 %v5451_v32, %v5043_v17 }
 0x375   : > { %v4915_v21 = vpop.f32.mrb[141].mxu1 }
 0x376   : > { %v5044_v46 = vpop.f32.mrb[100].mxu0  ;;  %v4916_v33 = vadd.f32 %v4915_v21, %v4914_v8  ;;  %v4917_v27 = vpop.f32.mrb[142].mxu1 }
 0x377   : > { %v5045_v5 = vpop.f32.mrb[101].mxu0  ;;  %v4918_v6 = vpop.f32.mrb[143].mxu1 }
 0x378   : > { %v5457_v52 = vadd.f32 %v4916_v33, %v7078_v10  ;;  %v5046_v39 = vadd.f32 %v5045_v5, %v5044_v46  ;;  %v5047_v63 = vpop.f32.mrb[102].mxu0  ;;  %v4919_v2 = vadd.f32 %v4918_v6, %v4917_v27  ;;  %v7191_v6 = vld [vmem:[%s7462_s6] ss:$0 sm:$0xff] }
 0x379   : > { %v5048_v59 = vpop.f32.mrb[103].mxu0 }
 0x37a   : > { %v5463_v62 = vadd.f32 %v4919_v2, %v7080_v49  ;;  %v5049_v1 = vadd.f32 %v5048_v59, %v5047_v63  ;;  %v7168_v45 = vadd.f32 %v5442_v37, %v5046_v39 }
 0x37c   : > { %v4920_v15 = vpop.f32.mrb[144].mxu1  ;;  %v7170_v44 = vadd.f32 %v5448_v56, %v5049_v1 }
 0x37d   : > { %v4921_v38 = vpop.f32.mrb[145].mxu1 }
 0x37e   : > { %v5050_v32 = vpop.f32.mrb[104].mxu0  ;;  %v4922_v41 = vadd.f32 %v4921_v38, %v4920_v15  ;;  %v4923_v26 = vpop.f32.mrb[146].mxu1 }
 0x37f   : > { %v5051_v18 = vpop.f32.mrb[105].mxu0  ;;  %v4924_v55 = vpop.f32.mrb[147].mxu1 }
 0x380   : > { %v5454_v10 = vadd.f32 %v4922_v41, %v7082_v23  ;;  %v5052_v53 = vadd.f32 %v5051_v18, %v5050_v32  ;;  %v5053_v20 = vpop.f32.mrb[106].mxu0  ;;  %v4925_v31 = vadd.f32 %v4924_v55, %v4923_v26 }
 0x381   : > { %v5054_v16 = vpop.f32.mrb[107].mxu0 }
 0x382   : > { %v5460_v49 = vadd.f32 %v4925_v31, %v7084_v14  ;;  %v5055_v3 = vadd.f32 %v5054_v16, %v5053_v20  ;;  %v7174_v37 = vadd.f32 %v5457_v52, %v5052_v53  ;;  %v7185_v14 = vld [vmem:[%s7461_s5] ss:$0 sm:$0xff] }
 0x384   : > { %v7176_v61 = vadd.f32 %v5463_v62, %v5055_v3 }
 0x386   : > { %v5056_v9 = vpop.f32.mrb[108].mxu0 }
 0x387   : > { %v5057_v24 = vpop.f32.mrb[109].mxu0 }
 0x388   : > { %v5058_v56 = vadd.f32 %v5057_v24, %v5056_v9  ;;  %v5059_v17 = vpop.f32.mrb[110].mxu0 }
 0x389   : > { %v5060_v8 = vpop.f32.mrb[111].mxu0 }
 0x38a   : > { %v5061_v21 = vadd.f32 %v5060_v8, %v5059_v17  ;;  %v7178_v46 = vadd.f32 %v5454_v10, %v5058_v56 }
 0x38c   : > { %v7180_v23 = vadd.f32 %v5460_v49, %v5061_v21 }
 0x38e   : > { %v5276_v33 = vpop.f32.mrb[16].mxu0 }
 0x38f   : > { %v5372_v27 = vadd.f32 %v7096_v34, %v5276_v33  ;;  %v3589_v5 = vpop.f32.mrb[17].mxu0 }
 0x390   : > { %v5375_v52 = vadd.f32 %v7090_v4, %v3589_v5  ;;  %v5277_v39 = vpop.f32.mrb[18].mxu0 }
 0x391   : > { %v3757_v63 = vmul.f32 %v5372_v27, %v7185_v14  ;;  %v5378_v2 = vadd.f32 %v7098_v50, %v5277_v39  ;;  %v3592_v59 = vpop.f32.mrb[19].mxu0 }
 0x392   : > { %v3755_v62 = vmul.f32 %v5375_v52, %v7185_v14  ;;  %v5381_v1 = vadd.f32 %v7092_v48, %v3592_v59 }
 0x393   : > { %v3796_v34 = vadd.f32 %v7191_v6, %v3757_v63  ;;  %v3758_v15 = vmul.f32 %v5378_v2, %v7185_v14 }
 0x394   : > { %v3794_v38 = vadd.f32 %v7191_v6, %v3755_v62  ;;  %v3756_v32 = vmul.f32 %v5381_v1, %v7185_v14 }
 0x395   : > { %v3797_v4 = vadd.f32 %v7191_v6, %v3758_v15  ;;  %v3828_v18 = vmax.f32 %v3796_v34, 0.0 }
 0x396   : > { %v3795_v41 = vadd.f32 %v7191_v6, %v3756_v32  ;;  %v5280_v26 = vpop.f32.mrb[20].mxu0  ;;  %v3826_v53 = vmax.f32 %v3794_v38, 0.0 }
 0x397   : > { %v3829_v50 = vmax.f32 %v3797_v4, 0.0  ;;  %v5384_v55 = vadd.f32 %v7108_v60, %v5280_v26  ;;  %v3605_v10 = vpop.f32.mrb[21].mxu0 }
 0x398   : > { %v3827_v48 = vmax.f32 %v3795_v41, 0.0  ;;  %v5387_v20 = vadd.f32 %v7102_v13, %v3605_v10  ;;  %v5281_v31 = vpop.f32.mrb[22].mxu0 }
 0x399   : > { %v3859_v16 = vpack.c.bf16 %v3829_v50, %v3828_v18  ;;  %v3761_v49 = vmul.f32 %v5384_v55, %v7185_v14  ;;  %v5390_v3 = vadd.f32 %v7110_v29, %v5281_v31  ;;  %v3608_v9 = vpop.f32.mrb[23].mxu0 }
 0x39a   : > { %v3759_v24 = vmul.f32 %v5387_v20, %v7185_v14  ;;  %v5393_v56 = vadd.f32 %v7104_v11, %v3608_v9  ;;  %v3858_v17 = vpack.c.bf16 %v3827_v48, %v3826_v53 }
 0x39b   : > { %v3800_v8 = vadd.f32 %v7191_v6, %v3761_v49  ;;  %v3762_v60 = vmul.f32 %v5390_v3, %v7185_v14 }
 0x39c   : > { %v3798_v21 = vadd.f32 %v7191_v6, %v3759_v24  ;;  %v3760_v13 = vmul.f32 %v5393_v56, %v7185_v14  ;;  %5322 = vmatprep.mubr.bf16.mxu1 %v3858_v17 }
 0x39d   : > { %v3801_v33 = vadd.f32 %v7191_v6, %v3762_v60  ;;  %5323 = vmatmul.mubr.bf16.vlgmr.msra.gmra.mrb[148].mxu1 %v3859_v16  ;;  %v3832_v5 = vmax.f32 %v3800_v8, 0.0 }
 0x39e   : > { %v3799_v29 = vadd.f32 %v7191_v6, %v3760_v13  ;;  %v5284_v27 = vpop.f32.mrb[24].mxu0  ;;  %v3830_v63 = vmax.f32 %v3798_v21, 0.0 }
 0x39f   : > { %v3833_v52 = vmax.f32 %v3801_v33, 0.0  ;;  %v5396_v11 = vadd.f32 %v7120_v28, %v5284_v27  ;;  %v3621_v39 = vpop.f32.mrb[25].mxu0 }
 0x3a0   : > { %v3831_v2 = vmax.f32 %v3799_v29, 0.0  ;;  %v5399_v59 = vadd.f32 %v7114_v36, %v3621_v39  ;;  %v5285_v62 = vpop.f32.mrb[26].mxu0 }
 0x3a1   : > { %v3765_v1 = vmul.f32 %v5396_v11, %v7185_v14  ;;  %v5402_v34 = vadd.f32 %v7122_v0, %v5285_v62  ;;  %v3624_v15 = vpop.f32.mrb[27].mxu0  ;;  %v3861_v38 = vpack.c.bf16 %v3833_v52, %v3832_v5 }
 0x3a2   : > { %v3763_v32 = vmul.f32 %v5399_v59, %v7185_v14  ;;  %v5405_v4 = vadd.f32 %v7116_v58, %v3624_v15  ;;  %v3860_v41 = vpack.c.bf16 %v3831_v2, %v3830_v63 }
 0x3a3   : > { %v3804_v26 = vadd.f32 %v7191_v6, %v3765_v1  ;;  %v3766_v28 = vmul.f32 %v5402_v34, %v7185_v14 }
 0x3a4   : > { %v3802_v18 = vadd.f32 %v7191_v6, %v3763_v32  ;;  %v3764_v36 = vmul.f32 %v5405_v4, %v7185_v14  ;;  %5326 = vmatprep.mubr.bf16.mxu1 %v3860_v41 }
 0x3a5   : > { %v3805_v50 = vadd.f32 %v7191_v6, %v3766_v28  ;;  %5327 = vmatmul.mubr.bf16.gmra.mrb[152].mxu1 %v3861_v38  ;;  %v3836_v10 = vmax.f32 %v3804_v26, 0.0 }
 0x3a6   : > { %v3803_v0 = vadd.f32 %v7191_v6, %v3764_v36  ;;  %v5288_v55 = vpop.f32.mrb[28].mxu0  ;;  %v3834_v20 = vmax.f32 %v3802_v18, 0.0 }
 0x3a7   : > { %v3837_v53 = vmax.f32 %v3805_v50, 0.0  ;;  %v5408_v58 = vadd.f32 %v7132_v57, %v5288_v55  ;;  %v3637_v48 = vpop.f32.mrb[29].mxu0 }
 0x3a8   : > { %v3835_v31 = vmax.f32 %v3803_v0, 0.0  ;;  %v5411_v16 = vadd.f32 %v7126_v43, %v3637_v48  ;;  %v5289_v49 = vpop.f32.mrb[30].mxu0 }
 0x3a9   : > { %v3769_v3 = vmul.f32 %v5408_v58, %v7185_v14  ;;  %v5414_v9 = vadd.f32 %v7134_v22, %v5289_v49  ;;  %v3640_v24 = vpop.f32.mrb[31].mxu0  ;;  %v3863_v56 = vpack.c.bf16 %v3837_v53, %v3836_v10 }
 0x3aa   : > { %v3767_v17 = vmul.f32 %v5411_v16, %v7185_v14  ;;  %v5417_v8 = vadd.f32 %v7128_v47, %v3640_v24  ;;  %v3862_v60 = vpack.c.bf16 %v3835_v31, %v3834_v20 }
 0x3ab   : > { %v3808_v21 = vadd.f32 %v7191_v6, %v3769_v3  ;;  %v3770_v57 = vmul.f32 %v5414_v9, %v7185_v14 }
 0x3ac   : > { %v3806_v13 = vadd.f32 %v7191_v6, %v3767_v17  ;;  %v3768_v43 = vmul.f32 %v5417_v8, %v7185_v14  ;;  %5330 = vmatprep.mubr.bf16.mxu1 %v3862_v60 }
 0x3ad   : > { %v3809_v33 = vadd.f32 %v7191_v6, %v3770_v57  ;;  %5331 = vmatmul.mubr.bf16.gmra.mrb[156].mxu1 %v3863_v56  ;;  %v3840_v27 = vmax.f32 %v3808_v21, 0.0 }
 0x3ae   : > { %v3807_v22 = vadd.f32 %v7191_v6, %v3768_v43  ;;  %v5292_v29 = vpop.f32.mrb[32].mxu0  ;;  %v3838_v11 = vmax.f32 %v3806_v13, 0.0 }
 0x3af   : > { %v3841_v5 = vmax.f32 %v3809_v33, 0.0  ;;  %v5420_v47 = vadd.f32 %v7144_v12, %v5292_v29  ;;  %v3653_v52 = vpop.f32.mrb[33].mxu0 }
 0x3b0   : > { %v3839_v39 = vmax.f32 %v3807_v22, 0.0  ;;  %v5423_v63 = vadd.f32 %v7138_v19, %v3653_v52  ;;  %v5293_v2 = vpop.f32.mrb[34].mxu0 }
 0x3b1   : > { %v3773_v59 = vmul.f32 %v5420_v47, %v7185_v14  ;;  %v5426_v62 = vadd.f32 %v7146_v42, %v5293_v2  ;;  %v3656_v1 = vpop.f32.mrb[35].mxu0  ;;  %v3865_v34 = vpack.c.bf16 %v3841_v5, %v3840_v27 }
 0x3b2   : > { %v3771_v15 = vmul.f32 %v5423_v63, %v7185_v14  ;;  %v5429_v38 = vadd.f32 %v7140_v54, %v3656_v1  ;;  %v3864_v32 = vpack.c.bf16 %v3839_v39, %v3838_v11 }
 0x3b3   : > { %v3812_v4 = vadd.f32 %v7191_v6, %v3773_v59  ;;  %v3774_v12 = vmul.f32 %v5426_v62, %v7185_v14 }
 0x3b4   : > { %v3810_v41 = vadd.f32 %v7191_v6, %v3771_v15  ;;  %v3772_v19 = vmul.f32 %v5429_v38, %v7185_v14  ;;  %5334 = vmatprep.mubr.bf16.mxu1 %v3864_v32 }
 0x3b5   : > { %v3813_v26 = vadd.f32 %v7191_v6, %v3774_v12  ;;  %5335 = vmatmul.mubr.bf16.gmra.mrb[160].mxu1 %v3865_v34  ;;  %v3844_v18 = vmax.f32 %v3812_v4, 0.0 }
 0x3b6   : > { %v3811_v42 = vadd.f32 %v7191_v6, %v3772_v19  ;;  %v5296_v28 = vpop.f32.mrb[36].mxu0  ;;  %v3842_v0 = vmax.f32 %v3810_v41, 0.0 }
 0x3b7   : > { %v3845_v36 = vmax.f32 %v3813_v26, 0.0  ;;  %v5432_v54 = vadd.f32 %v7156_v40, %v5296_v28  ;;  %v3669_v50 = vpop.f32.mrb[37].mxu0 }
 0x3b8   : > { %v3843_v55 = vmax.f32 %v3811_v42, 0.0  ;;  %v5435_v10 = vadd.f32 %v7150_v35, %v3669_v50  ;;  %v5297_v53 = vpop.f32.mrb[38].mxu0 }
 0x3b9   : > { %v3777_v58 = vmul.f32 %v5432_v54, %v7185_v14  ;;  %v5438_v48 = vadd.f32 %v7158_v51, %v5297_v53  ;;  %v3672_v20 = vpop.f32.mrb[39].mxu0  ;;  %v3867_v31 = vpack.c.bf16 %v3845_v36, %v3844_v18 }
 0x3ba   : > { %v3775_v16 = vmul.f32 %v5435_v10, %v7185_v14  ;;  %v5441_v49 = vadd.f32 %v7152_v7, %v3672_v20  ;;  %v3866_v3 = vpack.c.bf16 %v3843_v55, %v3842_v0 }
 0x3bb   : > { %v3816_v9 = vadd.f32 %v7191_v6, %v3777_v58  ;;  %v3778_v40 = vmul.f32 %v5438_v48, %v7185_v14  ;;  %v7291_v48 = vld [vmem:[%s7464_s8] ss:$0 sm:$0xff] }
 0x3bc   : > { %v3814_v24 = vadd.f32 %v7191_v6, %v3775_v16  ;;  %v3776_v35 = vmul.f32 %v5441_v49, %v7185_v14  ;;  %5338 = vmatprep.mubr.bf16.mxu1 %v3866_v3 }
 0x3bd   : > { %v3817_v56 = vadd.f32 %v7191_v6, %v3778_v40  ;;  %5339 = vmatmul.mubr.bf16.gmra.mrb[164].mxu1 %v3867_v31  ;;  %v3848_v8 = vmax.f32 %v3816_v9, 0.0 }
 0x3be   : > { %v3815_v51 = vadd.f32 %v7191_v6, %v3776_v35  ;;  %v5300_v17 = vpop.f32.mrb[40].mxu0  ;;  %v3846_v57 = vmax.f32 %v3814_v24, 0.0 }
 0x3bf   : > { %v3849_v60 = vmax.f32 %v3817_v56, 0.0  ;;  %v5444_v7 = vadd.f32 %v7168_v45, %v5300_v17  ;;  %v3685_v21 = vpop.f32.mrb[41].mxu0  ;;  %v5794_v56 = vld [vmem:[#allocation3 + $0x20] sm:$0xff] }
 0x3c0   : > { %v3847_v13 = vmax.f32 %v3815_v51, 0.0  ;;  %v5447_v43 = vadd.f32 %v7162_v25, %v3685_v21  ;;  %v5301_v33 = vpop.f32.mrb[42].mxu0 }
 0x3c1   : > { %v3781_v22 = vmul.f32 %v5444_v7, %v7185_v14  ;;  %v5450_v29 = vadd.f32 %v7170_v44, %v5301_v33  ;;  %v3688_v27 = vpop.f32.mrb[43].mxu0  ;;  %v3869_v5 = vpack.c.bf16 %v3849_v60, %v3848_v8  ;;  %v5795_v8 = vld [vmem:[#allocation3 + $0x10] sm:$0xff]  ;;  %v5797_v33 = vld [vmem:[#allocation3 + $0x18] sm:$0xff] }
 0x3c2   : > { %v3779_v47 = vmul.f32 %v5447_v43, %v7185_v14  ;;  %v5453_v52 = vadd.f32 %v7164_v30, %v3688_v27  ;;  %v3868_v11 = vpack.c.bf16 %v3847_v13, %v3846_v57  ;;  %v5796_v57 = vld [vmem:[#allocation3 + $0x28] sm:$0xff] }
 0x3c3   : > { %v3820_v39 = vadd.f32 %v7191_v6, %v3781_v22  ;;  %v3782_v45 = vmul.f32 %v5450_v29, %v7185_v14 }
 0x3c4   : > { %v3818_v63 = vadd.f32 %v7191_v6, %v3779_v47  ;;  %v3780_v25 = vmul.f32 %v5453_v52, %v7185_v14  ;;  %5342 = vmatprep.mubr.bf16.mxu1 %v3868_v11 }
 0x3c5   : > { %v3821_v2 = vadd.f32 %v7191_v6, %v3782_v45  ;;  %5343 = vmatmul.mubr.bf16.gmra.mrb[168].mxu1 %v3869_v5  ;;  %v3852_v62 = vmax.f32 %v3820_v39, 0.0 }
 0x3c6   : > { %v3819_v44 = vadd.f32 %v7191_v6, %v3780_v25  ;;  %v5304_v59 = vpop.f32.mrb[44].mxu0  ;;  %v3850_v15 = vmax.f32 %v3818_v63, 0.0 }
 0x3c7   : > { %v3853_v1 = vmax.f32 %v3821_v2, 0.0  ;;  %v5456_v30 = vadd.f32 %v7178_v46, %v5304_v59  ;;  %v3701_v34 = vpop.f32.mrb[45].mxu0  ;;  %v5798_v59 = vld [vmem:[#allocation3 + $0x40] sm:$0xff] }
 0x3c8   : > { %v3851_v38 = vmax.f32 %v3819_v44, 0.0  ;;  %v5459_v32 = vadd.f32 %v7174_v37, %v3701_v34  ;;  %v5305_v4 = vpop.f32.mrb[46].mxu0 }
 0x3c9   : > { %v3785_v12 = vmul.f32 %v5456_v30, %v7185_v14  ;;  %v5462_v41 = vadd.f32 %v7180_v23, %v5305_v4  ;;  %v3704_v19 = vpop.f32.mrb[47].mxu0  ;;  %v3871_v26 = vpack.c.bf16 %v3853_v1, %v3852_v62  ;;  %v5799_v30 = vld [vmem:[#allocation3 + $0x30] sm:$0xff] }
 0x3ca   : > { %v3783_v42 = vmul.f32 %v5459_v32, %v7185_v14  ;;  %v5465_v28 = vadd.f32 %v7176_v61, %v3704_v19  ;;  %v3870_v18 = vpack.c.bf16 %v3851_v38, %v3850_v15  ;;  %v5800_v32 = vld [vmem:[#allocation3 + $0x48] sm:$0xff] }
 0x3cb   : > { %v3824_v36 = vadd.f32 %v7191_v6, %v3785_v12  ;;  %v3786_v46 = vmul.f32 %v5462_v41, %v7185_v14  ;;  %v5801_v41 = vld [vmem:[#allocation3 + $0x38] sm:$0xff] }
 0x3cc   : > { %v3822_v54 = vadd.f32 %v7191_v6, %v3783_v42  ;;  %v3784_v37 = vmul.f32 %v5465_v28, %v7185_v14  ;;  %5346 = vmatprep.mubr.bf16.mxu1 %v3870_v18 }
 0x3cd   : > { %v3825_v50 = vadd.f32 %v7191_v6, %v3786_v46  ;;  %5347 = vmatmul.mubr.bf16.gmra.mrb[172].mxu1 %v3871_v26  ;;  %v3856_v0 = vmax.f32 %v3824_v36, 0.0 }
 0x3ce   : > { %v3823_v23 = vadd.f32 %v7191_v6, %v3784_v37  ;;  %v3854_v61 = vmax.f32 %v3822_v54, 0.0  ;;  %v7297_v6 = vld [vmem:[%s7465_s9] ss:$0 sm:$0xff] }
 0x3cf   : > { %v3857_v55 = vmax.f32 %v3825_v50, 0.0 }
 0x3d0   : > { %v3855_v10 = vmax.f32 %v3823_v23, 0.0 }
 0x3d1   : > { %v3873_v53 = vpack.c.bf16 %v3857_v55, %v3856_v0 }
 0x3d2   : > { %v3872_v58 = vpack.c.bf16 %v3855_v10, %v3854_v61  ;;  %v5802_v61 = vld [vmem:[#allocation3 + $0x60] sm:$0xff] }
 0x3d4   : > { %5350 = vmatprep.mubr.bf16.mxu1 %v3872_v58  ;;  %v5803_v58 = vld [vmem:[#allocation3 + $0x50] sm:$0xff] }
 0x3d5   : > { %5351 = vmatmul.mubr.bf16.gmra.mrb[176].mxu1 %v3873_v53 }
 0x470   : > { %v5324_v14 = vpop.f32.mrb[148].mxu1 }
 0x471   : > { %v4108_v20 = vmul.f32 %v5324_v14, %v7291_v48  ;;  %v3972_v31 = vpop.f32.mrb[149].mxu1 }
 0x472   : > { %v4106_v16 = vmul.f32 %v7291_v48, %v3972_v31  ;;  %v5325_v49 = vpop.f32.mrb[150].mxu1 }
 0x473   : > { %v4147_v3 = vadd.f32 %v7297_v6, %v4108_v20  ;;  %v4109_v9 = vmul.f32 %v5325_v49, %v7291_v48  ;;  %v3975_v40 = vpop.f32.mrb[151].mxu1 }
 0x474   : > { %v4145_v24 = vadd.f32 %v7297_v6, %v4106_v16  ;;  %v4107_v35 = vmul.f32 %v7291_v48, %v3975_v40  ;;  %v5804_v16 = vld [vmem:[#allocation3 + $0x68] sm:$0xff] }
 0x475   : > { %v4179_v51 = vadd.f32 %v5794_v56, %v4147_v3  ;;  %v4148_v17 = vadd.f32 %v7297_v6, %v4109_v9  ;;  %v5805_v9 = vld [vmem:[#allocation3 + $0x58] sm:$0xff] }
 0x476   : > { %v4177_v60 = vadd.f32 %v5795_v8, %v4145_v24  ;;  %v4146_v7 = vadd.f32 %v7297_v6, %v4107_v35 }
 0x477   : > { %v4211_v21 = vmax.f32 %v4179_v51, 0.0  ;;  %v4180_v13 = vadd.f32 %v5796_v57, %v4148_v17 }
 0x478   : > { %v4209_v43 = vmax.f32 %v4177_v60, 0.0  ;;  %v4178_v22 = vadd.f32 %v5797_v33, %v4146_v7  ;;  %v5328_v29 = vpop.f32.mrb[152].mxu1  ;;  %v5806_v33 = vld [vmem:[#allocation3 + $0x80] sm:$0xff] }
 0x479   : > { %4243 = vst [vmem:[%s7309_s12 + $0x10] sm:$0xff] %v4211_v21  ;;  %v4212_v27 = vmax.f32 %v4180_v13, 0.0  ;;  %v4112_v5 = vmul.f32 %v5328_v29, %v7291_v48  ;;  %v3988_v47 = vpop.f32.mrb[153].mxu1 }
 0x47a   : > { %4241 = vst [vmem:[%s7309_s12] sm:$0xff] %v4209_v43  ;;  %v4210_v52 = vmax.f32 %v4178_v22, 0.0  ;;  %v4110_v11 = vmul.f32 %v7291_v48, %v3988_v47  ;;  %v5329_v39 = vpop.f32.mrb[154].mxu1 }
 0x47b   : > { %4244 = vst [vmem:[%s7309_s12 + $0x18] sm:$0xff] %v4212_v27  ;;  %v4151_v45 = vadd.f32 %v7297_v6, %v4112_v5  ;;  %v4113_v63 = vmul.f32 %v5329_v39, %v7291_v48  ;;  %v3991_v25 = vpop.f32.mrb[155].mxu1  ;;  %v5807_v27 = vld [vmem:[#allocation3 + $0x70] sm:$0xff] }
 0x47c   : > { %4242 = vst [vmem:[%s7309_s12 + $0x8] sm:$0xff] %v4210_v52  ;;  %v4149_v2 = vadd.f32 %v7297_v6, %v4110_v11  ;;  %v4111_v44 = vmul.f32 %v7291_v48, %v3991_v25  ;;  %v5808_v11 = vld [vmem:[#allocation3 + $0x88] sm:$0xff] }
 0x47d   : > { %v4183_v62 = vadd.f32 %v5798_v59, %v4151_v45  ;;  %v4152_v1 = vadd.f32 %v7297_v6, %v4113_v63  ;;  %v5809_v63 = vld [vmem:[#allocation3 + $0x78] sm:$0xff] }
 0x47e   : > { %v4181_v34 = vadd.f32 %v5799_v30, %v4149_v2  ;;  %v4150_v15 = vadd.f32 %v7297_v6, %v4111_v44 }
 0x47f   : > { %v4215_v38 = vmax.f32 %v4183_v62, 0.0  ;;  %v4184_v4 = vadd.f32 %v5800_v32, %v4152_v1 }
 0x480   : > { %v4213_v12 = vmax.f32 %v4181_v34, 0.0  ;;  %v4182_v19 = vadd.f32 %v5801_v41, %v4150_v15  ;;  %v5332_v26 = vpop.f32.mrb[156].mxu1  ;;  %v5810_v41 = vld [vmem:[#allocation3 + $0xa0] sm:$0xff] }
 0x481   : > { %4247 = vst [vmem:[%s7309_s12 + $0x30] sm:$0xff] %v4215_v38  ;;  %v4216_v42 = vmax.f32 %v4184_v4, 0.0  ;;  %v4116_v28 = vmul.f32 %v5332_v26, %v7291_v48  ;;  %v4004_v18 = vpop.f32.mrb[157].mxu1 }
 0x482   : > { %4245 = vst [vmem:[%s7309_s12 + $0x20] sm:$0xff] %v4213_v12  ;;  %v4214_v36 = vmax.f32 %v4182_v19, 0.0  ;;  %v4114_v46 = vmul.f32 %v7291_v48, %v4004_v18  ;;  %v5333_v54 = vpop.f32.mrb[158].mxu1 }
 0x483   : > { %4248 = vst [vmem:[%s7309_s12 + $0x38] sm:$0xff] %v4216_v42  ;;  %v4155_v37 = vadd.f32 %v7297_v6, %v4116_v28  ;;  %v4117_v50 = vmul.f32 %v5333_v54, %v7291_v48  ;;  %v4007_v23 = vpop.f32.mrb[159].mxu1  ;;  %v5811_v42 = vld [vmem:[#allocation3 + $0x90] sm:$0xff] }
 0x484   : > { %4246 = vst [vmem:[%s7309_s12 + $0x28] sm:$0xff] %v4214_v36  ;;  %v4153_v0 = vadd.f32 %v7297_v6, %v4114_v46  ;;  %v4115_v55 = vmul.f32 %v7291_v48, %v4007_v23  ;;  %v5812_v46 = vld [vmem:[#allocation3 + $0xa8] sm:$0xff] }
 0x485   : > { %v4187_v10 = vadd.f32 %v5802_v61, %v4155_v37  ;;  %v4156_v53 = vadd.f32 %v7297_v6, %v4117_v50  ;;  %v5813_v50 = vld [vmem:[#allocation3 + $0x98] sm:$0xff] }
 0x486   : > { %v4185_v14 = vadd.f32 %v5803_v58, %v4153_v0  ;;  %v4154_v20 = vadd.f32 %v7297_v6, %v4115_v55 }
 0x487   : > { %v4219_v31 = vmax.f32 %v4187_v10, 0.0  ;;  %v4188_v49 = vadd.f32 %v5804_v16, %v4156_v53 }
 0x488   : > { %v4217_v3 = vmax.f32 %v4185_v14, 0.0  ;;  %v4186_v40 = vadd.f32 %v5805_v9, %v4154_v20  ;;  %v5336_v24 = vpop.f32.mrb[160].mxu1  ;;  %v5814_v9 = vld [vmem:[#allocation3 + $0xc0] sm:$0xff] }
 0x489   : > { %4251 = vst [vmem:[%s7309_s12 + $0x50] sm:$0xff] %v4219_v31  ;;  %v4220_v35 = vmax.f32 %v4188_v49, 0.0  ;;  %v4120_v56 = vmul.f32 %v5336_v24, %v7291_v48  ;;  %v4020_v51 = vpop.f32.mrb[161].mxu1 }
 0x48a   : > { %4249 = vst [vmem:[%s7309_s12 + $0x40] sm:$0xff] %v4217_v3  ;;  %v4218_v17 = vmax.f32 %v4186_v40, 0.0  ;;  %v4118_v8 = vmul.f32 %v7291_v48, %v4020_v51  ;;  %v5337_v60 = vpop.f32.mrb[162].mxu1 }
 0x48b   : > { %4252 = vst [vmem:[%s7309_s12 + $0x58] sm:$0xff] %v4220_v35  ;;  %v4159_v7 = vadd.f32 %v7297_v6, %v4120_v56  ;;  %v4121_v21 = vmul.f32 %v5337_v60, %v7291_v48  ;;  %v4023_v57 = vpop.f32.mrb[163].mxu1  ;;  %v5815_v35 = vld [vmem:[#allocation3 + $0xb0] sm:$0xff] }
 0x48c   : > { %4250 = vst [vmem:[%s7309_s12 + $0x48] sm:$0xff] %v4218_v17  ;;  %v4157_v13 = vadd.f32 %v7297_v6, %v4118_v8  ;;  %v4119_v43 = vmul.f32 %v7291_v48, %v4023_v57  ;;  %v5816_v8 = vld [vmem:[#allocation3 + $0xc8] sm:$0xff] }
 0x48d   : > { %v4191_v22 = vadd.f32 %v5806_v33, %v4159_v7  ;;  %v4160_v29 = vadd.f32 %v7297_v6, %v4121_v21  ;;  %v5817_v21 = vld [vmem:[#allocation3 + $0xb8] sm:$0xff] }
 0x48e   : > { %v4189_v5 = vadd.f32 %v5807_v27, %v4157_v13  ;;  %v4158_v47 = vadd.f32 %v7297_v6, %v4119_v43 }
 0x48f   : > { %v4223_v52 = vmax.f32 %v4191_v22, 0.0  ;;  %v4192_v39 = vadd.f32 %v5808_v11, %v4160_v29 }
 0x490   : > { %v4221_v45 = vmax.f32 %v4189_v5, 0.0  ;;  %v4190_v25 = vadd.f32 %v5809_v63, %v4158_v47  ;;  %v5340_v2 = vpop.f32.mrb[164].mxu1  ;;  %v5818_v63 = vld [vmem:[#allocation3 + $0xe0] sm:$0xff] }
 0x491   : > { %4255 = vst [vmem:[%s7309_s12 + $0x70] sm:$0xff] %v4223_v52  ;;  %v4224_v44 = vmax.f32 %v4192_v39, 0.0  ;;  %v4124_v59 = vmul.f32 %v5340_v2, %v7291_v48  ;;  %v4036_v62 = vpop.f32.mrb[165].mxu1 }
 0x492   : > { %4253 = vst [vmem:[%s7309_s12 + $0x60] sm:$0xff] %v4221_v45  ;;  %v4222_v1 = vmax.f32 %v4190_v25, 0.0  ;;  %v4122_v30 = vmul.f32 %v7291_v48, %v4036_v62  ;;  %v5341_v34 = vpop.f32.mrb[166].mxu1 }
 0x493   : > { %4256 = vst [vmem:[%s7309_s12 + $0x78] sm:$0xff] %v4224_v44  ;;  %v4163_v15 = vadd.f32 %v7297_v6, %v4124_v59  ;;  %v4125_v38 = vmul.f32 %v5341_v34, %v7291_v48  ;;  %v4039_v32 = vpop.f32.mrb[167].mxu1  ;;  %v5819_v44 = vld [vmem:[#allocation3 + $0xd0] sm:$0xff] }
 0x494   : > { %4254 = vst [vmem:[%s7309_s12 + $0x68] sm:$0xff] %v4222_v1  ;;  %v4161_v4 = vadd.f32 %v7297_v6, %v4122_v30  ;;  %v4123_v12 = vmul.f32 %v7291_v48, %v4039_v32  ;;  %v5820_v30 = vld [vmem:[#allocation3 + $0xe8] sm:$0xff] }
 0x495   : > { %v4195_v19 = vadd.f32 %v5810_v41, %v4163_v15  ;;  %v4164_v26 = vadd.f32 %v7297_v6, %v4125_v38  ;;  %v5821_v38 = vld [vmem:[#allocation3 + $0xd8] sm:$0xff] }
 0x496   : > { %v4193_v28 = vadd.f32 %v5811_v42, %v4161_v4  ;;  %v4162_v18 = vadd.f32 %v7297_v6, %v4123_v12 }
 0x497   : > { %v4227_v36 = vmax.f32 %v4195_v19, 0.0  ;;  %v4196_v54 = vadd.f32 %v5812_v46, %v4164_v26 }
 0x498   : > { %v4225_v37 = vmax.f32 %v4193_v28, 0.0  ;;  %v4194_v23 = vadd.f32 %v5813_v50, %v4162_v18  ;;  %v5344_v0 = vpop.f32.mrb[168].mxu1  ;;  %v5822_v50 = vld [vmem:[#allocation3 + $0x100] sm:$0xff] }
 0x499   : > { %4259 = vst [vmem:[%s7309_s12 + $0x90] sm:$0xff] %v4227_v36  ;;  %v4228_v55 = vmax.f32 %v4196_v54, 0.0  ;;  %v4128_v61 = vmul.f32 %v5344_v0, %v7291_v48  ;;  %v4052_v10 = vpop.f32.mrb[169].mxu1 }
 0x49a   : > { %4257 = vst [vmem:[%s7309_s12 + $0x80] sm:$0xff] %v4225_v37  ;;  %v4226_v53 = vmax.f32 %v4194_v23, 0.0  ;;  %v4126_v58 = vmul.f32 %v7291_v48, %v4052_v10  ;;  %v5345_v14 = vpop.f32.mrb[170].mxu1 }
 0x49b   : > { %4260 = vst [vmem:[%s7309_s12 + $0x98] sm:$0xff] %v4228_v55  ;;  %v4167_v20 = vadd.f32 %v7297_v6, %v4128_v61  ;;  %v4129_v31 = vmul.f32 %v5345_v14, %v7291_v48  ;;  %v4055_v16 = vpop.f32.mrb[171].mxu1  ;;  %v5823_v55 = vld [vmem:[#allocation3 + $0xf0] sm:$0xff] }
 0x49c   : > { %4258 = vst [vmem:[%s7309_s12 + $0x88] sm:$0xff] %v4226_v53  ;;  %v4165_v49 = vadd.f32 %v7297_v6, %v4126_v58  ;;  %v4127_v3 = vmul.f32 %v7291_v48, %v4055_v16  ;;  %v5824_v58 = vld [vmem:[#allocation3 + $0x108] sm:$0xff] }
 0x49d   : > { %v4199_v40 = vadd.f32 %v5814_v9, %v4167_v20  ;;  %v4168_v24 = vadd.f32 %v7297_v6, %v4129_v31 }
 0x49e   : > { %v4197_v56 = vadd.f32 %v5815_v35, %v4165_v49  ;;  %v4166_v51 = vadd.f32 %v7297_v6, %v4127_v3 }
 0x49f   : > { %v4231_v17 = vmax.f32 %v4199_v40, 0.0  ;;  %v4200_v60 = vadd.f32 %v5816_v8, %v4168_v24 }
 0x4a0   : > { %v4229_v7 = vmax.f32 %v4197_v56, 0.0  ;;  %v4198_v57 = vadd.f32 %v5817_v21, %v4166_v51  ;;  %v5348_v13 = vpop.f32.mrb[172].mxu1 }
 0x4a1   : > { %4263 = vst [vmem:[%s7309_s12 + $0xb0] sm:$0xff] %v4231_v17  ;;  %v4232_v43 = vmax.f32 %v4200_v60, 0.0  ;;  %v4132_v33 = vmul.f32 %v5348_v13, %v7291_v48  ;;  %v4068_v22 = vpop.f32.mrb[173].mxu1 }
 0x4a2   : > { %4261 = vst [vmem:[%s7309_s12 + $0xa0] sm:$0xff] %v4229_v7  ;;  %v4230_v29 = vmax.f32 %v4198_v57, 0.0  ;;  %v4130_v27 = vmul.f32 %v7291_v48, %v4068_v22  ;;  %v5349_v5 = vpop.f32.mrb[174].mxu1 }
 0x4a3   : > { %4264 = vst [vmem:[%s7309_s12 + $0xb8] sm:$0xff] %v4232_v43  ;;  %v4171_v47 = vadd.f32 %v7297_v6, %v4132_v33  ;;  %v4133_v52 = vmul.f32 %v5349_v5, %v7291_v48  ;;  %v4071_v11 = vpop.f32.mrb[175].mxu1 }
 0x4a4   : > { %4262 = vst [vmem:[%s7309_s12 + $0xa8] sm:$0xff] %v4230_v29  ;;  %v4169_v39 = vadd.f32 %v7297_v6, %v4130_v27  ;;  %v4131_v45 = vmul.f32 %v7291_v48, %v4071_v11 }
 0x4a5   : > { %v4203_v25 = vadd.f32 %v5818_v63, %v4171_v47  ;;  %v4172_v2 = vadd.f32 %v7297_v6, %v4133_v52 }
 0x4a6   : > { %v4201_v59 = vadd.f32 %v5819_v44, %v4169_v39  ;;  %v4170_v62 = vadd.f32 %v7297_v6, %v4131_v45 }
 0x4a7   : > { %v4235_v1 = vmax.f32 %v4203_v25, 0.0  ;;  %v4204_v34 = vadd.f32 %v5820_v30, %v4172_v2 }
 0x4a8   : > { %v4233_v15 = vmax.f32 %v4201_v59, 0.0  ;;  %v4202_v32 = vadd.f32 %v5821_v38, %v4170_v62  ;;  %v5352_v4 = vpop.f32.mrb[176].mxu1 }
 0x4a9   : > { %4267 = vst [vmem:[%s7309_s12 + $0xd0] sm:$0xff] %v4235_v1  ;;  %v4236_v12 = vmax.f32 %v4204_v34, 0.0  ;;  %v4136_v41 = vmul.f32 %v5352_v4, %v7291_v48  ;;  %v4084_v19 = vpop.f32.mrb[177].mxu1 }
 0x4aa   : > { %4265 = vst [vmem:[%s7309_s12 + $0xc0] sm:$0xff] %v4233_v15  ;;  %v4234_v26 = vmax.f32 %v4202_v32, 0.0  ;;  %v4134_v42 = vmul.f32 %v7291_v48, %v4084_v19  ;;  %v5353_v28 = vpop.f32.mrb[178].mxu1 }
 0x4ab   : > { %4268 = vst [vmem:[%s7309_s12 + $0xd8] sm:$0xff] %v4236_v12  ;;  %v4175_v18 = vadd.f32 %v7297_v6, %v4136_v41  ;;  %v4137_v36 = vmul.f32 %v5353_v28, %v7291_v48  ;;  %v4087_v46 = vpop.f32.mrb[179].mxu1 }
 0x4ac   : > { %4266 = vst [vmem:[%s7309_s12 + $0xc8] sm:$0xff] %v4234_v26  ;;  %v4173_v54 = vadd.f32 %v7297_v6, %v4134_v42  ;;  %v4135_v37 = vmul.f32 %v7291_v48, %v4087_v46  ;;  %v5825_v48 = vld [vmem:[#allocation3 + $0xf8] sm:$0xff] }
 0x4ad   : > { %v4207_v23 = vadd.f32 %v5822_v50, %v4175_v18  ;;  %v4176_v0 = vadd.f32 %v7297_v6, %v4137_v36 }
 0x4ae   : > { %v4205_v61 = vadd.f32 %v5823_v55, %v4173_v54  ;;  %v4174_v10 = vadd.f32 %v7297_v6, %v4135_v37 }
 0x4af   : > { %v4239_v53 = vmax.f32 %v4207_v23, 0.0  ;;  %v4208_v14 = vadd.f32 %v5824_v58, %v4176_v0 }
 0x4b0   : > { %v4237_v20 = vmax.f32 %v4205_v61, 0.0  ;;  %v4206_v31 = vadd.f32 %v5825_v48, %v4174_v10 }
 0x4b1   : > { %4271 = vst [vmem:[%s7309_s12 + $0xf0] sm:$0xff] %v4239_v53  ;;  %v4240_v16 = vmax.f32 %v4208_v14, 0.0 }
 0x4b2   : > { %4269 = vst [vmem:[%s7309_s12 + $0xe0] sm:$0xff] %v4237_v20  ;;  %v4238_v6 = vmax.f32 %v4206_v31, 0.0 }
 0x4b3   : > { %4272 = vst [vmem:[%s7309_s12 + $0xf8] sm:$0xff] %v4240_v16 }
 0x4b4   : > { %4270 = vst [vmem:[%s7309_s12 + $0xe8] sm:$0xff] %v4238_v6 }
 0x4b5   : > { %5953 = shalt.err (!%p5950_p6)
}
 0x4b6   : > { %s5954_s20 = scalar_lea.hbm %s7401_s23, 4096  ;;  %s5958_s13 = scalar_lea.hbm %s7466_s10, 8192 }
 0x4b7   : > { %p5955_p2 = scmp.ne.s32.totalorder %s7401_s23, %s5954_s20  ;;  %p5959_p12 = scmp.lt.u32.totalorder %s7401_s23, %s7466_s10 }
 0x4b8   : > { %p5960_p1 = scmp.lt.u32.totalorder %s5958_s13, %s5954_s20  ;;  %p5962_p10 = scmp.lt.u32.totalorder %s5954_s20, %s7401_s23 }
 0x4b9   : > { %p5956_p8 = pnand %p5955_p2, %p7560_p4 }
 0x4ba   : > { %p5961_p5 = por %p5960_p1, %p5959_p12 }
 0x4bb   : > { %p5957_p7 = pneg %p5956_p8 }
 0x4bc   : > { %p5963_p0 = por %p5962_p10, %p5961_p5 }
 0x4be   : > { %p5964_p9 = pnand %p5963_p0, %p5957_p7 }
 0x4c0   : > { %5967 = shalt.err (!%p5964_p9)
}
 0x4c1   : > { %s6042_s11 = smov 128   ;;  %s6043_s28 = smov 8  }
 0x4c2   : > { %5545 = dma.vmem_to_hbm [thread:$0]  (%p7560_p4), %s7403_s18, 4096, %s7401_s23, %s7410_s16, %s6042_s11, %s6042_s11, %s6043_s28  }
 0x4c3 PF: > { %s7561_s22 = sld [smem:[#allocation19_spill]]  ;;  %s7562_s12 = sld [smem:[#allocation16_spill]] }
 0x4c4   : > { %s7563_s25 = sld [smem:[#allocation21_spill]] }
 0x4c9   : > { %p5570_p11 = scmp.ge.s32.totalorder %s7561_s22, 2  ;;  %s4305_s30 = sand.u32 1, %s7562_s12  }
 0x4ca   : > { %p7564_p13 = scmp.ne.s32.totalorder %s7563_s25, 0  ;;  %s4306_s21 = scalar_lea.sflag [#allocation5], %s4305_s30 }
 0x4cc   : > { %p5561_p3 = pnand %p5570_p11, %p7564_p13 }
 0x4ce   : > { %6005 = dma.done.wait (!%p5561_p3), %s4306_s21, 4096  }
 0x4cf   : > { %6007 = vsyncadd (!%p5561_p3), %s4306_s21, 4294963200  ;;  %s26_s18 = sadd.s32 1, %s7561_s22   ;;  %s7565_s24 = sld [smem:[#allocation17_spill]] }
 0x4d0   : > { %p23_p6 = scmp.ge.s32.totalorder %s26_s18, 4   ;;  %s7566_s15 = sld [smem:[#allocation22_spill]] }
 0x4d1   : > { %s7567_s16 = sld [smem:[#allocation18_spill]]  ;;  %s7568_s17 = sld [smem:[#allocation20_spill]] }
 0x4d2   : > { %s7569_s13 = smov %s6014_s14  ;;  %25 = sbr.rel (!%p23_p6) target bundleno = 10 (0xa), region = 118 }
 0x4d5   : > { %s7570_s14 = smov %s7565_s24 }
 0x4d9   :  { %4311 = vsyncpa [#allocation4], 1 }
 0x4da   :  { %4313 = vsyncpa [#allocation4 + $0x1], 1 }
 0x4db   :  { %4314 = vsyncpa [#allocation7], 1 }
 0x4dc   :  { %4315 = vsyncpa [#allocation10], 1 }
 0x4dd   :  { %4316 = vsyncpa [#allocation5], 1 }
 0x4de   :  { %4318 = vsyncpa [#allocation5 + $0x1], 1 }

</bundles_post_ra>
